<compile_context>
chip_gen: v6e
topology: v6e:2x2x1
jax: 0.10.0
libtpu: 0.0.40
codegen_flags: <defaults>
</compile_context>

<pallas_src>
import math

import jax
import jax.numpy as jnp
from jax.experimental import pallas as pl
from jax.experimental.pallas import tpu as pltpu


# ------------------------------ config helpers ------------------------------

def _round_up(x, m):
    return (x + m - 1) // m * m


def _derive_cfg(obs_shape, c1, c2, hidden_dim):
    """Mirrors SmallImpalaCNN.__init__ shape logic."""
    _, H, W = obs_shape
    K1, s1 = (8, 4) if H > 9 else (4, 2)
    K2, s2 = (4, 2) if W > 9 else (2, 1)
    OH1 = (H - K1) // s1 + 1
    OW1 = (W - K1) // s1 + 1
    OH2 = (OH1 - K2) // s2 + 1
    OW2 = (OW1 - K2) // s2 + 1
    return dict(
        Cin=3, H=H, W=W, K1=K1, s1=s1, K2=K2, s2=s2,
        OH1=OH1, OW1=OW1, OH2=OH2, OW2=OW2,
        C1=c1, C2=c2, hidden=hidden_dim,
        Kreal=3 * K1 * K1,
        K1pad=_round_up(3 * K1 * K1, 128),
        C1pad=_round_up(c1, 128),
        C2pad=_round_up(c2, 128),
        Hpad=_round_up(hidden_dim, 128),
    )


def _vmem_budget_bytes():
    """~75% of this chip's physical VMEM; conservative 48 MiB fallback (v7x)."""
    try:
        cap = getattr(pltpu.get_tpu_info(), "vmem_capacity_bytes", None)
        if cap:
            return int(cap) * 3 // 4
    except Exception:
        pass
    return 48 * 1024 * 1024


def _weight_vmem_bytes(cfg):
    return (2 * (cfg["K1pad"] * cfg["C1pad"]
                 + cfg["K2"] * cfg["K2"] * cfg["C1pad"] * cfg["C2pad"]
                 + cfg["OH2"] * cfg["OW2"] * cfg["C2pad"] * cfg["Hpad"])
            + 4 * (cfg["C1pad"] + cfg["C2pad"] + cfg["Hpad"]))


def _choose_batch_tile(n, cfg, vmem_budget):
    """Batch tile: multiple of 16 (bf16 sublane tile), VMEM-aware, <= 256, and
    small enough that batches >= 32 split across >= 2 grid steps (v7x TCs)."""
    P1 = cfg["OH1"] * cfg["OW1"]
    per_row = (2 * P1 * cfg["K1pad"] * 2        # p1 block (bf16, double-buffered)
               + P1 * cfg["C1pad"] * 2          # a1 VMEM scratch (bf16)
               + P1 * cfg["C1pad"] * 4          # conv1 f32 result before staging
               + 2 * cfg["Hpad"] * 4            # output block (f32, double-buffered)
               + (cfg["C2pad"] + cfg["Hpad"]) * 4)  # live f32 accumulators
    avail = vmem_budget - 2 * _weight_vmem_bytes(cfg) - (4 << 20)
    avail = max(avail, per_row * 16)
    max_tile = max(16, (avail // per_row) // 16 * 16)
    n16 = _round_up(max(n, 1), 16)
    tile = min(256, max_tile, n16)
    if n16 >= 32:                               # guarantee grid >= 2
        tile = min(tile, max(16, (n16 // 2) // 16 * 16))
    return tile


def _const_spec(shape, single_buffer):
    """BlockSpec for a grid-invariant (weight/bias) operand."""
    ndim = len(shape)
    index_map = lambda i, _nd=ndim: (0,) * _nd
    if single_buffer:
        # Constant index map -> never re-fetched; the default 2nd buffer is waste.
        return pl.BlockSpec(shape, index_map, pipeline_mode=pl.Buffered(1))
    return pl.BlockSpec(shape, index_map)


# ------------------------------ fused kernel --------------------------------

def _make_fused_kernel(cfg, tile_n):
    OW1 = cfg["OW1"]
    OH2, OW2 = cfg["OH2"], cfg["OW2"]
    K2, s2 = cfg["K2"], cfg["s2"]
    C2pad, Hpad = cfg["C2pad"], cfg["Hpad"]

    def kernel(p1_ref, w1_ref, b1_ref, w2_ref, b2_ref, wf_ref, bf_ref,
               o_ref, a1_ref):
        # conv1 + ReLU: ONE stacked-M matmul over every conv1 output position
        # (M = OH1*OW1*tile_n).  The bf16 result is staged in a VMEM scratch so
        # conv2 taps are predictable aligned loads instead of ~70 live vregs.
        z1 = jnp.dot(p1_ref[...], w1_ref[...],
                     preferred_element_type=jnp.float32)
        a1_ref[...] = jnp.maximum(z1 + b1_ref[...], 0.0).astype(jnp.bfloat16)

        # conv2 + ReLU fused with the fc contraction, one conv2 position at a
        # time.  No lane-concat: conv2 is a sum over its K2*K2 taps, each a
        # (tile_n, C1pad) x (C1pad, C2pad) MXU matmul on a static ref slice.
        # NOTE: taps are zero-padded 16->128 channels (wasted MXU K); repacking
        # the K2^2 taps' real channels into one 128-lane operand would cut
        # conv2 MXU passes ~4x but only pays off at large batch tiles.
        b2 = b2_ref[...]
        acc = jnp.zeros((tile_n, Hpad), jnp.float32)
        for oh2 in range(OH2):
            for ow2 in range(OW2):
                acc2 = jnp.zeros((tile_n, C2pad), jnp.float32)
                for kh in range(K2):
                    for kw in range(K2):
                        pos = (oh2 * s2 + kh) * OW1 + (ow2 * s2 + kw)
                        tap = a1_ref[pl.ds(pos * tile_n, tile_n), :]
                        acc2 = acc2 + jnp.dot(
                            tap, w2_ref[kh, kw],
                            preferred_element_type=jnp.float32)
                a2 = jnp.maximum(acc2 + b2, 0.0).astype(jnp.bfloat16)
                acc = acc + jnp.dot(a2, wf_ref[oh2 * OW2 + ow2],
                                    preferred_element_type=jnp.float32)

        o_ref[...] = jnp.maximum(acc + bf_ref[...], 0.0)   # fc bias + ReLU

    return kernel


# --------------------------- parameter packing -------------------------------

def pack_params(params, obs_shape, hidden_dim):
    """One-time reorder + zero-pad of the PyTorch-layout weights into the
    lane-dense layouts the fused kernel consumes.  Matmul operands are stored
    as bf16 (MXU-native); biases stay f32 (elementwise path)."""
    c1 = params["w1"].shape[0]
    c2 = params["w2"].shape[0]
    cfg = _derive_cfg(obs_shape, c1, c2, hidden_dim)
    K2 = cfg["K2"]
    OH2, OW2 = cfg["OH2"], cfg["OW2"]
    Kreal, K1pad = cfg["Kreal"], cfg["K1pad"]
    C1pad, C2pad, Hpad = cfg["C1pad"], cfg["C2pad"], cfg["Hpad"]

    # conv1 weight (c1, Cin, K1, K1) -> rows (kh, kw, cin), cols padded to 128.
    w1 = jnp.transpose(params["w1"], (2, 3, 1, 0)).reshape(Kreal, c1)
    w1p = jnp.zeros((K1pad, C1pad), jnp.float32).at[:Kreal, :c1].set(w1)
    b1p = jnp.zeros((1, C1pad), jnp.float32).at[0, :c1].set(params["b1"])

    # conv2 weight (c2, c1, K2, K2) -> (K2, K2, C1pad, C2pad) tap matrices.
    w2 = jnp.transpose(params["w2"], (2, 3, 1, 0))               # (K2,K2,c1,c2)
    w2p = jnp.zeros((K2, K2, C1pad, C2pad), jnp.float32)
    w2p = w2p.at[:, :, :c1, :c2].set(w2)
    b2p = jnp.zeros((1, C2pad), jnp.float32).at[0, :c2].set(params["b2"])

    # fc weight (hidden, c2*OH2*OW2) flattened in PyTorch NCHW order ->
    # (OH2*OW2, C2pad, Hpad) so the kernel accumulates per conv2 position.
    wf = params["wf"].reshape(hidden_dim, c2, OH2, OW2)
    wf = jnp.transpose(wf, (2, 3, 1, 0))                         # (OH2,OW2,c2,h)
    wfp = jnp.zeros((OH2, OW2, C2pad, Hpad), jnp.float32)
    wfp = wfp.at[:, :, :c2, :hidden_dim].set(wf).reshape(OH2 * OW2, C2pad, Hpad)
    bfp = jnp.zeros((1, Hpad), jnp.float32).at[0, :hidden_dim].set(params["bf"])

    return dict(cfg=cfg,
                w1p=w1p.astype(jnp.bfloat16), b1p=b1p,
                w2p=w2p.astype(jnp.bfloat16), b2p=b2p,
                wfp=wfp.astype(jnp.bfloat16), bfp=bfp)


# ------------------------------ forward pass ---------------------------------

def build_forward(cfg, single_buffer_weights=True):
    """Returns a single jitted callable:
       (x, w1p, b1p, w2p, b2p, wfp, bfp) -> (N, hidden_dim) f32."""
    vmem_budget = _vmem_budget_bytes()
    Cin, K1, s1 = cfg["Cin"], cfg["K1"], cfg["s1"]
    OH1, OW1 = cfg["OH1"], cfg["OW1"]
    OH2, OW2, K2 = cfg["OH2"], cfg["OW2"], cfg["K2"]
    P1 = OH1 * OW1
    Kreal, K1pad = cfg["Kreal"], cfg["K1pad"]
    C1pad, C2pad, Hpad = cfg["C1pad"], cfg["C2pad"], cfg["Hpad"]

    def fwd(x, w1p, b1p, w2p, b2p, wfp, bfp):
        if x.shape[1] != Cin:                    # matches the PyTorch permute
            x = jnp.transpose(x, (0, 3, 1, 2))
        N = x.shape[0]
        tile_n = _choose_batch_tile(N, cfg, vmem_budget)
        n_pad = _round_up(N, tile_n)
        grid = (n_pad // tile_n,)

        # im2col of the raw input only (conv2 patches are built in VMEM).
        # bf16 halves HBM traffic; everything here fuses inside the jit.
        x_nhwc = jnp.transpose(x, (0, 2, 3, 1)).astype(jnp.bfloat16)
        pieces = [x_nhwc[:, kh:kh + s1 * (OH1 - 1) + 1:s1,
                         kw:kw + s1 * (OW1 - 1) + 1:s1, :]
                  for kh in range(K1) for kw in range(K1)]
        p1 = jnp.concatenate(pieces, axis=-1)            # (N, OH1, OW1, Kreal)
        p1 = p1.reshape(N, P1, Kreal)
        p1 = jnp.pad(p1, ((0, n_pad - N), (0, 0), (0, K1pad - Kreal)))
        # Lay each grid block out as one lane-dense (P1*tile_n, K1pad) slab
        # (rows ordered position-major, batch-minor) so the kernel issues ONE
        # stacked-M conv1 matmul with no in-kernel reshape.
        p1 = p1.reshape(grid[0], tile_n, P1, K1pad)
        p1 = jnp.transpose(p1, (0, 2, 1, 3)).reshape(grid[0], P1 * tile_n, K1pad)

        kernel = _make_fused_kernel(cfg, tile_n)
        flops = 2 * n_pad * (P1 * K1pad * C1pad
                             + OH2 * OW2 * K2 * K2 * C1pad * C2pad
                             + OH2 * OW2 * C2pad * Hpad)
        bytes_accessed = (2 * (p1.size + w1p.size + w2p.size + wfp.size)
                          + 4 * (b1p.size + b2p.size + bfp.size)
                          + 4 * n_pad * Hpad)

        out = pl.pallas_call(
            kernel,
            out_shape=jax.ShapeDtypeStruct((n_pad, Hpad), jnp.float32),
            grid=grid,
            in_specs=[
                pl.BlockSpec((None, P1 * tile_n, K1pad), lambda i: (i, 0, 0)),
                _const_spec(w1p.shape, single_buffer_weights),
                _const_spec(b1p.shape, single_buffer_weights),
                _const_spec(w2p.shape, single_buffer_weights),
                _const_spec(b2p.shape, single_buffer_weights),
                _const_spec(wfp.shape, single_buffer_weights),
                _const_spec(bfp.shape, single_buffer_weights),
            ],
            out_specs=pl.BlockSpec((tile_n, Hpad), lambda i: (i, 0)),
            scratch_shapes=[pltpu.VMEM((P1 * tile_n, C1pad), jnp.bfloat16)],
            compiler_params=pltpu.CompilerParams(
                dimension_semantics=("parallel",),
                vmem_limit_bytes=int(vmem_budget)),
            cost_estimate=pl.CostEstimate(
                flops=flops, transcendentals=0, bytes_accessed=bytes_accessed),
        )(p1, w1p, b1p, w2p, b2p, wfp, bfp)

        return out[:N, :cfg["hidden"]]

    return jax.jit(fwd)


# ---------------------- parameter init (xavier_uniform) ----------------------

def _xavier_uniform(key, shape, fan_in, fan_out, gain):
    bound = gain * math.sqrt(6.0 / (fan_in + fan_out))
    return jax.random.uniform(key, shape, jnp.float32, -bound, bound)


def init_params(key, obs_shape, channel_scale=1, hidden_dim=32):
    """Matches SmallImpalaCNN.__init__ shapes (biases = 0 like the reference)."""
    _, H, W = obs_shape
    K1, s1 = (8, 4) if H > 9 else (4, 2)
    K2, s2 = (4, 2) if W > 9 else (2, 1)
    c1 = 16 * channel_scale
    c2 = 32 * channel_scale
    gain = math.sqrt(2.0)  # nn.init.calculate_gain('relu')
    keys = jax.random.split(key, 3)
    w1 = _xavier_uniform(keys[0], (c1, 3, K1, K1), 3 * K1 * K1, c1 * K1 * K1, gain)
    b1 = jnp.zeros((c1,), jnp.float32)
    w2 = _xavier_uniform(keys[1], (c2, c1, K2, K2), c1 * K2 * K2, c2 * K2 * K2, gain)
    b2 = jnp.zeros((c2,), jnp.float32)
    OH1 = (H - K1) // s1 + 1
    OW1 = (W - K1) // s1 + 1
    OH2 = (OH1 - K2) // s2 + 1
    OW2 = (OW1 - K2) // s2 + 1
    in_features = c2 * OH2 * OW2
    wf = _xavier_uniform(keys[2], (hidden_dim, in_features),
                         in_features, hidden_dim, gain)
    bf = jnp.zeros((hidden_dim,), jnp.float32)
    return dict(w1=w1, b1=b1, s1=s1, w2=w2, b2=b2, s2=s2, wf=wf, bf=bf)


# ------------------------- pure-JAX reference (check) ------------------------

def _ref_forward(params, x):
    if x.shape[1] != 3:
        x = jnp.transpose(x, (0, 3, 1, 2))
    for w, b, s in ((params["w1"], params["b1"], params["s1"]),
                    (params["w2"], params["b2"], params["s2"])):
        dn = jax.lax.conv_dimension_numbers(x.shape, w.shape,
                                            ("NCHW", "OIHW", "NCHW"))
        x = jax.lax.conv_general_dilated(x, w, (s, s), "VALID",
                                         dimension_numbers=dn)
        x = jnp.maximum(x + b[None, :, None, None], 0.0)
    x = x.reshape(x.shape[0], -1)
    return jnp.maximum(x @ params["wf"].T + params["bf"], 0.0)


# ---------------------------------- main -------------------------------------

if __name__ == "__main__":
    key = jax.random.PRNGKey(0)
    pkey, xkey = jax.random.split(key)

    obs_shape = (3, 8, 8)      # -> kernel1=4/stride1=2, kernel2=2/stride2=1
    hidden_dim = 32
    params = init_params(pkey, obs_shape, channel_scale=1, hidden_dim=hidden_dim)
    packed = pack_params(params, obs_shape, hidden_dim)

    x = jax.random.uniform(xkey, (2, *obs_shape), jnp.float32)   # (2,3,8,8) NCHW
    weights = (packed["w1p"], packed["b1p"], packed["w2p"], packed["b2p"],
               packed["wfp"], packed["bfp"])

    try:
        fwd = build_forward(packed["cfg"], single_buffer_weights=True)
        out = jax.block_until_ready(fwd(x, *weights))
    except Exception:
        # pl.Buffered(1) rejected by this build -> fall back to default
        # double-buffered weight operands (identical semantics).
        fwd = build_forward(packed["cfg"], single_buffer_weights=False)
        out = jax.block_until_ready(fwd(x, *weights))

    assert out.shape == (2, hidden_dim), out.shape
    ref = _ref_forward(params, x)
    max_err = float(jnp.max(jnp.abs(out - ref)))
    tol = 1e-2 + 2e-2 * float(jnp.max(jnp.abs(ref)))   # bf16 MXU operands
    assert max_err < tol, f"mismatch vs reference: {max_err} (tol {tol})"

    print("KERNEL_OK")
</pallas_src>

<mosaic_0001>
module attributes {stable_mosaic.version = 11 : i64} {
  func.func @kernel(%arg0: i32, %arg1: memref<1x144x128xbf16, #tpu.memory_space<vmem>>, %arg2: memref<128x128xbf16, #tpu.memory_space<vmem>>, %arg3: memref<1x128xf32, #tpu.memory_space<vmem>>, %arg4: memref<2x2x128x128xbf16, #tpu.memory_space<vmem>>, %arg5: memref<1x128xf32, #tpu.memory_space<vmem>>, %arg6: memref<4x128x128xbf16, #tpu.memory_space<vmem>>, %arg7: memref<1x128xf32, #tpu.memory_space<vmem>>, %arg8: memref<16x128xf32, #tpu.memory_space<vmem>>, %arg9: memref<144x128xbf16, #tpu.memory_space<vmem>>) attributes {dimension_semantics = [#tpu.dimension_semantics<parallel>], iteration_bounds = array<i64: 1>, scalar_prefetch = 0 : i64, scratch_operands = 1 : i64, tpu.core_type = #tpu.core_type<tc>, window_params = [{transform_indices = @transform_0, window_bounds = array<i64: 1, 144, 128>}, {pipeline_mode = #tpu.pipeline_mode<synchronous>, transform_indices = @transform_1, window_bounds = array<i64: 128, 128>}, {pipeline_mode = #tpu.pipeline_mode<synchronous>, transform_indices = @transform_2, window_bounds = array<i64: 1, 128>}, {pipeline_mode = #tpu.pipeline_mode<synchronous>, transform_indices = @transform_3, window_bounds = array<i64: 2, 2, 128, 128>}, {pipeline_mode = #tpu.pipeline_mode<synchronous>, transform_indices = @transform_4, window_bounds = array<i64: 1, 128>}, {pipeline_mode = #tpu.pipeline_mode<synchronous>, transform_indices = @transform_5, window_bounds = array<i64: 4, 128, 128>}, {pipeline_mode = #tpu.pipeline_mode<synchronous>, transform_indices = @transform_6, window_bounds = array<i64: 1, 128>}, {transform_indices = @transform_7, window_bounds = array<i64: 16, 128>}]} {
    %c0 = arith.constant 0 : index
    %c0_0 = arith.constant 0 : index
    %c0_1 = arith.constant 0 : index
    %0 = vector.load %arg1[%c0, %c0_0, %c0_1] : memref<1x144x128xbf16, #tpu.memory_space<vmem>>, vector<1x144x128xbf16>
    %1 = vector.shape_cast %0 : vector<1x144x128xbf16> to vector<144x128xbf16>
    %c0_2 = arith.constant 0 : index
    %c0_3 = arith.constant 0 : index
    %2 = vector.load %arg2[%c0_2, %c0_3] : memref<128x128xbf16, #tpu.memory_space<vmem>>, vector<128x128xbf16>
    %cst = arith.constant dense<0.000000e+00> : vector<144x128xf32>
    %3 = tpu.matmul %1, %2, %cst {dimension_numbers = #tpu.dot_dimension_numbers<[1], [0], [0], [1], [0, 0, 1, 1], [], []>} : vector<144x128xbf16>, vector<128x128xbf16>, vector<144x128xf32> -> vector<144x128xf32>
    %c0_4 = arith.constant 0 : index
    %c0_5 = arith.constant 0 : index
    %4 = vector.load %arg3[%c0_4, %c0_5] : memref<1x128xf32, #tpu.memory_space<vmem>>, vector<1x128xf32>
    %5 = vector.broadcast %4 : vector<1x128xf32> to vector<144x128xf32>
    %6 = arith.addf %3, %5 : vector<144x128xf32>
    %cst_6 = arith.constant 0.000000e+00 : f32
    %7 = vector.broadcast %cst_6 : f32 to vector<144x128xf32>
    %8 = arith.maximumf %6, %7 : vector<144x128xf32>
    %9 = arith.truncf %8 : vector<144x128xf32> to vector<144x128xbf16>
    %c0_7 = arith.constant 0 : index
    %c0_8 = arith.constant 0 : index
    %10 = vector.load %arg9[%c0_7, %c0_8] : memref<144x128xbf16, #tpu.memory_space<vmem>>, vector<144x128xbf16>
    tpu.vector_store %arg9[%c0_7, %c0_8], %9 {strides = array<i32>} : memref<144x128xbf16, #tpu.memory_space<vmem>>, vector<144x128xbf16>,
    %c0_9 = arith.constant 0 : index
    %c0_10 = arith.constant 0 : index
    %11 = vector.load %arg5[%c0_9, %c0_10] : memref<1x128xf32, #tpu.memory_space<vmem>>, vector<1x128xf32>
    %cst_11 = arith.constant 0.000000e+00 : f32
    %12 = vector.broadcast %cst_11 : f32 to vector<16x128xf32>
    %cst_12 = arith.constant 0.000000e+00 : f32
    %13 = vector.broadcast %cst_12 : f32 to vector<16x128xf32>
    %c0_13 = arith.constant 0 : index
    %c0_14 = arith.constant 0 : index
    %14 = vector.load %arg9[%c0_13, %c0_14] : memref<144x128xbf16, #tpu.memory_space<vmem>>, vector<16x128xbf16>
    %c0_15 = arith.constant 0 : index
    %c0_16 = arith.constant 0 : index
    %c0_17 = arith.constant 0 : index
    %c0_18 = arith.constant 0 : index
    %15 = vector.load %arg4[%c0_15, %c0_16, %c0_17, %c0_18] : memref<2x2x128x128xbf16, #tpu.memory_space<vmem>>, vector<1x1x128x128xbf16>
    %16 = vector.shape_cast %15 : vector<1x1x128x128xbf16> to vector<128x128xbf16>
    %cst_19 = arith.constant dense<0.000000e+00> : vector<16x128xf32>
    %17 = tpu.matmul %14, %16, %cst_19 {dimension_numbers = #tpu.dot_dimension_numbers<[1], [0], [0], [1], [0, 0, 1, 1], [], []>} : vector<16x128xbf16>, vector<128x128xbf16>, vector<16x128xf32> -> vector<16x128xf32>
    %18 = arith.addf %13, %17 : vector<16x128xf32>
    %c16 = arith.constant 16 : index
    %c0_20 = arith.constant 0 : index
    %19 = vector.load %arg9[%c16, %c0_20] : memref<144x128xbf16, #tpu.memory_space<vmem>>, vector<16x128xbf16>
    %c0_21 = arith.constant 0 : index
    %c1 = arith.constant 1 : index
    %c0_22 = arith.constant 0 : index
    %c0_23 = arith.constant 0 : index
    %20 = vector.load %arg4[%c0_21, %c1, %c0_22, %c0_23] : memref<2x2x128x128xbf16, #tpu.memory_space<vmem>>, vector<1x1x128x128xbf16>
    %21 = vector.shape_cast %20 : vector<1x1x128x128xbf16> to vector<128x128xbf16>
    %cst_24 = arith.constant dense<0.000000e+00> : vector<16x128xf32>
    %22 = tpu.matmul %19, %21, %cst_24 {dimension_numbers = #tpu.dot_dimension_numbers<[1], [0], [0], [1], [0, 0, 1, 1], [], []>} : vector<16x128xbf16>, vector<128x128xbf16>, vector<16x128xf32> -> vector<16x128xf32>
    %23 = arith.addf %18, %22 : vector<16x128xf32>
    %c48 = arith.constant 48 : index
    %c0_25 = arith.constant 0 : index
    %24 = vector.load %arg9[%c48, %c0_25] : memref<144x128xbf16, #tpu.memory_space<vmem>>, vector<16x128xbf16>
    %c1_26 = arith.constant 1 : index
    %c0_27 = arith.constant 0 : index
    %c0_28 = arith.constant 0 : index
    %c0_29 = arith.constant 0 : index
    %25 = vector.load %arg4[%c1_26, %c0_27, %c0_28, %c0_29] : memref<2x2x128x128xbf16, #tpu.memory_space<vmem>>, vector<1x1x128x128xbf16>
    %26 = vector.shape_cast %25 : vector<1x1x128x128xbf16> to vector<128x128xbf16>
    %cst_30 = arith.constant dense<0.000000e+00> : vector<16x128xf32>
    %27 = tpu.matmul %24, %26, %cst_30 {dimension_numbers = #tpu.dot_dimension_numbers<[1], [0], [0], [1], [0, 0, 1, 1], [], []>} : vector<16x128xbf16>, vector<128x128xbf16>, vector<16x128xf32> -> vector<16x128xf32>
    %28 = arith.addf %23, %27 : vector<16x128xf32>
    %c64 = arith.constant 64 : index
    %c0_31 = arith.constant 0 : index
    %29 = vector.load %arg9[%c64, %c0_31] : memref<144x128xbf16, #tpu.memory_space<vmem>>, vector<16x128xbf16>
    %c1_32 = arith.constant 1 : index
    %c1_33 = arith.constant 1 : index
    %c0_34 = arith.constant 0 : index
    %c0_35 = arith.constant 0 : index
    %30 = vector.load %arg4[%c1_32, %c1_33, %c0_34, %c0_35] : memref<2x2x128x128xbf16, #tpu.memory_space<vmem>>, vector<1x1x128x128xbf16>
    %31 = vector.shape_cast %30 : vector<1x1x128x128xbf16> to vector<128x128xbf16>
    %cst_36 = arith.constant dense<0.000000e+00> : vector<16x128xf32>
    %32 = tpu.matmul %29, %31, %cst_36 {dimension_numbers = #tpu.dot_dimension_numbers<[1], [0], [0], [1], [0, 0, 1, 1], [], []>} : vector<16x128xbf16>, vector<128x128xbf16>, vector<16x128xf32> -> vector<16x128xf32>
    %33 = arith.addf %28, %32 : vector<16x128xf32>
    %34 = vector.broadcast %11 : vector<1x128xf32> to vector<16x128xf32>
    %35 = arith.addf %33, %34 : vector<16x128xf32>
    %cst_37 = arith.constant 0.000000e+00 : f32
    %36 = vector.broadcast %cst_37 : f32 to vector<16x128xf32>
    %37 = arith.maximumf %35, %36 : vector<16x128xf32>
    %38 = arith.truncf %37 : vector<16x128xf32> to vector<16x128xbf16>
    %c0_38 = arith.constant 0 : index
    %c0_39 = arith.constant 0 : index
    %c0_40 = arith.constant 0 : index
    %39 = vector.load %arg6[%c0_38, %c0_39, %c0_40] : memref<4x128x128xbf16, #tpu.memory_space<vmem>>, vector<1x128x128xbf16>
    %40 = vector.shape_cast %39 : vector<1x128x128xbf16> to vector<128x128xbf16>
    %cst_41 = arith.constant dense<0.000000e+00> : vector<16x128xf32>
    %41 = tpu.matmul %38, %40, %cst_41 {dimension_numbers = #tpu.dot_dimension_numbers<[1], [0], [0], [1], [0, 0, 1, 1], [], []>} : vector<16x128xbf16>, vector<128x128xbf16>, vector<16x128xf32> -> vector<16x128xf32>
    %42 = arith.addf %12, %41 : vector<16x128xf32>
    %cst_42 = arith.constant 0.000000e+00 : f32
    %43 = vector.broadcast %cst_42 : f32 to vector<16x128xf32>
    %c16_43 = arith.constant 16 : index
    %c0_44 = arith.constant 0 : index
    %44 = vector.load %arg9[%c16_43, %c0_44] : memref<144x128xbf16, #tpu.memory_space<vmem>>, vector<16x128xbf16>
    %c0_45 = arith.constant 0 : index
    %c0_46 = arith.constant 0 : index
    %c0_47 = arith.constant 0 : index
    %c0_48 = arith.constant 0 : index
    %45 = vector.load %arg4[%c0_45, %c0_46, %c0_47, %c0_48] : memref<2x2x128x128xbf16, #tpu.memory_space<vmem>>, vector<1x1x128x128xbf16>
    %46 = vector.shape_cast %45 : vector<1x1x128x128xbf16> to vector<128x128xbf16>
    %cst_49 = arith.constant dense<0.000000e+00> : vector<16x128xf32>
    %47 = tpu.matmul %44, %46, %cst_49 {dimension_numbers = #tpu.dot_dimension_numbers<[1], [0], [0], [1], [0, 0, 1, 1], [], []>} : vector<16x128xbf16>, vector<128x128xbf16>, vector<16x128xf32> -> vector<16x128xf32>
    %48 = arith.addf %43, %47 : vector<16x128xf32>
    %c32 = arith.constant 32 : index
    %c0_50 = arith.constant 0 : index
    %49 = vector.load %arg9[%c32, %c0_50] : memref<144x128xbf16, #tpu.memory_space<vmem>>, vector<16x128xbf16>
    %c0_51 = arith.constant 0 : index
    %c1_52 = arith.constant 1 : index
    %c0_53 = arith.constant 0 : index
    %c0_54 = arith.constant 0 : index
    %50 = vector.load %arg4[%c0_51, %c1_52, %c0_53, %c0_54] : memref<2x2x128x128xbf16, #tpu.memory_space<vmem>>, vector<1x1x128x128xbf16>
    %51 = vector.shape_cast %50 : vector<1x1x128x128xbf16> to vector<128x128xbf16>
    %cst_55 = arith.constant dense<0.000000e+00> : vector<16x128xf32>
    %52 = tpu.matmul %49, %51, %cst_55 {dimension_numbers = #tpu.dot_dimension_numbers<[1], [0], [0], [1], [0, 0, 1, 1], [], []>} : vector<16x128xbf16>, vector<128x128xbf16>, vector<16x128xf32> -> vector<16x128xf32>
    %53 = arith.addf %48, %52 : vector<16x128xf32>
    %c64_56 = arith.constant 64 : index
    %c0_57 = arith.constant 0 : index
    %54 = vector.load %arg9[%c64_56, %c0_57] : memref<144x128xbf16, #tpu.memory_space<vmem>>, vector<16x128xbf16>
    %c1_58 = arith.constant 1 : index
    %c0_59 = arith.constant 0 : index
    %c0_60 = arith.constant 0 : index
    %c0_61 = arith.constant 0 : index
    %55 = vector.load %arg4[%c1_58, %c0_59, %c0_60, %c0_61] : memref<2x2x128x128xbf16, #tpu.memory_space<vmem>>, vector<1x1x128x128xbf16>
    %56 = vector.shape_cast %55 : vector<1x1x128x128xbf16> to vector<128x128xbf16>
    %cst_62 = arith.constant dense<0.000000e+00> : vector<16x128xf32>
    %57 = tpu.matmul %54, %56, %cst_62 {dimension_numbers = #tpu.dot_dimension_numbers<[1], [0], [0], [1], [0, 0, 1, 1], [], []>} : vector<16x128xbf16>, vector<128x128xbf16>, vector<16x128xf32> -> vector<16x128xf32>
    %58 = arith.addf %53, %57 : vector<16x128xf32>
    %c80 = arith.constant 80 : index
    %c0_63 = arith.constant 0 : index
    %59 = vector.load %arg9[%c80, %c0_63] : memref<144x128xbf16, #tpu.memory_space<vmem>>, vector<16x128xbf16>
    %c1_64 = arith.constant 1 : index
    %c1_65 = arith.constant 1 : index
    %c0_66 = arith.constant 0 : index
    %c0_67 = arith.constant 0 : index
    %60 = vector.load %arg4[%c1_64, %c1_65, %c0_66, %c0_67] : memref<2x2x128x128xbf16, #tpu.memory_space<vmem>>, vector<1x1x128x128xbf16>
    %61 = vector.shape_cast %60 : vector<1x1x128x128xbf16> to vector<128x128xbf16>
    %cst_68 = arith.constant dense<0.000000e+00> : vector<16x128xf32>
    %62 = tpu.matmul %59, %61, %cst_68 {dimension_numbers = #tpu.dot_dimension_numbers<[1], [0], [0], [1], [0, 0, 1, 1], [], []>} : vector<16x128xbf16>, vector<128x128xbf16>, vector<16x128xf32> -> vector<16x128xf32>
    %63 = arith.addf %58, %62 : vector<16x128xf32>
    %64 = vector.broadcast %11 : vector<1x128xf32> to vector<16x128xf32>
    %65 = arith.addf %63, %64 : vector<16x128xf32>
    %cst_69 = arith.constant 0.000000e+00 : f32
    %66 = vector.broadcast %cst_69 : f32 to vector<16x128xf32>
    %67 = arith.maximumf %65, %66 : vector<16x128xf32>
    %68 = arith.truncf %67 : vector<16x128xf32> to vector<16x128xbf16>
    %c1_70 = arith.constant 1 : index
    %c0_71 = arith.constant 0 : index
    %c0_72 = arith.constant 0 : index
    %69 = vector.load %arg6[%c1_70, %c0_71, %c0_72] : memref<4x128x128xbf16, #tpu.memory_space<vmem>>, vector<1x128x128xbf16>
    %70 = vector.shape_cast %69 : vector<1x128x128xbf16> to vector<128x128xbf16>
    %cst_73 = arith.constant dense<0.000000e+00> : vector<16x128xf32>
    %71 = tpu.matmul %68, %70, %cst_73 {dimension_numbers = #tpu.dot_dimension_numbers<[1], [0], [0], [1], [0, 0, 1, 1], [], []>} : vector<16x128xbf16>, vector<128x128xbf16>, vector<16x128xf32> -> vector<16x128xf32>
    %72 = arith.addf %42, %71 : vector<16x128xf32>
    %cst_74 = arith.constant 0.000000e+00 : f32
    %73 = vector.broadcast %cst_74 : f32 to vector<16x128xf32>
    %c48_75 = arith.constant 48 : index
    %c0_76 = arith.constant 0 : index
    %74 = vector.load %arg9[%c48_75, %c0_76] : memref<144x128xbf16, #tpu.memory_space<vmem>>, vector<16x128xbf16>
    %c0_77 = arith.constant 0 : index
    %c0_78 = arith.constant 0 : index
    %c0_79 = arith.constant 0 : index
    %c0_80 = arith.constant 0 : index
    %75 = vector.load %arg4[%c0_77, %c0_78, %c0_79, %c0_80] : memref<2x2x128x128xbf16, #tpu.memory_space<vmem>>, vector<1x1x128x128xbf16>
    %76 = vector.shape_cast %75 : vector<1x1x128x128xbf16> to vector<128x128xbf16>
    %cst_81 = arith.constant dense<0.000000e+00> : vector<16x128xf32>
    %77 = tpu.matmul %74, %76, %cst_81 {dimension_numbers = #tpu.dot_dimension_numbers<[1], [0], [0], [1], [0, 0, 1, 1], [], []>} : vector<16x128xbf16>, vector<128x128xbf16>, vector<16x128xf32> -> vector<16x128xf32>
    %78 = arith.addf %73, %77 : vector<16x128xf32>
    %c64_82 = arith.constant 64 : index
    %c0_83 = arith.constant 0 : index
    %79 = vector.load %arg9[%c64_82, %c0_83] : memref<144x128xbf16, #tpu.memory_space<vmem>>, vector<16x128xbf16>
    %c0_84 = arith.constant 0 : index
    %c1_85 = arith.constant 1 : index
    %c0_86 = arith.constant 0 : index
    %c0_87 = arith.constant 0 : index
    %80 = vector.load %arg4[%c0_84, %c1_85, %c0_86, %c0_87] : memref<2x2x128x128xbf16, #tpu.memory_space<vmem>>, vector<1x1x128x128xbf16>
    %81 = vector.shape_cast %80 : vector<1x1x128x128xbf16> to vector<128x128xbf16>
    %cst_88 = arith.constant dense<0.000000e+00> : vector<16x128xf32>
    %82 = tpu.matmul %79, %81, %cst_88 {dimension_numbers = #tpu.dot_dimension_numbers<[1], [0], [0], [1], [0, 0, 1, 1], [], []>} : vector<16x128xbf16>, vector<128x128xbf16>, vector<16x128xf32> -> vector<16x128xf32>
    %83 = arith.addf %78, %82 : vector<16x128xf32>
    %c96 = arith.constant 96 : index
    %c0_89 = arith.constant 0 : index
    %84 = vector.load %arg9[%c96, %c0_89] : memref<144x128xbf16, #tpu.memory_space<vmem>>, vector<16x128xbf16>
    %c1_90 = arith.constant 1 : index
    %c0_91 = arith.constant 0 : index
    %c0_92 = arith.constant 0 : index
    %c0_93 = arith.constant 0 : index
    %85 = vector.load %arg4[%c1_90, %c0_91, %c0_92, %c0_93] : memref<2x2x128x128xbf16, #tpu.memory_space<vmem>>, vector<1x1x128x128xbf16>
    %86 = vector.shape_cast %85 : vector<1x1x128x128xbf16> to vector<128x128xbf16>
    %cst_94 = arith.constant dense<0.000000e+00> : vector<16x128xf32>
    %87 = tpu.matmul %84, %86, %cst_94 {dimension_numbers = #tpu.dot_dimension_numbers<[1], [0], [0], [1], [0, 0, 1, 1], [], []>} : vector<16x128xbf16>, vector<128x128xbf16>, vector<16x128xf32> -> vector<16x128xf32>
    %88 = arith.addf %83, %87 : vector<16x128xf32>
    %c112 = arith.constant 112 : index
    %c0_95 = arith.constant 0 : index
    %89 = vector.load %arg9[%c112, %c0_95] : memref<144x128xbf16, #tpu.memory_space<vmem>>, vector<16x128xbf16>
    %c1_96 = arith.constant 1 : index
    %c1_97 = arith.constant 1 : index
    %c0_98 = arith.constant 0 : index
    %c0_99 = arith.constant 0 : index
    %90 = vector.load %arg4[%c1_96, %c1_97, %c0_98, %c0_99] : memref<2x2x128x128xbf16, #tpu.memory_space<vmem>>, vector<1x1x128x128xbf16>
    %91 = vector.shape_cast %90 : vector<1x1x128x128xbf16> to vector<128x128xbf16>
    %cst_100 = arith.constant dense<0.000000e+00> : vector<16x128xf32>
    %92 = tpu.matmul %89, %91, %cst_100 {dimension_numbers = #tpu.dot_dimension_numbers<[1], [0], [0], [1], [0, 0, 1, 1], [], []>} : vector<16x128xbf16>, vector<128x128xbf16>, vector<16x128xf32> -> vector<16x128xf32>
    %93 = arith.addf %88, %92 : vector<16x128xf32>
    %94 = vector.broadcast %11 : vector<1x128xf32> to vector<16x128xf32>
    %95 = arith.addf %93, %94 : vector<16x128xf32>
    %cst_101 = arith.constant 0.000000e+00 : f32
    %96 = vector.broadcast %cst_101 : f32 to vector<16x128xf32>
    %97 = arith.maximumf %95, %96 : vector<16x128xf32>
    %98 = arith.truncf %97 : vector<16x128xf32> to vector<16x128xbf16>
    %c2 = arith.constant 2 : index
    %c0_102 = arith.constant 0 : index
    %c0_103 = arith.constant 0 : index
    %99 = vector.load %arg6[%c2, %c0_102, %c0_103] : memref<4x128x128xbf16, #tpu.memory_space<vmem>>, vector<1x128x128xbf16>
    %100 = vector.shape_cast %99 : vector<1x128x128xbf16> to vector<128x128xbf16>
    %cst_104 = arith.constant dense<0.000000e+00> : vector<16x128xf32>
    %101 = tpu.matmul %98, %100, %cst_104 {dimension_numbers = #tpu.dot_dimension_numbers<[1], [0], [0], [1], [0, 0, 1, 1], [], []>} : vector<16x128xbf16>, vector<128x128xbf16>, vector<16x128xf32> -> vector<16x128xf32>
    %102 = arith.addf %72, %101 : vector<16x128xf32>
    %cst_105 = arith.constant 0.000000e+00 : f32
    %103 = vector.broadcast %cst_105 : f32 to vector<16x128xf32>
    %c64_106 = arith.constant 64 : index
    %c0_107 = arith.constant 0 : index
    %104 = vector.load %arg9[%c64_106, %c0_107] : memref<144x128xbf16, #tpu.memory_space<vmem>>, vector<16x128xbf16>
    %c0_108 = arith.constant 0 : index
    %c0_109 = arith.constant 0 : index
    %c0_110 = arith.constant 0 : index
    %c0_111 = arith.constant 0 : index
    %105 = vector.load %arg4[%c0_108, %c0_109, %c0_110, %c0_111] : memref<2x2x128x128xbf16, #tpu.memory_space<vmem>>, vector<1x1x128x128xbf16>
    %106 = vector.shape_cast %105 : vector<1x1x128x128xbf16> to vector<128x128xbf16>
    %cst_112 = arith.constant dense<0.000000e+00> : vector<16x128xf32>
    %107 = tpu.matmul %104, %106, %cst_112 {dimension_numbers = #tpu.dot_dimension_numbers<[1], [0], [0], [1], [0, 0, 1, 1], [], []>} : vector<16x128xbf16>, vector<128x128xbf16>, vector<16x128xf32> -> vector<16x128xf32>
    %108 = arith.addf %103, %107 : vector<16x128xf32>
    %c80_113 = arith.constant 80 : index
    %c0_114 = arith.constant 0 : index
    %109 = vector.load %arg9[%c80_113, %c0_114] : memref<144x128xbf16, #tpu.memory_space<vmem>>, vector<16x128xbf16>
    %c0_115 = arith.constant 0 : index
    %c1_116 = arith.constant 1 : index
    %c0_117 = arith.constant 0 : index
    %c0_118 = arith.constant 0 : index
    %110 = vector.load %arg4[%c0_115, %c1_116, %c0_117, %c0_118] : memref<2x2x128x128xbf16, #tpu.memory_space<vmem>>, vector<1x1x128x128xbf16>
    %111 = vector.shape_cast %110 : vector<1x1x128x128xbf16> to vector<128x128xbf16>
    %cst_119 = arith.constant dense<0.000000e+00> : vector<16x128xf32>
    %112 = tpu.matmul %109, %111, %cst_119 {dimension_numbers = #tpu.dot_dimension_numbers<[1], [0], [0], [1], [0, 0, 1, 1], [], []>} : vector<16x128xbf16>, vector<128x128xbf16>, vector<16x128xf32> -> vector<16x128xf32>
    %113 = arith.addf %108, %112 : vector<16x128xf32>
    %c112_120 = arith.constant 112 : index
    %c0_121 = arith.constant 0 : index
    %114 = vector.load %arg9[%c112_120, %c0_121] : memref<144x128xbf16, #tpu.memory_space<vmem>>, vector<16x128xbf16>
    %c1_122 = arith.constant 1 : index
    %c0_123 = arith.constant 0 : index
    %c0_124 = arith.constant 0 : index
    %c0_125 = arith.constant 0 : index
    %115 = vector.load %arg4[%c1_122, %c0_123, %c0_124, %c0_125] : memref<2x2x128x128xbf16, #tpu.memory_space<vmem>>, vector<1x1x128x128xbf16>
    %116 = vector.shape_cast %115 : vector<1x1x128x128xbf16> to vector<128x128xbf16>
    %cst_126 = arith.constant dense<0.000000e+00> : vector<16x128xf32>
    %117 = tpu.matmul %114, %116, %cst_126 {dimension_numbers = #tpu.dot_dimension_numbers<[1], [0], [0], [1], [0, 0, 1, 1], [], []>} : vector<16x128xbf16>, vector<128x128xbf16>, vector<16x128xf32> -> vector<16x128xf32>
    %118 = arith.addf %113, %117 : vector<16x128xf32>
    %c128 = arith.constant 128 : index
    %c0_127 = arith.constant 0 : index
    %119 = vector.load %arg9[%c128, %c0_127] : memref<144x128xbf16, #tpu.memory_space<vmem>>, vector<16x128xbf16>
    %c1_128 = arith.constant 1 : index
    %c1_129 = arith.constant 1 : index
    %c0_130 = arith.constant 0 : index
    %c0_131 = arith.constant 0 : index
    %120 = vector.load %arg4[%c1_128, %c1_129, %c0_130, %c0_131] : memref<2x2x128x128xbf16, #tpu.memory_space<vmem>>, vector<1x1x128x128xbf16>
    %121 = vector.shape_cast %120 : vector<1x1x128x128xbf16> to vector<128x128xbf16>
    %cst_132 = arith.constant dense<0.000000e+00> : vector<16x128xf32>
    %122 = tpu.matmul %119, %121, %cst_132 {dimension_numbers = #tpu.dot_dimension_numbers<[1], [0], [0], [1], [0, 0, 1, 1], [], []>} : vector<16x128xbf16>, vector<128x128xbf16>, vector<16x128xf32> -> vector<16x128xf32>
    %123 = arith.addf %118, %122 : vector<16x128xf32>
    %124 = vector.broadcast %11 : vector<1x128xf32> to vector<16x128xf32>
    %125 = arith.addf %123, %124 : vector<16x128xf32>
    %cst_133 = arith.constant 0.000000e+00 : f32
    %126 = vector.broadcast %cst_133 : f32 to vector<16x128xf32>
    %127 = arith.maximumf %125, %126 : vector<16x128xf32>
    %128 = arith.truncf %127 : vector<16x128xf32> to vector<16x128xbf16>
    %c3 = arith.constant 3 : index
    %c0_134 = arith.constant 0 : index
    %c0_135 = arith.constant 0 : index
    %129 = vector.load %arg6[%c3, %c0_134, %c0_135] : memref<4x128x128xbf16, #tpu.memory_space<vmem>>, vector<1x128x128xbf16>
    %130 = vector.shape_cast %129 : vector<1x128x128xbf16> to vector<128x128xbf16>
    %cst_136 = arith.constant dense<0.000000e+00> : vector<16x128xf32>
    %131 = tpu.matmul %128, %130, %cst_136 {dimension_numbers = #tpu.dot_dimension_numbers<[1], [0], [0], [1], [0, 0, 1, 1], [], []>} : vector<16x128xbf16>, vector<128x128xbf16>, vector<16x128xf32> -> vector<16x128xf32>
    %132 = arith.addf %102, %131 : vector<16x128xf32>
    %c0_137 = arith.constant 0 : index
    %c0_138 = arith.constant 0 : index
    %133 = vector.load %arg7[%c0_137, %c0_138] : memref<1x128xf32, #tpu.memory_space<vmem>>, vector<1x128xf32>
    %134 = vector.broadcast %133 : vector<1x128xf32> to vector<16x128xf32>
    %135 = arith.addf %132, %134 : vector<16x128xf32>
    %cst_139 = arith.constant 0.000000e+00 : f32
    %136 = vector.broadcast %cst_139 : f32 to vector<16x128xf32>
    %137 = arith.maximumf %135, %136 : vector<16x128xf32>
    %c0_140 = arith.constant 0 : index
    %c0_141 = arith.constant 0 : index
    %138 = vector.load %arg8[%c0_140, %c0_141] : memref<16x128xf32, #tpu.memory_space<vmem>>, vector<16x128xf32>
    tpu.vector_store %arg8[%c0_140, %c0_141], %137 {strides = array<i32>} : memref<16x128xf32, #tpu.memory_space<vmem>>, vector<16x128xf32>,
    return
  }
  func.func @transform_0(%arg0: i32) -> (i32, i32, i32) {
    %c0_i32 = arith.constant 0 : i32
    %c0_i32_0 = arith.constant 0 : i32
    %c0_i32_1 = arith.constant 0 : i32
    return %arg0, %c0_i32, %c0_i32_0 : i32, i32, i32
  }
  func.func @transform_1(%arg0: i32) -> (i32, i32) {
    %c0_i32 = arith.constant 0 : i32
    %c0_i32_0 = arith.constant 0 : i32
    %c0_i32_1 = arith.constant 0 : i32
    return %c0_i32, %c0_i32_0 : i32, i32
  }
  func.func @transform_2(%arg0: i32) -> (i32, i32) {
    %c0_i32 = arith.constant 0 : i32
    %c0_i32_0 = arith.constant 0 : i32
    %c0_i32_1 = arith.constant 0 : i32
    return %c0_i32, %c0_i32_0 : i32, i32
  }
  func.func @transform_3(%arg0: i32) -> (i32, i32, i32, i32) {
    %c0_i32 = arith.constant 0 : i32
    %c0_i32_0 = arith.constant 0 : i32
    %c0_i32_1 = arith.constant 0 : i32
    %c0_i32_2 = arith.constant 0 : i32
    %c0_i32_3 = arith.constant 0 : i32
    return %c0_i32, %c0_i32_0, %c0_i32_1, %c0_i32_2 : i32, i32, i32, i32
  }
  func.func @transform_4(%arg0: i32) -> (i32, i32) {
    %c0_i32 = arith.constant 0 : i32
    %c0_i32_0 = arith.constant 0 : i32
    %c0_i32_1 = arith.constant 0 : i32
    return %c0_i32, %c0_i32_0 : i32, i32
  }
  func.func @transform_5(%arg0: i32) -> (i32, i32, i32) {
    %c0_i32 = arith.constant 0 : i32
    %c0_i32_0 = arith.constant 0 : i32
    %c0_i32_1 = arith.constant 0 : i32
    %c0_i32_2 = arith.constant 0 : i32
    return %c0_i32, %c0_i32_0, %c0_i32_1 : i32, i32, i32
  }
  func.func @transform_6(%arg0: i32) -> (i32, i32) {
    %c0_i32 = arith.constant 0 : i32
    %c0_i32_0 = arith.constant 0 : i32
    %c0_i32_1 = arith.constant 0 : i32
    return %c0_i32, %c0_i32_0 : i32, i32
  }
  func.func @transform_7(%arg0: i32) -> (i32, i32) {
    %c0_i32 = arith.constant 0 : i32
    %c0_i32_0 = arith.constant 0 : i32
    return %arg0, %c0_i32 : i32, i32
  }
}

module attributes {stable_mosaic.version = 11 : i64} {
  func.func @kernel(%arg0: i32, %arg1: memref<1x144x128xbf16, #tpu.memory_space<vmem>>, %arg2: memref<128x128xbf16, #tpu.memory_space<vmem>>, %arg3: memref<1x128xf32, #tpu.memory_space<vmem>>, %arg4: memref<2x2x128x128xbf16, #tpu.memory_space<vmem>>, %arg5: memref<1x128xf32, #tpu.memory_space<vmem>>, %arg6: memref<4x128x128xbf16, #tpu.memory_space<vmem>>, %arg7: memref<1x128xf32, #tpu.memory_space<vmem>>, %arg8: memref<16x128xf32, #tpu.memory_space<vmem>>, %arg9: memref<144x128xbf16, #tpu.memory_space<vmem>>) attributes {dimension_semantics = [#tpu.dimension_semantics<parallel>], iteration_bounds = array<i64: 1>, scalar_prefetch = 0 : i64, scratch_operands = 1 : i64, tpu.core_type = #tpu.core_type<tc>, window_params = [{transform_indices = @transform_0, window_bounds = array<i64: 1, 144, 128>}, {pipeline_mode = #tpu.pipeline_mode<synchronous>, transform_indices = @transform_1, window_bounds = array<i64: 128, 128>}, {pipeline_mode = #tpu.pipeline_mode<synchronous>, transform_indices = @transform_2, window_bounds = array<i64: 1, 128>}, {pipeline_mode = #tpu.pipeline_mode<synchronous>, transform_indices = @transform_3, window_bounds = array<i64: 2, 2, 128, 128>}, {pipeline_mode = #tpu.pipeline_mode<synchronous>, transform_indices = @transform_4, window_bounds = array<i64: 1, 128>}, {pipeline_mode = #tpu.pipeline_mode<synchronous>, transform_indices = @transform_5, window_bounds = array<i64: 4, 128, 128>}, {pipeline_mode = #tpu.pipeline_mode<synchronous>, transform_indices = @transform_6, window_bounds = array<i64: 1, 128>}, {transform_indices = @transform_7, window_bounds = array<i64: 16, 128>}]} {
    %c0 = arith.constant 0 : index
    %c0_0 = arith.constant 0 : index
    %c0_1 = arith.constant 0 : index
    %0 = vector.load %arg1[%c0, %c0_0, %c0_1] : memref<1x144x128xbf16, #tpu.memory_space<vmem>>, vector<1x144x128xbf16>
    %1 = vector.shape_cast %0 : vector<1x144x128xbf16> to vector<144x128xbf16>
    %c0_2 = arith.constant 0 : index
    %c0_3 = arith.constant 0 : index
    %2 = vector.load %arg2[%c0_2, %c0_3] : memref<128x128xbf16, #tpu.memory_space<vmem>>, vector<128x128xbf16>
    %cst = arith.constant dense<0.000000e+00> : vector<144x128xf32>
    %3 = tpu.matmul %1, %2, %cst {dimension_numbers = #tpu.dot_dimension_numbers<[1], [0], [0], [1], [0, 0, 1, 1], [], []>} : vector<144x128xbf16>, vector<128x128xbf16>, vector<144x128xf32> -> vector<144x128xf32>
    %c0_4 = arith.constant 0 : index
    %c0_5 = arith.constant 0 : index
    %4 = vector.load %arg3[%c0_4, %c0_5] : memref<1x128xf32, #tpu.memory_space<vmem>>, vector<1x128xf32>
    %5 = vector.broadcast %4 : vector<1x128xf32> to vector<144x128xf32>
    %6 = arith.addf %3, %5 : vector<144x128xf32>
    %cst_6 = arith.constant 0.000000e+00 : f32
    %7 = vector.broadcast %cst_6 : f32 to vector<144x128xf32>
    %8 = arith.maximumf %6, %7 : vector<144x128xf32>
    %9 = arith.truncf %8 : vector<144x128xf32> to vector<144x128xbf16>
    %c0_7 = arith.constant 0 : index
    %c0_8 = arith.constant 0 : index
    %10 = vector.load %arg9[%c0_7, %c0_8] : memref<144x128xbf16, #tpu.memory_space<vmem>>, vector<144x128xbf16>
    tpu.vector_store %arg9[%c0_7, %c0_8], %9 {strides = array<i32>} : memref<144x128xbf16, #tpu.memory_space<vmem>>, vector<144x128xbf16>,
    %c0_9 = arith.constant 0 : index
    %c0_10 = arith.constant 0 : index
    %11 = vector.load %arg5[%c0_9, %c0_10] : memref<1x128xf32, #tpu.memory_space<vmem>>, vector<1x128xf32>
    %cst_11 = arith.constant 0.000000e+00 : f32
    %12 = vector.broadcast %cst_11 : f32 to vector<16x128xf32>
    %cst_12 = arith.constant 0.000000e+00 : f32
    %13 = vector.broadcast %cst_12 : f32 to vector<16x128xf32>
    %c0_13 = arith.constant 0 : index
    %c0_14 = arith.constant 0 : index
    %14 = vector.load %arg9[%c0_13, %c0_14] : memref<144x128xbf16, #tpu.memory_space<vmem>>, vector<16x128xbf16>
    %c0_15 = arith.constant 0 : index
    %c0_16 = arith.constant 0 : index
    %c0_17 = arith.constant 0 : index
    %c0_18 = arith.constant 0 : index
    %15 = vector.load %arg4[%c0_15, %c0_16, %c0_17, %c0_18] : memref<2x2x128x128xbf16, #tpu.memory_space<vmem>>, vector<1x1x128x128xbf16>
    %16 = vector.shape_cast %15 : vector<1x1x128x128xbf16> to vector<128x128xbf16>
    %cst_19 = arith.constant dense<0.000000e+00> : vector<16x128xf32>
    %17 = tpu.matmul %14, %16, %cst_19 {dimension_numbers = #tpu.dot_dimension_numbers<[1], [0], [0], [1], [0, 0, 1, 1], [], []>} : vector<16x128xbf16>, vector<128x128xbf16>, vector<16x128xf32> -> vector<16x128xf32>
    %18 = arith.addf %13, %17 : vector<16x128xf32>
    %c16 = arith.constant 16 : index
    %c0_20 = arith.constant 0 : index
    %19 = vector.load %arg9[%c16, %c0_20] : memref<144x128xbf16, #tpu.memory_space<vmem>>, vector<16x128xbf16>
    %c0_21 = arith.constant 0 : index
    %c1 = arith.constant 1 : index
    %c0_22 = arith.constant 0 : index
    %c0_23 = arith.constant 0 : index
    %20 = vector.load %arg4[%c0_21, %c1, %c0_22, %c0_23] : memref<2x2x128x128xbf16, #tpu.memory_space<vmem>>, vector<1x1x128x128xbf16>
    %21 = vector.shape_cast %20 : vector<1x1x128x128xbf16> to vector<128x128xbf16>
    %cst_24 = arith.constant dense<0.000000e+00> : vector<16x128xf32>
    %22 = tpu.matmul %19, %21, %cst_24 {dimension_numbers = #tpu.dot_dimension_numbers<[1], [0], [0], [1], [0, 0, 1, 1], [], []>} : vector<16x128xbf16>, vector<128x128xbf16>, vector<16x128xf32> -> vector<16x128xf32>
    %23 = arith.addf %18, %22 : vector<16x128xf32>
    %c48 = arith.constant 48 : index
    %c0_25 = arith.constant 0 : index
    %24 = vector.load %arg9[%c48, %c0_25] : memref<144x128xbf16, #tpu.memory_space<vmem>>, vector<16x128xbf16>
    %c1_26 = arith.constant 1 : index
    %c0_27 = arith.constant 0 : index
    %c0_28 = arith.constant 0 : index
    %c0_29 = arith.constant 0 : index
    %25 = vector.load %arg4[%c1_26, %c0_27, %c0_28, %c0_29] : memref<2x2x128x128xbf16, #tpu.memory_space<vmem>>, vector<1x1x128x128xbf16>
    %26 = vector.shape_cast %25 : vector<1x1x128x128xbf16> to vector<128x128xbf16>
    %cst_30 = arith.constant dense<0.000000e+00> : vector<16x128xf32>
    %27 = tpu.matmul %24, %26, %cst_30 {dimension_numbers = #tpu.dot_dimension_numbers<[1], [0], [0], [1], [0, 0, 1, 1], [], []>} : vector<16x128xbf16>, vector<128x128xbf16>, vector<16x128xf32> -> vector<16x128xf32>
    %28 = arith.addf %23, %27 : vector<16x128xf32>
    %c64 = arith.constant 64 : index
    %c0_31 = arith.constant 0 : index
    %29 = vector.load %arg9[%c64, %c0_31] : memref<144x128xbf16, #tpu.memory_space<vmem>>, vector<16x128xbf16>
    %c1_32 = arith.constant 1 : index
    %c1_33 = arith.constant 1 : index
    %c0_34 = arith.constant 0 : index
    %c0_35 = arith.constant 0 : index
    %30 = vector.load %arg4[%c1_32, %c1_33, %c0_34, %c0_35] : memref<2x2x128x128xbf16, #tpu.memory_space<vmem>>, vector<1x1x128x128xbf16>
    %31 = vector.shape_cast %30 : vector<1x1x128x128xbf16> to vector<128x128xbf16>
    %cst_36 = arith.constant dense<0.000000e+00> : vector<16x128xf32>
    %32 = tpu.matmul %29, %31, %cst_36 {dimension_numbers = #tpu.dot_dimension_numbers<[1], [0], [0], [1], [0, 0, 1, 1], [], []>} : vector<16x128xbf16>, vector<128x128xbf16>, vector<16x128xf32> -> vector<16x128xf32>
    %33 = arith.addf %28, %32 : vector<16x128xf32>
    %34 = vector.broadcast %11 : vector<1x128xf32> to vector<16x128xf32>
    %35 = arith.addf %33, %34 : vector<16x128xf32>
    %cst_37 = arith.constant 0.000000e+00 : f32
    %36 = vector.broadcast %cst_37 : f32 to vector<16x128xf32>
    %37 = arith.maximumf %35, %36 : vector<16x128xf32>
    %38 = arith.truncf %37 : vector<16x128xf32> to vector<16x128xbf16>
    %c0_38 = arith.constant 0 : index
    %c0_39 = arith.constant 0 : index
    %c0_40 = arith.constant 0 : index
    %39 = vector.load %arg6[%c0_38, %c0_39, %c0_40] : memref<4x128x128xbf16, #tpu.memory_space<vmem>>, vector<1x128x128xbf16>
    %40 = vector.shape_cast %39 : vector<1x128x128xbf16> to vector<128x128xbf16>
    %cst_41 = arith.constant dense<0.000000e+00> : vector<16x128xf32>
    %41 = tpu.matmul %38, %40, %cst_41 {dimension_numbers = #tpu.dot_dimension_numbers<[1], [0], [0], [1], [0, 0, 1, 1], [], []>} : vector<16x128xbf16>, vector<128x128xbf16>, vector<16x128xf32> -> vector<16x128xf32>
    %42 = arith.addf %12, %41 : vector<16x128xf32>
    %cst_42 = arith.constant 0.000000e+00 : f32
    %43 = vector.broadcast %cst_42 : f32 to vector<16x128xf32>
    %c16_43 = arith.constant 16 : index
    %c0_44 = arith.constant 0 : index
    %44 = vector.load %arg9[%c16_43, %c0_44] : memref<144x128xbf16, #tpu.memory_space<vmem>>, vector<16x128xbf16>
    %c0_45 = arith.constant 0 : index
    %c0_46 = arith.constant 0 : index
    %c0_47 = arith.constant 0 : index
    %c0_48 = arith.constant 0 : index
    %45 = vector.load %arg4[%c0_45, %c0_46, %c0_47, %c0_48] : memref<2x2x128x128xbf16, #tpu.memory_space<vmem>>, vector<1x1x128x128xbf16>
    %46 = vector.shape_cast %45 : vector<1x1x128x128xbf16> to vector<128x128xbf16>
    %cst_49 = arith.constant dense<0.000000e+00> : vector<16x128xf32>
    %47 = tpu.matmul %44, %46, %cst_49 {dimension_numbers = #tpu.dot_dimension_numbers<[1], [0], [0], [1], [0, 0, 1, 1], [], []>} : vector<16x128xbf16>, vector<128x128xbf16>, vector<16x128xf32> -> vector<16x128xf32>
    %48 = arith.addf %43, %47 : vector<16x128xf32>
    %c32 = arith.constant 32 : index
    %c0_50 = arith.constant 0 : index
    %49 = vector.load %arg9[%c32, %c0_50] : memref<144x128xbf16, #tpu.memory_space<vmem>>, vector<16x128xbf16>
    %c0_51 = arith.constant 0 : index
    %c1_52 = arith.constant 1 : index
    %c0_53 = arith.constant 0 : index
    %c0_54 = arith.constant 0 : index
    %50 = vector.load %arg4[%c0_51, %c1_52, %c0_53, %c0_54] : memref<2x2x128x128xbf16, #tpu.memory_space<vmem>>, vector<1x1x128x128xbf16>
    %51 = vector.shape_cast %50 : vector<1x1x128x128xbf16> to vector<128x128xbf16>
    %cst_55 = arith.constant dense<0.000000e+00> : vector<16x128xf32>
    %52 = tpu.matmul %49, %51, %cst_55 {dimension_numbers = #tpu.dot_dimension_numbers<[1], [0], [0], [1], [0, 0, 1, 1], [], []>} : vector<16x128xbf16>, vector<128x128xbf16>, vector<16x128xf32> -> vector<16x128xf32>
    %53 = arith.addf %48, %52 : vector<16x128xf32>
    %c64_56 = arith.constant 64 : index
    %c0_57 = arith.constant 0 : index
    %54 = vector.load %arg9[%c64_56, %c0_57] : memref<144x128xbf16, #tpu.memory_space<vmem>>, vector<16x128xbf16>
    %c1_58 = arith.constant 1 : index
    %c0_59 = arith.constant 0 : index
    %c0_60 = arith.constant 0 : index
    %c0_61 = arith.constant 0 : index
    %55 = vector.load %arg4[%c1_58, %c0_59, %c0_60, %c0_61] : memref<2x2x128x128xbf16, #tpu.memory_space<vmem>>, vector<1x1x128x128xbf16>
    %56 = vector.shape_cast %55 : vector<1x1x128x128xbf16> to vector<128x128xbf16>
    %cst_62 = arith.constant dense<0.000000e+00> : vector<16x128xf32>
    %57 = tpu.matmul %54, %56, %cst_62 {dimension_numbers = #tpu.dot_dimension_numbers<[1], [0], [0], [1], [0, 0, 1, 1], [], []>} : vector<16x128xbf16>, vector<128x128xbf16>, vector<16x128xf32> -> vector<16x128xf32>
    %58 = arith.addf %53, %57 : vector<16x128xf32>
    %c80 = arith.constant 80 : index
    %c0_63 = arith.constant 0 : index
    %59 = vector.load %arg9[%c80, %c0_63] : memref<144x128xbf16, #tpu.memory_space<vmem>>, vector<16x128xbf16>
    %c1_64 = arith.constant 1 : index
    %c1_65 = arith.constant 1 : index
    %c0_66 = arith.constant 0 : index
    %c0_67 = arith.constant 0 : index
    %60 = vector.load %arg4[%c1_64, %c1_65, %c0_66, %c0_67] : memref<2x2x128x128xbf16, #tpu.memory_space<vmem>>, vector<1x1x128x128xbf16>
    %61 = vector.shape_cast %60 : vector<1x1x128x128xbf16> to vector<128x128xbf16>
    %cst_68 = arith.constant dense<0.000000e+00> : vector<16x128xf32>
    %62 = tpu.matmul %59, %61, %cst_68 {dimension_numbers = #tpu.dot_dimension_numbers<[1], [0], [0], [1], [0, 0, 1, 1], [], []>} : vector<16x128xbf16>, vector<128x128xbf16>, vector<16x128xf32> -> vector<16x128xf32>
    %63 = arith.addf %58, %62 : vector<16x128xf32>
    %64 = vector.broadcast %11 : vector<1x128xf32> to vector<16x128xf32>
    %65 = arith.addf %63, %64 : vector<16x128xf32>
    %cst_69 = arith.constant 0.000000e+00 : f32
    %66 = vector.broadcast %cst_69 : f32 to vector<16x128xf32>
    %67 = arith.maximumf %65, %66 : vector<16x128xf32>
    %68 = arith.truncf %67 : vector<16x128xf32> to vector<16x128xbf16>
    %c1_70 = arith.constant 1 : index
    %c0_71 = arith.constant 0 : index
    %c0_72 = arith.constant 0 : index
    %69 = vector.load %arg6[%c1_70, %c0_71, %c0_72] : memref<4x128x128xbf16, #tpu.memory_space<vmem>>, vector<1x128x128xbf16>
    %70 = vector.shape_cast %69 : vector<1x128x128xbf16> to vector<128x128xbf16>
    %cst_73 = arith.constant dense<0.000000e+00> : vector<16x128xf32>
    %71 = tpu.matmul %68, %70, %cst_73 {dimension_numbers = #tpu.dot_dimension_numbers<[1], [0], [0], [1], [0, 0, 1, 1], [], []>} : vector<16x128xbf16>, vector<128x128xbf16>, vector<16x128xf32> -> vector<16x128xf32>
    %72 = arith.addf %42, %71 : vector<16x128xf32>
    %cst_74 = arith.constant 0.000000e+00 : f32
    %73 = vector.broadcast %cst_74 : f32 to vector<16x128xf32>
    %c48_75 = arith.constant 48 : index
    %c0_76 = arith.constant 0 : index
    %74 = vector.load %arg9[%c48_75, %c0_76] : memref<144x128xbf16, #tpu.memory_space<vmem>>, vector<16x128xbf16>
    %c0_77 = arith.constant 0 : index
    %c0_78 = arith.constant 0 : index
    %c0_79 = arith.constant 0 : index
    %c0_80 = arith.constant 0 : index
    %75 = vector.load %arg4[%c0_77, %c0_78, %c0_79, %c0_80] : memref<2x2x128x128xbf16, #tpu.memory_space<vmem>>, vector<1x1x128x128xbf16>
    %76 = vector.shape_cast %75 : vector<1x1x128x128xbf16> to vector<128x128xbf16>
    %cst_81 = arith.constant dense<0.000000e+00> : vector<16x128xf32>
    %77 = tpu.matmul %74, %76, %cst_81 {dimension_numbers = #tpu.dot_dimension_numbers<[1], [0], [0], [1], [0, 0, 1, 1], [], []>} : vector<16x128xbf16>, vector<128x128xbf16>, vector<16x128xf32> -> vector<16x128xf32>
    %78 = arith.addf %73, %77 : vector<16x128xf32>
    %c64_82 = arith.constant 64 : index
    %c0_83 = arith.constant 0 : index
    %79 = vector.load %arg9[%c64_82, %c0_83] : memref<144x128xbf16, #tpu.memory_space<vmem>>, vector<16x128xbf16>
    %c0_84 = arith.constant 0 : index
    %c1_85 = arith.constant 1 : index
    %c0_86 = arith.constant 0 : index
    %c0_87 = arith.constant 0 : index
    %80 = vector.load %arg4[%c0_84, %c1_85, %c0_86, %c0_87] : memref<2x2x128x128xbf16, #tpu.memory_space<vmem>>, vector<1x1x128x128xbf16>
    %81 = vector.shape_cast %80 : vector<1x1x128x128xbf16> to vector<128x128xbf16>
    %cst_88 = arith.constant dense<0.000000e+00> : vector<16x128xf32>
    %82 = tpu.matmul %79, %81, %cst_88 {dimension_numbers = #tpu.dot_dimension_numbers<[1], [0], [0], [1], [0, 0, 1, 1], [], []>} : vector<16x128xbf16>, vector<128x128xbf16>, vector<16x128xf32> -> vector<16x128xf32>
    %83 = arith.addf %78, %82 : vector<16x128xf32>
    %c96 = arith.constant 96 : index
    %c0_89 = arith.constant 0 : index
    %84 = vector.load %arg9[%c96, %c0_89] : memref<144x128xbf16, #tpu.memory_space<vmem>>, vector<16x128xbf16>
    %c1_90 = arith.constant 1 : index
    %c0_91 = arith.constant 0 : index
    %c0_92 = arith.constant 0 : index
    %c0_93 = arith.constant 0 : index
    %85 = vector.load %arg4[%c1_90, %c0_91, %c0_92, %c0_93] : memref<2x2x128x128xbf16, #tpu.memory_space<vmem>>, vector<1x1x128x128xbf16>
    %86 = vector.shape_cast %85 : vector<1x1x128x128xbf16> to vector<128x128xbf16>
    %cst_94 = arith.constant dense<0.000000e+00> : vector<16x128xf32>
    %87 = tpu.matmul %84, %86, %cst_94 {dimension_numbers = #tpu.dot_dimension_numbers<[1], [0], [0], [1], [0, 0, 1, 1], [], []>} : vector<16x128xbf16>, vector<128x128xbf16>, vector<16x128xf32> -> vector<16x128xf32>
    %88 = arith.addf %83, %87 : vector<16x128xf32>
    %c112 = arith.constant 112 : index
    %c0_95 = arith.constant 0 : index
    %89 = vector.load %arg9[%c112, %c0_95] : memref<144x128xbf16, #tpu.memory_space<vmem>>, vector<16x128xbf16>
    %c1_96 = arith.constant 1 : index
    %c1_97 = arith.constant 1 : index
    %c0_98 = arith.constant 0 : index
    %c0_99 = arith.constant 0 : index
    %90 = vector.load %arg4[%c1_96, %c1_97, %c0_98, %c0_99] : memref<2x2x128x128xbf16, #tpu.memory_space<vmem>>, vector<1x1x128x128xbf16>
    %91 = vector.shape_cast %90 : vector<1x1x128x128xbf16> to vector<128x128xbf16>
    %cst_100 = arith.constant dense<0.000000e+00> : vector<16x128xf32>
    %92 = tpu.matmul %89, %91, %cst_100 {dimension_numbers = #tpu.dot_dimension_numbers<[1], [0], [0], [1], [0, 0, 1, 1], [], []>} : vector<16x128xbf16>, vector<128x128xbf16>, vector<16x128xf32> -> vector<16x128xf32>
    %93 = arith.addf %88, %92 : vector<16x128xf32>
    %94 = vector.broadcast %11 : vector<1x128xf32> to vector<16x128xf32>
    %95 = arith.addf %93, %94 : vector<16x128xf32>
    %cst_101 = arith.constant 0.000000e+00 : f32
    %96 = vector.broadcast %cst_101 : f32 to vector<16x128xf32>
    %97 = arith.maximumf %95, %96 : vector<16x128xf32>
    %98 = arith.truncf %97 : vector<16x128xf32> to vector<16x128xbf16>
    %c2 = arith.constant 2 : index
    %c0_102 = arith.constant 0 : index
    %c0_103 = arith.constant 0 : index
    %99 = vector.load %arg6[%c2, %c0_102, %c0_103] : memref<4x128x128xbf16, #tpu.memory_space<vmem>>, vector<1x128x128xbf16>
    %100 = vector.shape_cast %99 : vector<1x128x128xbf16> to vector<128x128xbf16>
    %cst_104 = arith.constant dense<0.000000e+00> : vector<16x128xf32>
    %101 = tpu.matmul %98, %100, %cst_104 {dimension_numbers = #tpu.dot_dimension_numbers<[1], [0], [0], [1], [0, 0, 1, 1], [], []>} : vector<16x128xbf16>, vector<128x128xbf16>, vector<16x128xf32> -> vector<16x128xf32>
    %102 = arith.addf %72, %101 : vector<16x128xf32>
    %cst_105 = arith.constant 0.000000e+00 : f32
    %103 = vector.broadcast %cst_105 : f32 to vector<16x128xf32>
    %c64_106 = arith.constant 64 : index
    %c0_107 = arith.constant 0 : index
    %104 = vector.load %arg9[%c64_106, %c0_107] : memref<144x128xbf16, #tpu.memory_space<vmem>>, vector<16x128xbf16>
    %c0_108 = arith.constant 0 : index
    %c0_109 = arith.constant 0 : index
    %c0_110 = arith.constant 0 : index
    %c0_111 = arith.constant 0 : index
    %105 = vector.load %arg4[%c0_108, %c0_109, %c0_110, %c0_111] : memref<2x2x128x128xbf16, #tpu.memory_space<vmem>>, vector<1x1x128x128xbf16>
    %106 = vector.shape_cast %105 : vector<1x1x128x128xbf16> to vector<128x128xbf16>
    %cst_112 = arith.constant dense<0.000000e+00> : vector<16x128xf32>
    %107 = tpu.matmul %104, %106, %cst_112 {dimension_numbers = #tpu.dot_dimension_numbers<[1], [0], [0], [1], [0, 0, 1, 1], [], []>} : vector<16x128xbf16>, vector<128x128xbf16>, vector<16x128xf32> -> vector<16x128xf32>
    %108 = arith.addf %103, %107 : vector<16x128xf32>
    %c80_113 = arith.constant 80 : index
    %c0_114 = arith.constant 0 : index
    %109 = vector.load %arg9[%c80_113, %c0_114] : memref<144x128xbf16, #tpu.memory_space<vmem>>, vector<16x128xbf16>
    %c0_115 = arith.constant 0 : index
    %c1_116 = arith.constant 1 : index
    %c0_117 = arith.constant 0 : index
    %c0_118 = arith.constant 0 : index
    %110 = vector.load %arg4[%c0_115, %c1_116, %c0_117, %c0_118] : memref<2x2x128x128xbf16, #tpu.memory_space<vmem>>, vector<1x1x128x128xbf16>
    %111 = vector.shape_cast %110 : vector<1x1x128x128xbf16> to vector<128x128xbf16>
    %cst_119 = arith.constant dense<0.000000e+00> : vector<16x128xf32>
    %112 = tpu.matmul %109, %111, %cst_119 {dimension_numbers = #tpu.dot_dimension_numbers<[1], [0], [0], [1], [0, 0, 1, 1], [], []>} : vector<16x128xbf16>, vector<128x128xbf16>, vector<16x128xf32> -> vector<16x128xf32>
    %113 = arith.addf %108, %112 : vector<16x128xf32>
    %c112_120 = arith.constant 112 : index
    %c0_121 = arith.constant 0 : index
    %114 = vector.load %arg9[%c112_120, %c0_121] : memref<144x128xbf16, #tpu.memory_space<vmem>>, vector<16x128xbf16>
    %c1_122 = arith.constant 1 : index
    %c0_123 = arith.constant 0 : index
    %c0_124 = arith.constant 0 : index
    %c0_125 = arith.constant 0 : index
    %115 = vector.load %arg4[%c1_122, %c0_123, %c0_124, %c0_125] : memref<2x2x128x128xbf16, #tpu.memory_space<vmem>>, vector<1x1x128x128xbf16>
    %116 = vector.shape_cast %115 : vector<1x1x128x128xbf16> to vector<128x128xbf16>
    %cst_126 = arith.constant dense<0.000000e+00> : vector<16x128xf32>
    %117 = tpu.matmul %114, %116, %cst_126 {dimension_numbers = #tpu.dot_dimension_numbers<[1], [0], [0], [1], [0, 0, 1, 1], [], []>} : vector<16x128xbf16>, vector<128x128xbf16>, vector<16x128xf32> -> vector<16x128xf32>
    %118 = arith.addf %113, %117 : vector<16x128xf32>
    %c128 = arith.constant 128 : index
    %c0_127 = arith.constant 0 : index
    %119 = vector.load %arg9[%c128, %c0_127] : memref<144x128xbf16, #tpu.memory_space<vmem>>, vector<16x128xbf16>
    %c1_128 = arith.constant 1 : index
    %c1_129 = arith.constant 1 : index
    %c0_130 = arith.constant 0 : index
    %c0_131 = arith.constant 0 : index
    %120 = vector.load %arg4[%c1_128, %c1_129, %c0_130, %c0_131] : memref<2x2x128x128xbf16, #tpu.memory_space<vmem>>, vector<1x1x128x128xbf16>
    %121 = vector.shape_cast %120 : vector<1x1x128x128xbf16> to vector<128x128xbf16>
    %cst_132 = arith.constant dense<0.000000e+00> : vector<16x128xf32>
    %122 = tpu.matmul %119, %121, %cst_132 {dimension_numbers = #tpu.dot_dimension_numbers<[1], [0], [0], [1], [0, 0, 1, 1], [], []>} : vector<16x128xbf16>, vector<128x128xbf16>, vector<16x128xf32> -> vector<16x128xf32>
    %123 = arith.addf %118, %122 : vector<16x128xf32>
    %124 = vector.broadcast %11 : vector<1x128xf32> to vector<16x128xf32>
    %125 = arith.addf %123, %124 : vector<16x128xf32>
    %cst_133 = arith.constant 0.000000e+00 : f32
    %126 = vector.broadcast %cst_133 : f32 to vector<16x128xf32>
    %127 = arith.maximumf %125, %126 : vector<16x128xf32>
    %128 = arith.truncf %127 : vector<16x128xf32> to vector<16x128xbf16>
    %c3 = arith.constant 3 : index
    %c0_134 = arith.constant 0 : index
    %c0_135 = arith.constant 0 : index
    %129 = vector.load %arg6[%c3, %c0_134, %c0_135] : memref<4x128x128xbf16, #tpu.memory_space<vmem>>, vector<1x128x128xbf16>
    %130 = vector.shape_cast %129 : vector<1x128x128xbf16> to vector<128x128xbf16>
    %cst_136 = arith.constant dense<0.000000e+00> : vector<16x128xf32>
    %131 = tpu.matmul %128, %130, %cst_136 {dimension_numbers = #tpu.dot_dimension_numbers<[1], [0], [0], [1], [0, 0, 1, 1], [], []>} : vector<16x128xbf16>, vector<128x128xbf16>, vector<16x128xf32> -> vector<16x128xf32>
    %132 = arith.addf %102, %131 : vector<16x128xf32>
    %c0_137 = arith.constant 0 : index
    %c0_138 = arith.constant 0 : index
    %133 = vector.load %arg7[%c0_137, %c0_138] : memref<1x128xf32, #tpu.memory_space<vmem>>, vector<1x128xf32>
    %134 = vector.broadcast %133 : vector<1x128xf32> to vector<16x128xf32>
    %135 = arith.addf %132, %134 : vector<16x128xf32>
    %cst_139 = arith.constant 0.000000e+00 : f32
    %136 = vector.broadcast %cst_139 : f32 to vector<16x128xf32>
    %137 = arith.maximumf %135, %136 : vector<16x128xf32>
    %c0_140 = arith.constant 0 : index
    %c0_141 = arith.constant 0 : index
    %138 = vector.load %arg8[%c0_140, %c0_141] : memref<16x128xf32, #tpu.memory_space<vmem>>, vector<16x128xf32>
    tpu.vector_store %arg8[%c0_140, %c0_141], %137 {strides = array<i32>} : memref<16x128xf32, #tpu.memory_space<vmem>>, vector<16x128xf32>,
    return
  }
  func.func @transform_0(%arg0: i32) -> (i32, i32, i32) {
    %c0_i32 = arith.constant 0 : i32
    %c0_i32_0 = arith.constant 0 : i32
    %c0_i32_1 = arith.constant 0 : i32
    return %arg0, %c0_i32, %c0_i32_0 : i32, i32, i32
  }
  func.func @transform_1(%arg0: i32) -> (i32, i32) {
    %c0_i32 = arith.constant 0 : i32
    %c0_i32_0 = arith.constant 0 : i32
    %c0_i32_1 = arith.constant 0 : i32
    return %c0_i32, %c0_i32_0 : i32, i32
  }
  func.func @transform_2(%arg0: i32) -> (i32, i32) {
    %c0_i32 = arith.constant 0 : i32
    %c0_i32_0 = arith.constant 0 : i32
    %c0_i32_1 = arith.constant 0 : i32
    return %c0_i32, %c0_i32_0 : i32, i32
  }
  func.func @transform_3(%arg0: i32) -> (i32, i32, i32, i32) {
    %c0_i32 = arith.constant 0 : i32
    %c0_i32_0 = arith.constant 0 : i32
    %c0_i32_1 = arith.constant 0 : i32
    %c0_i32_2 = arith.constant 0 : i32
    %c0_i32_3 = arith.constant 0 : i32
    return %c0_i32, %c0_i32_0, %c0_i32_1, %c0_i32_2 : i32, i32, i32, i32
  }
  func.func @transform_4(%arg0: i32) -> (i32, i32) {
    %c0_i32 = arith.constant 0 : i32
    %c0_i32_0 = arith.constant 0 : i32
    %c0_i32_1 = arith.constant 0 : i32
    return %c0_i32, %c0_i32_0 : i32, i32
  }
  func.func @transform_5(%arg0: i32) -> (i32, i32, i32) {
    %c0_i32 = arith.constant 0 : i32
    %c0_i32_0 = arith.constant 0 : i32
    %c0_i32_1 = arith.constant 0 : i32
    %c0_i32_2 = arith.constant 0 : i32
    return %c0_i32, %c0_i32_0, %c0_i32_1 : i32, i32, i32
  }
  func.func @transform_6(%arg0: i32) -> (i32, i32) {
    %c0_i32 = arith.constant 0 : i32
    %c0_i32_0 = arith.constant 0 : i32
    %c0_i32_1 = arith.constant 0 : i32
    return %c0_i32, %c0_i32_0 : i32, i32
  }
  func.func @transform_7(%arg0: i32) -> (i32, i32) {
    %c0_i32 = arith.constant 0 : i32
    %c0_i32_0 = arith.constant 0 : i32
    return %arg0, %c0_i32 : i32, i32
  }
}

</mosaic_0001>

<bundles_post_ra>
// kernel: fwd.1
= control target key start
LH: loop header
LB: loop body
LE: loop exit
PB: predicated region body
PF: predicated region fallthrough
CT: control target
= control target key end

     0   :  { %v2901_v0 = vmov 0.0   ;;  %vm2902_vm0 = vmmov 0   ;;  %s3728_s1 = inlined_call_operand.vmem [shape: bf16[128,128], index: 1, kind: input, shape index: {}]   ;;  %s3729_s0 = inlined_call_operand.vmem [shape: bf16[1,144,128], index: 0, kind: input, shape index: {}]   ;;  %s3730_s3 = inlined_call_operand.vmem [shape: bf16[2,2,128,128], index: 3, kind: input, shape index: {}]   ;;  %s3731_s2 = inlined_call_operand.vmem [shape: f32[1,128], index: 2, kind: input, shape index: {}]   ;;  %s3732_s5 = inlined_call_operand.vmem [shape: bf16[4,128,128], index: 5, kind: input, shape index: {}]   ;;  %s3733_s4 = inlined_call_operand.vmem [shape: f32[1,128], index: 4, kind: input, shape index: {}]   ;;  %s3734_s6 = inlined_call_operand.vmem [shape: f32[1,128], index: 6, kind: input, shape index: {}]   ;;  %s3735_s7 = inlined_call_operand.vmem [shape: f32[16,128], index: 7, kind: output, shape index: {}]  }
   0x1   :  { %2332 = vmatprep.subr.bf16.mxu0 %v2901_v0  ;;  %v2786_v1 = vld [vmem:[%s3728_s1 + $0x38] sm:$0xff]   ;;  %2348 = vmatprep.mubr.msk.bf16.mxu0 %vm2902_vm0, %v2901_v0  ;;  %v2787_v2 = vld [vmem:[%s3728_s1 + $0x30] sm:$0xff]   ;;  %v2788_v3 = vld [vmem:[%s3728_s1 + $0x28] sm:$0xff]  }
   0x2   :  { %2384 = vmatprep.subr.bf16.mxu1 %v2901_v0  ;;  %2400 = vmatprep.mubr.msk.bf16.mxu1 %vm2902_vm0, %v2901_v0  ;;  %v2789_v4 = vld [vmem:[%s3728_s1 + $0x20] sm:$0xff]   ;;  %v2790_v5 = vld [vmem:[%s3728_s1 + $0x18] sm:$0xff]   ;;  %v2791_v7 = vld [vmem:[%s3728_s1 + $0x10] sm:$0xff]  }
   0x3   :  { %2333 = vmatpush3.bf16.msra.mxu0 %v2786_v1  ;;  %v2970_v6 = vld [vmem:[%s3730_s3 + $0x78] sm:$0xff]   ;;  %v2792_v8 = vld [vmem:[%s3728_s1 + $0x8] sm:$0xff]   ;;  %v2793_v9 = vld [vmem:[%s3728_s1] sm:$0xff]  }
   0x4   :  { %2334 = vmatprep.subr.bf16.mxu0 %v2901_v0  ;;  %2385 = vmatpush3.bf16.msra.mxu1 %v2970_v6  ;;  %v2794_v10 = vld [vmem:[%s3729_s0] sm:$0xff]   ;;  %v2795_v11 = vld [vmem:[%s3729_s0 + $0x8] sm:$0xff]   ;;  %v2796_v12 = vld [vmem:[%s3729_s0 + $0x10] sm:$0xff]  }
   0x5   :  { %2386 = vmatprep.subr.bf16.mxu1 %v2901_v0  ;;  %v2797_v13 = vld [vmem:[%s3729_s0 + $0x18] sm:$0xff]   ;;  %v2798_v14 = vld [vmem:[%s3729_s0 + $0x20] sm:$0xff]   ;;  %v2799_v15 = vld [vmem:[%s3729_s0 + $0x28] sm:$0xff]  }
   0x6   :  { %v3021_v16 = vld [vmem:[%s3730_s3 + $0x70] sm:$0xff]   ;;  %v3028_v17 = vld [vmem:[%s3730_s3 + $0x68] sm:$0xff]   ;;  %v3035_v18 = vld [vmem:[%s3730_s3 + $0x60] sm:$0xff]  }
   0x7   :  { %2335 = vmatpush3.bf16.msra.mxu0 %v2787_v2  ;;  %v3042_v19 = vld [vmem:[%s3730_s3 + $0x58] sm:$0xff]   ;;  %v3049_v20 = vld [vmem:[%s3730_s3 + $0x50] sm:$0xff]   ;;  %v3056_v21 = vld [vmem:[%s3730_s3 + $0x48] sm:$0xff]  }
   0x8   :  { %2336 = vmatprep.subr.bf16.mxu0 %v2901_v0  ;;  %2387 = vmatpush3.bf16.msra.mxu1 %v3021_v16  ;;  %v3061_v22 = vld [vmem:[%s3730_s3 + $0xf8] sm:$0xff]   ;;  %v3070_v23 = vld [vmem:[%s3730_s3 + $0x40] sm:$0xff]   ;;  %v3075_v24 = vld [vmem:[%s3730_s3 + $0xf0] sm:$0xff]  }
   0x9   :  { %2388 = vmatprep.subr.bf16.mxu1 %v2901_v0  ;;  %v2810_v25 = vld [vmem:[%s3729_s0 + $0x30] sm:$0xff]   ;;  %v3087_v26 = vld [vmem:[%s3730_s3 + $0xe8] sm:$0xff]   ;;  %v3096_v27 = vld [vmem:[%s3730_s3 + $0xe0] sm:$0xff]  }
   0xa   :  { %v2816_v28 = vld [vmem:[%s3729_s0 + $0x38] sm:$0xff]   ;;  %v3115_v30 = vld [vmem:[%s3730_s3 + $0xd0] sm:$0xff]   ;;  %v2821_v31 = vld [vmem:[%s3729_s0 + $0x40] sm:$0xff]  }
   0xb   :  { %2337 = vmatpush3.bf16.msra.mxu0 %v2788_v3  ;;  %v3106_v29 = vld [vmem:[%s3730_s3 + $0xd8] sm:$0xff]   ;;  %v3125_v32 = vld [vmem:[%s3730_s3 + $0xc8] sm:$0xff]   ;;  %v3134_v33 = vld [vmem:[%s3730_s3 + $0xc0] sm:$0xff]  }
   0xc   :  { %2338 = vmatprep.subr.bf16.mxu0 %v2901_v0  ;;  %2389 = vmatpush3.bf16.msra.mxu1 %v3028_v17  ;;  %v3141_v34 = vld [vmem:[%s3731_s2] ss:$0 sm:$0xff]  ;;  %v3153_v1 = vld [vmem:[%s3730_s3 + $0x38] sm:$0xff]  }
   0xd   :  { %2390 = vmatprep.subr.bf16.mxu1 %v2901_v0 }
   0xf   :  { %2339 = vmatpush3.bf16.msra.mxu0 %v2789_v4 }
  0x10   :  { %2340 = vmatprep.subr.bf16.mxu0 %v2901_v0  ;;  %2391 = vmatpush3.bf16.msra.mxu1 %v3035_v18 }
  0x11   :  { %2392 = vmatprep.subr.bf16.mxu1 %v2901_v0 }
  0x13   :  { %2341 = vmatpush3.bf16.msra.mxu0 %v2790_v5 }
  0x14   :  { %2342 = vmatprep.subr.bf16.mxu0 %v2901_v0  ;;  %2393 = vmatpush3.bf16.msra.mxu1 %v3042_v19 }
  0x15   :  { %2394 = vmatprep.subr.bf16.mxu1 %v2901_v0 }
  0x17   :  { %2343 = vmatpush3.bf16.msra.mxu0 %v2791_v7 }
  0x18   :  { %2344 = vmatprep.subr.bf16.mxu0 %v2901_v0  ;;  %2395 = vmatpush3.bf16.msra.mxu1 %v3049_v20 }
  0x19   :  { %2396 = vmatprep.subr.bf16.mxu1 %v2901_v0 }
  0x1b   :  { %2345 = vmatpush3.bf16.msra.mxu0 %v2792_v8  ;;  %v3163_v8 = vld [vmem:[%s3730_s3 + $0x30] sm:$0xff]  }
  0x1c   :  { %2346 = vmatprep.subr.bf16.mxu0 %v2901_v0  ;;  %2397 = vmatpush3.bf16.msra.mxu1 %v3056_v21 }
  0x1d   :  { %2398 = vmatprep.subr.bf16.mxu1 %v2901_v0 }
  0x1f   :  { %2347 = vmatpush3.bf16.msra.mxu0 %v2793_v9 }
  0x20   :  { %2444 = vmatprep.subr.bf16.mxu0 %v2901_v0  ;;  %2399 = vmatpush3.bf16.msra.mxu1 %v3070_v23 }
  0x21   :  { %2404 = vmatprep.subr.bf16.mxu1 %v2901_v0 }
  0x22   :  { %2349 = vmatmul.mubr.bf16.vlgmr.msra.gmra.mxu0 %v2794_v10 }
  0x23   :  { %2352 = vmatprep.mubr.msk.bf16.mxu0 %vm2902_vm0, %v2901_v0  ;;  %2445 = vmatpush3.bf16.msra.mxu0 %v3061_v22 }
  0x24   :  { %2446 = vmatprep.subr.bf16.mxu0 %v2901_v0 }
  0x27   :  { %2447 = vmatpush3.bf16.msra.mxu0 %v3075_v24 }
  0x28   :  { %2448 = vmatprep.subr.bf16.mxu0 %v2901_v0 }
  0x2a   :  { %2353 = vmatmul.mubr.bf16.gmra.mxu0 %v2795_v11 }
  0x2b   :  { %2356 = vmatprep.mubr.msk.bf16.mxu0 %vm2902_vm0, %v2901_v0  ;;  %2449 = vmatpush3.bf16.msra.mxu0 %v3087_v26 }
  0x2c   :  { %2450 = vmatprep.subr.bf16.mxu0 %v2901_v0 }
  0x2f   :  { %2451 = vmatpush3.bf16.msra.mxu0 %v3096_v27 }
  0x30   :  { %2452 = vmatprep.subr.bf16.mxu0 %v2901_v0 }
  0x32   :  { %2357 = vmatmul.mubr.bf16.gmra.mxu0 %v2796_v12 }
  0x33   :  { %2360 = vmatprep.mubr.msk.bf16.mxu0 %vm2902_vm0, %v2901_v0  ;;  %2453 = vmatpush3.bf16.msra.mxu0 %v3106_v29 }
  0x34   :  { %2454 = vmatprep.subr.bf16.mxu0 %v2901_v0 }
  0x37   :  { %2455 = vmatpush3.bf16.msra.mxu0 %v3115_v30 }
  0x38   :  { %2456 = vmatprep.subr.bf16.mxu0 %v2901_v0 }
  0x3a   :  { %2361 = vmatmul.mubr.bf16.gmra.mxu0 %v2797_v13 }
  0x3b   :  { %2364 = vmatprep.mubr.msk.bf16.mxu0 %vm2902_vm0, %v2901_v0  ;;  %2457 = vmatpush3.bf16.msra.mxu0 %v3125_v32 }
  0x3c   :  { %2458 = vmatprep.subr.bf16.mxu0 %v2901_v0 }
  0x3f   :  { %2459 = vmatpush3.bf16.msra.mxu0 %v3134_v33 }
  0x40   :  { %2484 = vmatprep.subr.bf16.mxu0 %v2901_v0 }
  0x42   :  { %2365 = vmatmul.mubr.bf16.gmra.mxu0 %v2798_v14  ;;  %v3173_v14 = vld [vmem:[%s3730_s3 + $0x28] sm:$0xff]  }
  0x43   :  { %2368 = vmatprep.mubr.msk.bf16.mxu0 %vm2902_vm0, %v2901_v0 }
  0x4a   :  { %2369 = vmatmul.mubr.bf16.gmra.mxu0 %v2799_v15 }
  0x4b   :  { %2372 = vmatprep.mubr.msk.bf16.mxu0 %vm2902_vm0, %v2901_v0 }
  0x52   :  { %2373 = vmatmul.mubr.bf16.gmra.mxu0 %v2810_v25 }
  0x53   :  { %2376 = vmatprep.mubr.msk.bf16.mxu0 %vm2902_vm0, %v2901_v0 }
  0x5a   :  { %2377 = vmatmul.mubr.bf16.gmra.mxu0 %v2816_v28 }
  0x5b   :  { %2380 = vmatprep.mubr.msk.bf16.mxu0 %vm2902_vm0, %v2901_v0 }
  0x62   :  { %2381 = vmatmul.mubr.bf16.gmra.mxu0 %v2821_v31 }
  0x63   :  { %2460 = vmatprep.mubr.msk.bf16.mxu0 %vm2902_vm0, %v2901_v0 }
  0xe2   :  { %v204_v35 = vpop.f32.mrf.mxu0 }
  0xe3   :  { %v205_v37 = vadd.f32 %v3141_v34, %v204_v35  ;;  %v3181_v35 = vld [vmem:[%s3730_s3 + $0x20] sm:$0xff]  }
  0xe4   :  { %v2350_v36 = vpop.f32.mrf.mxu0 }
  0xe5   :  { %v275_v41 = vmax.f32 %v205_v37, 0.0 }
  0xe6   :  { %v207_v38 = vpop.f32.mrf.mxu0 }
  0xe7   :  { %v208_v39 = vadd.f32 %v3141_v34, %v207_v38 }
  0xe8   :  { %v2351_v40 = vpop.f32.mrf.mxu0 }
  0xe9   :  { %v276_v42 = vmax.f32 %v208_v39, 0.0  ;;  %v3188_v40 = vld [vmem:[%s3730_s3 + $0x18] sm:$0xff]  }
  0xea   :  { %v212_v43 = vpop.f32.mrf.mxu0 }
  0xeb   :  { %v2085_v44 = vpack.c.bf16 %v276_v42, %v275_v41  ;;  %v213_v46 = vadd.f32 %v3141_v34, %v212_v43 }
  0xec   :  { %v2354_v45 = vpop.f32.mrf.mxu0 }
  0xed   :  { %2086 = vst [vmem:[#allocation2] sm:$0xff] %v2085_v44   ;;  %v277_v50 = vmax.f32 %v213_v46, 0.0  ;;  %v3196_v44 = vld [vmem:[%s3730_s3 + $0x10] sm:$0xff]  }
  0xee   :  { %v215_v47 = vpop.f32.mrf.mxu0 }
  0xef   :  { %v216_v48 = vadd.f32 %v3141_v34, %v215_v47 }
  0xf0   :  { %v2355_v49 = vpop.f32.mrf.mxu0 }
  0xf1   :  { %v278_v51 = vmax.f32 %v216_v48, 0.0  ;;  %v3204_v49 = vld [vmem:[%s3730_s3 + $0x8] sm:$0xff]  }
  0xf2   :  { %v220_v52 = vpop.f32.mrf.mxu0 }
  0xf3   :  { %v2090_v53 = vpack.c.bf16 %v278_v51, %v277_v50  ;;  %v221_v54 = vadd.f32 %v3141_v34, %v220_v52  ;;  %v3215_v52 = vld [vmem:[%s3730_s3] sm:$0xff]  }
  0xf4   :  { %v2358_v55 = vpop.f32.mrf.mxu0 }
  0xf5   :  { %2127 = vst [vmem:[#allocation2 + $0x8] sm:$0xff] %v2090_v53   ;;  %v279_v57 = vmax.f32 %v221_v54, 0.0  ;;  %v3226_v53 = vld [vmem:[%s3730_s3 + $0xb8] sm:$0xff]   ;;  %v2829_v54 = vld [vmem:[#allocation2] sm:$0xff]   ;;  %v3235_v55 = vld [vmem:[%s3730_s3 + $0xb0] sm:$0xff]  }
  0xf6   :  { %v223_v56 = vpop.f32.mrf.mxu0 }
  0xf7   :  { %v224_v58 = vadd.f32 %v3141_v34, %v223_v56  ;;  %v3246_v56 = vld [vmem:[%s3730_s3 + $0xa8] sm:$0xff]  }
  0xf8   :  { %v2359_v59 = vpop.f32.mrf.mxu0 }
  0xf9   :  { %v280_v60 = vmax.f32 %v224_v58, 0.0  ;;  %v3264_v58 = vld [vmem:[%s3730_s3 + $0x98] sm:$0xff]   ;;  %v3273_v59 = vld [vmem:[%s3730_s3 + $0x90] sm:$0xff]  }
  0xfa   :  { %v228_v61 = vpop.f32.mrf.mxu0 }
  0xfb   :  { %v2095_v62 = vpack.c.bf16 %v280_v60, %v279_v57  ;;  %v229_v63 = vadd.f32 %v3141_v34, %v228_v61  ;;  %v3255_v57 = vld [vmem:[%s3730_s3 + $0xa0] sm:$0xff]   ;;  %v3282_v60 = vld [vmem:[%s3730_s3 + $0x88] sm:$0xff]  }
  0xfc   :  { %v2362_v2 = vpop.f32.mrf.mxu0  ;;  %v3155_v3 = vld [vmem:[#allocation2 + $0x8] sm:$0xff]   ;;  %v3291_v61 = vld [vmem:[%s3730_s3 + $0x80] sm:$0xff]  }
  0xfd   :  { %2128 = vst [vmem:[#allocation2 + $0x10] sm:$0xff] %v2095_v62   ;;  %2401 = vmatmul.mubr.bf16.vlgmr.msra.gmra.mxu1 %v3155_v3  ;;  %v281_v5 = vmax.f32 %v229_v63, 0.0 }
  0xfe   :  { %v231_v4 = vpop.f32.mrf.mxu0  ;;  %2405 = vmatpush3.bf16.msra.mxu1 %v3153_v1  ;;  %2420 = vmatprep.mubr.msk.bf16.mxu1 %vm2902_vm0, %v2901_v0 }
  0xff   :  { %v232_v7 = vadd.f32 %v3141_v34, %v231_v4  ;;  %2406 = vmatprep.subr.bf16.mxu1 %v2901_v0 }
 0x100   :  { %v2363_v9 = vpop.f32.mrf.mxu0 }
 0x101   :  { %v282_v10 = vmax.f32 %v232_v7, 0.0 }
 0x102   :  { %v236_v11 = vpop.f32.mrf.mxu0  ;;  %2407 = vmatpush3.bf16.msra.mxu1 %v3163_v8 }
 0x103   :  { %v2100_v12 = vpack.c.bf16 %v282_v10, %v281_v5  ;;  %v237_v13 = vadd.f32 %v3141_v34, %v236_v11  ;;  %2408 = vmatprep.subr.bf16.mxu1 %v2901_v0 }
 0x104   :  { %v2366_v15 = vpop.f32.mrf.mxu0 }
 0x105   :  { %2129 = vst [vmem:[#allocation2 + $0x18] sm:$0xff] %v2100_v12   ;;  %v283_v28 = vmax.f32 %v237_v13, 0.0 }
 0x106   :  { %v239_v25 = vpop.f32.mrf.mxu0  ;;  %2409 = vmatpush3.bf16.msra.mxu1 %v3173_v14 }
 0x107   :  { %v240_v31 = vadd.f32 %v3141_v34, %v239_v25  ;;  %2410 = vmatprep.subr.bf16.mxu1 %v2901_v0 }
 0x108   :  { %v2367_v36 = vpop.f32.mrf.mxu0 }
 0x109   :  { %v284_v37 = vmax.f32 %v240_v31, 0.0  ;;  %v2841_v31 = vld [vmem:[%s3732_s5 + $0x38] sm:$0xff]  }
 0x10a   :  { %v244_v38 = vpop.f32.mrf.mxu0  ;;  %2411 = vmatpush3.bf16.msra.mxu1 %v3181_v35 }
 0x10b   :  { %v2105_v39 = vpack.c.bf16 %v284_v37, %v283_v28  ;;  %v245_v41 = vadd.f32 %v3141_v34, %v244_v38  ;;  %2412 = vmatprep.subr.bf16.mxu1 %v2901_v0  ;;  %v2842_v38 = vld [vmem:[%s3732_s5 + $0x30] sm:$0xff]  }
 0x10c   :  { %v2370_v42 = vpop.f32.mrf.mxu0  ;;  %v3300_v62 = vld [vmem:[#allocation2 + $0x18] sm:$0xff]  }
 0x10d   :  { %2130 = vst [vmem:[#allocation2 + $0x20] sm:$0xff] %v2105_v39   ;;  %v285_v45 = vmax.f32 %v245_v41, 0.0 }
 0x10e   :  { %v247_v43 = vpop.f32.mrf.mxu0  ;;  %2413 = vmatpush3.bf16.msra.mxu1 %v3188_v40 }
 0x10f   :  { %v248_v46 = vadd.f32 %v3141_v34, %v247_v43  ;;  %2414 = vmatprep.subr.bf16.mxu1 %v2901_v0 }
 0x110   :  { %v2371_v47 = vpop.f32.mrf.mxu0 }
 0x111   :  { %v286_v48 = vmax.f32 %v248_v46, 0.0  ;;  %v2845_v47 = vld [vmem:[%s3732_s5 + $0x18] sm:$0xff]  }
 0x112   :  { %2415 = vmatpush3.bf16.msra.mxu1 %v3196_v44  ;;  %v252_v63 = vpop.f32.mrf.mxu0 }
 0x113   :  { %v2110_v50 = vpack.c.bf16 %v286_v48, %v285_v45  ;;  %2416 = vmatprep.subr.bf16.mxu1 %v2901_v0  ;;  %v2843_v45 = vld [vmem:[%s3732_s5 + $0x28] sm:$0xff]   ;;  %v2846_v48 = vld [vmem:[%s3732_s5 + $0x10] sm:$0xff]  }
 0x114   :  { %v3207_v51 = vld [vmem:[#allocation2 + $0x20] sm:$0xff]   ;;  %v2374_v2 = vpop.f32.mrf.mxu0 }
 0x115   :  { %2131 = vst [vmem:[#allocation2 + $0x28] sm:$0xff] %v2110_v50   ;;  %2461 = vmatmul.mubr.bf16.vlgmr.msra.gmra.mxu0 %v3207_v51  ;;  %v2847_v50 = vld [vmem:[%s3732_s5 + $0x8] sm:$0xff]  }
 0x116   :  { %2417 = vmatpush3.bf16.msra.mxu1 %v3204_v49  ;;  %2485 = vmatpush3.bf16.msra.mxu0 %v3153_v1  ;;  %v2851_v2 = vld [vmem:[%s3732_s5 + $0x68] sm:$0xff]  }
 0x117   :  { %2418 = vmatprep.subr.bf16.mxu1 %v2901_v0  ;;  %2486 = vmatprep.subr.bf16.mxu0 %v2901_v0 }
 0x118   :  { %2500 = vmatprep.mubr.msk.bf16.mxu0 %vm2902_vm0, %v2901_v0 }
 0x11a   :  { %2419 = vmatpush3.bf16.msra.mxu1 %v3215_v52  ;;  %2487 = vmatpush3.bf16.msra.mxu0 %v3163_v8 }
 0x11b   :  { %2424 = vmatprep.subr.bf16.mxu1 %v2901_v0  ;;  %2488 = vmatprep.subr.bf16.mxu0 %v2901_v0 }
 0x11d   :  { %2421 = vmatmul.mubr.bf16.vlgmr.msra.gmra.mxu1 %v2829_v54  ;;  %v2848_v54 = vld [vmem:[%s3732_s5] sm:$0xff]  }
 0x11e   :  { %2425 = vmatpush3.bf16.msra.mxu1 %v3226_v53  ;;  %2489 = vmatpush3.bf16.msra.mxu0 %v3173_v14 }
 0x11f   :  { %2426 = vmatprep.subr.bf16.mxu1 %v2901_v0  ;;  %2490 = vmatprep.subr.bf16.mxu0 %v2901_v0 }
 0x120   :  { %2440 = vmatprep.mubr.msk.bf16.mxu1 %vm2902_vm0, %v2901_v0 }
 0x122   :  { %2427 = vmatpush3.bf16.msra.mxu1 %v3235_v55  ;;  %2491 = vmatpush3.bf16.msra.mxu0 %v3181_v35 }
 0x123   :  { %2428 = vmatprep.subr.bf16.mxu1 %v2901_v0  ;;  %2492 = vmatprep.subr.bf16.mxu0 %v2901_v0 }
 0x126   :  { %2429 = vmatpush3.bf16.msra.mxu1 %v3246_v56  ;;  %2493 = vmatpush3.bf16.msra.mxu0 %v3188_v40 }
 0x127   :  { %2430 = vmatprep.subr.bf16.mxu1 %v2901_v0  ;;  %2494 = vmatprep.subr.bf16.mxu0 %v2901_v0 }
 0x12a   :  { %2431 = vmatpush3.bf16.msra.mxu1 %v3255_v57  ;;  %2495 = vmatpush3.bf16.msra.mxu0 %v3196_v44 }
 0x12b   :  { %2432 = vmatprep.subr.bf16.mxu1 %v2901_v0  ;;  %2496 = vmatprep.subr.bf16.mxu0 %v2901_v0 }
 0x12e   :  { %2433 = vmatpush3.bf16.msra.mxu1 %v3264_v58  ;;  %2497 = vmatpush3.bf16.msra.mxu0 %v3204_v49 }
 0x12f   :  { %2434 = vmatprep.subr.bf16.mxu1 %v2901_v0  ;;  %2498 = vmatprep.subr.bf16.mxu0 %v2901_v0 }
 0x132   :  { %2435 = vmatpush3.bf16.msra.mxu1 %v3273_v59  ;;  %2499 = vmatpush3.bf16.msra.mxu0 %v3215_v52 }
 0x133   :  { %2436 = vmatprep.subr.bf16.mxu1 %v2901_v0  ;;  %2524 = vmatprep.subr.bf16.mxu0 %v2901_v0 }
 0x135   :  { %2501 = vmatmul.mubr.bf16.vlgmr.msra.gmra.mxu0 %v3155_v3  ;;  %v255_v3 = vpop.f32.mrf.mxu0 }
 0x136   :  { %2437 = vmatpush3.bf16.msra.mxu1 %v3282_v60  ;;  %2525 = vmatpush3.bf16.msra.mxu0 %v3061_v22  ;;  %v256_v4 = vadd.f32 %v3141_v34, %v255_v3  ;;  %v2852_v3 = vld [vmem:[%s3732_s5 + $0x60] sm:$0xff]  }
 0x137   :  { %2438 = vmatprep.subr.bf16.mxu1 %v2901_v0  ;;  %2526 = vmatprep.subr.bf16.mxu0 %v2901_v0  ;;  %v2375_v5 = vpop.f32.mrf.mxu0 }
 0x138   :  { %2540 = vmatprep.mubr.msk.bf16.mxu0 %vm2902_vm0, %v2901_v0  ;;  %v288_v7 = vmax.f32 %v256_v4, 0.0 }
 0x139   :  { %v260_v9 = vpop.f32.mrf.mxu0 }
 0x13a   :  { %2439 = vmatpush3.bf16.msra.mxu1 %v3291_v61  ;;  %2527 = vmatpush3.bf16.msra.mxu0 %v3075_v24 }
 0x13b   :  { %2464 = vmatprep.subr.bf16.mxu1 %v2901_v0  ;;  %2528 = vmatprep.subr.bf16.mxu0 %v2901_v0  ;;  %v2378_v10 = vpop.f32.mrf.mxu0 }
 0x13c   :  { %v2855_v10 = vld [vmem:[%s3732_s5 + $0x48] sm:$0xff]  }
 0x13d   :  { %2441 = vmatmul.mubr.bf16.vlgmr.msra.gmra.mxu1 %v3300_v62 }
 0x13e   :  { %2465 = vmatpush3.bf16.msra.mxu1 %v2970_v6  ;;  %2480 = vmatprep.mubr.msk.bf16.mxu1 %vm2902_vm0, %v2901_v0  ;;  %v253_v6 = vadd.f32 %v3141_v34, %v252_v63  ;;  %v2849_v63 = vld [vmem:[%s3732_s5 + $0x78] sm:$0xff]  }
 0x13f   :  { %2466 = vmatprep.subr.bf16.mxu1 %v2901_v0  ;;  %2529 = vmatpush3.bf16.msra.mxu0 %v3087_v26 }
 0x140   :  { %2530 = vmatprep.subr.bf16.mxu0 %v2901_v0 }
 0x142   :  { %2467 = vmatpush3.bf16.msra.mxu1 %v3021_v16  ;;  %v287_v16 = vmax.f32 %v253_v6, 0.0  ;;  %v2850_v6 = vld [vmem:[%s3732_s5 + $0x70] sm:$0xff]  }
 0x143   :  { %2468 = vmatprep.subr.bf16.mxu1 %v2901_v0  ;;  %2531 = vmatpush3.bf16.msra.mxu0 %v3096_v27 }
 0x144   :  { %2532 = vmatprep.subr.bf16.mxu0 %v2901_v0 }
 0x146   :  { %2469 = vmatpush3.bf16.msra.mxu1 %v3028_v17  ;;  %v2115_v17 = vpack.c.bf16 %v288_v7, %v287_v16  ;;  %v2853_v16 = vld [vmem:[%s3732_s5 + $0x58] sm:$0xff]   ;;  %v2854_v7 = vld [vmem:[%s3732_s5 + $0x50] sm:$0xff]  }
 0x147   :  { %2470 = vmatprep.subr.bf16.mxu1 %v2901_v0  ;;  %2533 = vmatpush3.bf16.msra.mxu0 %v3106_v29 }
 0x148   :  { %2534 = vmatprep.subr.bf16.mxu0 %v2901_v0  ;;  %2132 = vst [vmem:[#allocation2 + $0x30] sm:$0xff] %v2115_v17  }
 0x14a   :  { %2471 = vmatpush3.bf16.msra.mxu1 %v3035_v18  ;;  %v3330_v18 = vld [vmem:[#allocation2 + $0x28] sm:$0xff]  }
 0x14b   :  { %2472 = vmatprep.subr.bf16.mxu1 %v2901_v0  ;;  %2535 = vmatpush3.bf16.msra.mxu0 %v3115_v30 }
 0x14c   :  { %2536 = vmatprep.subr.bf16.mxu0 %v2901_v0 }
 0x14e   :  { %2473 = vmatpush3.bf16.msra.mxu1 %v3042_v19  ;;  %v2839_v19 = vld [vmem:[#allocation2 + $0x10] sm:$0xff]  }
 0x14f   :  { %2474 = vmatprep.subr.bf16.mxu1 %v2901_v0  ;;  %2537 = vmatpush3.bf16.msra.mxu0 %v3125_v32 }
 0x150   :  { %2538 = vmatprep.subr.bf16.mxu0 %v2901_v0 }
 0x152   :  { %2475 = vmatpush3.bf16.msra.mxu1 %v3049_v20  ;;  %v261_v20 = vadd.f32 %v3141_v34, %v260_v9 }
 0x153   :  { %2476 = vmatprep.subr.bf16.mxu1 %v2901_v0  ;;  %2539 = vmatpush3.bf16.msra.mxu0 %v3134_v33 }
 0x154   :  { %2564 = vmatprep.subr.bf16.mxu0 %v2901_v0  ;;  %v289_v11 = vmax.f32 %v261_v20, 0.0 }
 0x156   :  { %2477 = vmatpush3.bf16.msra.mxu1 %v3056_v21  ;;  %2541 = vmatmul.mubr.bf16.vlgmr.msra.gmra.mxu0 %v3330_v18  ;;  %v263_v21 = vpop.f32.mrf.mxu0 }
 0x157   :  { %2478 = vmatprep.subr.bf16.mxu1 %v2901_v0  ;;  %2580 = vmatprep.mubr.msk.bf16.mxu0 %vm2902_vm0, %v2901_v0  ;;  %v264_v12 = vadd.f32 %v3141_v34, %v263_v21 }
 0x158   :  { %v2379_v13 = vpop.f32.mrf.mxu0  ;;  %2565 = vmatpush3.bf16.msra.mxu0 %v2841_v31 }
 0x159   :  { %2566 = vmatprep.subr.bf16.mxu0 %v2901_v0 }
 0x15a   :  { %2479 = vmatpush3.bf16.msra.mxu1 %v3070_v23  ;;  %v290_v23 = vmax.f32 %v264_v12, 0.0  ;;  %v268_v15 = vpop.f32.mrf.mxu0 }
 0x15b   :  { %2504 = vmatprep.subr.bf16.mxu1 %v2901_v0  ;;  %v269_v28 = vadd.f32 %v3141_v34, %v268_v15 }
 0x15c   :  { %v2120_v25 = vpack.c.bf16 %v290_v23, %v289_v11  ;;  %v2382_v36 = vpop.f32.mrf.mxu0  ;;  %2567 = vmatpush3.bf16.msra.mxu0 %v2842_v38 }
 0x15d   :  { %2481 = vmatmul.mubr.bf16.vlgmr.msra.gmra.mxu1 %v2839_v19  ;;  %v291_v37 = vmax.f32 %v269_v28, 0.0  ;;  %2568 = vmatprep.subr.bf16.mxu0 %v2901_v0  ;;  %v2856_v19 = vld [vmem:[%s3732_s5 + $0x40] sm:$0xff]  }
 0x15e   :  { %2505 = vmatpush3.bf16.msra.mxu1 %v3226_v53  ;;  %2520 = vmatprep.mubr.msk.bf16.mxu1 %vm2902_vm0, %v2901_v0  ;;  %2133 = vst [vmem:[#allocation2 + $0x38] sm:$0xff] %v2120_v25   ;;  %v271_v39 = vpop.f32.mrf.mxu0 }
 0x15f   :  { %2506 = vmatprep.subr.bf16.mxu1 %v2901_v0  ;;  %v272_v41 = vadd.f32 %v3141_v34, %v271_v39  ;;  %v2844_v34 = vld [vmem:[%s3732_s5 + $0x20] sm:$0xff]  }
 0x160   :  { %v2383_v42 = vpop.f32.mrf.mxu0  ;;  %2569 = vmatpush3.bf16.msra.mxu0 %v2843_v45 }
 0x161   :  { %v292_v43 = vmax.f32 %v272_v41, 0.0  ;;  %2570 = vmatprep.subr.bf16.mxu0 %v2901_v0 }
 0x162   :  { %2507 = vmatpush3.bf16.msra.mxu1 %v3235_v55 }
 0x163   :  { %2508 = vmatprep.subr.bf16.mxu1 %v2901_v0  ;;  %v2125_v46 = vpack.c.bf16 %v292_v43, %v291_v37 }
 0x164   :  { %2571 = vmatpush3.bf16.msra.mxu0 %v2844_v34 }
 0x165   :  { %2134 = vst [vmem:[#allocation2 + $0x40] sm:$0xff] %v2125_v46   ;;  %2572 = vmatprep.subr.bf16.mxu0 %v2901_v0  ;;  %v3434_v46 = vld [vmem:[%s3733_s4] ss:$0 sm:$0xff] }
 0x166   :  { %2509 = vmatpush3.bf16.msra.mxu1 %v3246_v56 }
 0x167   :  { %2510 = vmatprep.subr.bf16.mxu1 %v2901_v0 }
 0x168   :  { %2573 = vmatpush3.bf16.msra.mxu0 %v2845_v47 }
 0x169   :  { %2574 = vmatprep.subr.bf16.mxu0 %v2901_v0 }
 0x16a   :  { %2511 = vmatpush3.bf16.msra.mxu1 %v3255_v57 }
 0x16b   :  { %2512 = vmatprep.subr.bf16.mxu1 %v2901_v0 }
 0x16c   :  { %2575 = vmatpush3.bf16.msra.mxu0 %v2846_v48 }
 0x16d   :  { %2576 = vmatprep.subr.bf16.mxu0 %v2901_v0 }
 0x16e   :  { %2513 = vmatpush3.bf16.msra.mxu1 %v3264_v58 }
 0x16f   :  { %2514 = vmatprep.subr.bf16.mxu1 %v2901_v0 }
 0x170   :  { %2577 = vmatpush3.bf16.msra.mxu0 %v2847_v50 }
 0x171   :  { %2578 = vmatprep.subr.bf16.mxu0 %v2901_v0 }
 0x172   :  { %2515 = vmatpush3.bf16.msra.mxu1 %v3273_v59 }
 0x173   :  { %2516 = vmatprep.subr.bf16.mxu1 %v2901_v0 }
 0x174   :  { %2579 = vmatpush3.bf16.msra.mxu0 %v2848_v54 }
 0x175   :  { %2604 = vmatprep.subr.bf16.mxu0 %v2901_v0 }
 0x176   :  { %2517 = vmatpush3.bf16.msra.mxu1 %v3282_v60 }
 0x177   :  { %2518 = vmatprep.subr.bf16.mxu1 %v2901_v0 }
 0x17a   :  { %2519 = vmatpush3.bf16.msra.mxu1 %v3291_v61 }
 0x17b   :  { %2544 = vmatprep.subr.bf16.mxu1 %v2901_v0 }
 0x17d   :  { %2521 = vmatmul.mubr.bf16.vlgmr.msra.gmra.mxu1 %v3207_v51 }
 0x17e   :  { %2560 = vmatprep.mubr.msk.bf16.mxu1 %vm2902_vm0, %v2901_v0  ;;  %2545 = vmatpush3.bf16.msra.mxu1 %v2849_v63 }
 0x17f   :  { %2546 = vmatprep.subr.bf16.mxu1 %v2901_v0 }
 0x182   :  { %2547 = vmatpush3.bf16.msra.mxu1 %v2850_v6 }
 0x183   :  { %2548 = vmatprep.subr.bf16.mxu1 %v2901_v0 }
 0x186   :  { %2549 = vmatpush3.bf16.msra.mxu1 %v2851_v2 }
 0x187   :  { %2550 = vmatprep.subr.bf16.mxu1 %v2901_v0 }
 0x18a   :  { %2551 = vmatpush3.bf16.msra.mxu1 %v2852_v3 }
 0x18b   :  { %2552 = vmatprep.subr.bf16.mxu1 %v2901_v0 }
 0x18e   :  { %2553 = vmatpush3.bf16.msra.mxu1 %v2853_v16 }
 0x18f   :  { %2554 = vmatprep.subr.bf16.mxu1 %v2901_v0 }
 0x192   :  { %2555 = vmatpush3.bf16.msra.mxu1 %v2854_v7 }
 0x193   :  { %2556 = vmatprep.subr.bf16.mxu1 %v2901_v0 }
 0x196   :  { %2557 = vmatpush3.bf16.msra.mxu1 %v2855_v10 }
 0x197   :  { %2558 = vmatprep.subr.bf16.mxu1 %v2901_v0 }
 0x19a   :  { %2559 = vmatpush3.bf16.msra.mxu1 %v2856_v19 }
 0x19b   :  { %2584 = vmatprep.subr.bf16.mxu1 %v2901_v0 }
 0x1bd   :  { %v509_v4 = vpop.f32.mrf.mxu1 }
 0x1bf   :  { %v2402_v5 = vpop.f32.mrf.mxu1 }
 0x1c1   :  { %v512_v9 = vpop.f32.mrf.mxu1 }
 0x1c3   :  { %v2403_v17 = vpop.f32.mrf.mxu1 }
 0x1d5   :  { %v834_v20 = vpop.f32.mrf.mxu0 }
 0x1d7   :  { %v2462_v21 = vpop.f32.mrf.mxu0 }
 0x1d8   :  { %v2878_v21 = vld [vmem:[%s3730_s3 + $0x68] sm:$0xff]  }
 0x1d9   :  { %v837_v11 = vpop.f32.mrf.mxu0 }
 0x1db   :  { %v2463_v12 = vpop.f32.mrf.mxu0 }
 0x1dc   :  { %v2880_v12 = vld [vmem:[%s3730_s3 + $0x58] sm:$0xff]  }
 0x1dd   :  { %v604_v13 = vpop.f32.mrf.mxu1 }
 0x1de   :  { %v605_v38 = vadd.f32 %v604_v13, %v509_v4  ;;  %v2881_v13 = vld [vmem:[%s3730_s3 + $0x50] sm:$0xff]  }
 0x1df   :  { %v2422_v23 = vpop.f32.mrf.mxu1 }
 0x1e0   :  { %v2882_v23 = vld [vmem:[%s3730_s3 + $0x48] sm:$0xff]  }
 0x1e1   :  { %v607_v15 = vpop.f32.mrf.mxu1 }
 0x1e2   :  { %v608_v43 = vadd.f32 %v607_v15, %v512_v9  ;;  %v2883_v15 = vld [vmem:[%s3730_s3 + $0x40] sm:$0xff]  }
 0x1e3   :  { %v2423_v25 = vpop.f32.mrf.mxu1 }
 0x1e4   :  { %v2865_v25 = vld [vmem:[%s3732_s5 + $0x88] sm:$0xff]  }
 0x1f5   :  { %v953_v28 = vpop.f32.mrf.mxu0 }
 0x1f7   :  { %v2502_v31 = vpop.f32.mrf.mxu0 }
 0x1f8   :  { %v2866_v31 = vld [vmem:[%s3732_s5 + $0x80] sm:$0xff]  }
 0x1f9   :  { %v956_v36 = vpop.f32.mrf.mxu0 }
 0x1fb   :  { %v2503_v37 = vpop.f32.mrf.mxu0 }
 0x1fd   :  { %v718_v39 = vpop.f32.mrf.mxu1 }
 0x1fe   :  { %v725_v41 = vadd.f32 %v718_v39, %v605_v38 }
 0x1ff   :  { %v2442_v42 = vpop.f32.mrf.mxu1 }
 0x200   :  { %v841_v45 = vadd.f32 %v834_v20, %v725_v41 }
 0x201   :  { %v721_v34 = vpop.f32.mrf.mxu1 }
 0x202   :  { %v726_v47 = vadd.f32 %v721_v34, %v608_v43  ;;  %v849_v50 = vadd.f32 %v3434_v46, %v841_v45 }
 0x203   :  { %v2443_v48 = vpop.f32.mrf.mxu1 }
 0x204   :  { %v842_v54 = vadd.f32 %v837_v11, %v726_v47  ;;  %v851_v6 = vmax.f32 %v849_v50, 0.0  ;;  %v2879_v11 = vld [vmem:[%s3730_s3 + $0x60] sm:$0xff]  }
 0x206   :  { %v850_v63 = vadd.f32 %v3434_v46, %v842_v54 }
 0x208   :  { %v852_v2 = vmax.f32 %v850_v63, 0.0 }
 0x20a   :  { %v853_v3 = vpack.c.bf16 %v852_v2, %v851_v6 }
 0x20c   :  { %2581 = vmatmul.mubr.bf16.vlgmr.msra.gmra.mxu0 %v853_v3 }
 0x20d   :  { %2605 = vmatpush3.bf16.msra.mxu0 %v3153_v1  ;;  %2620 = vmatprep.mubr.msk.bf16.mxu0 %vm2902_vm0, %v2901_v0 }
 0x20e   :  { %2606 = vmatprep.subr.bf16.mxu0 %v2901_v0 }
 0x211   :  { %2607 = vmatpush3.bf16.msra.mxu0 %v3163_v8 }
 0x212   :  { %2608 = vmatprep.subr.bf16.mxu0 %v2901_v0 }
 0x215   :  { %2609 = vmatpush3.bf16.msra.mxu0 %v3173_v14 }
 0x216   :  { %2610 = vmatprep.subr.bf16.mxu0 %v2901_v0  ;;  %v1045_v16 = vpop.f32.mrf.mxu0 }
 0x218   :  { %v2542_v4 = vpop.f32.mrf.mxu0 }
 0x219   :  { %2611 = vmatpush3.bf16.msra.mxu0 %v3181_v35 }
 0x21a   :  { %2612 = vmatprep.subr.bf16.mxu0 %v2901_v0  ;;  %v1048_v1 = vpop.f32.mrf.mxu0 }
 0x21c   :  { %v2543_v5 = vpop.f32.mrf.mxu0 }
 0x21d   :  { %2613 = vmatpush3.bf16.msra.mxu0 %v3188_v40  ;;  %v912_v7 = vpop.f32.mrf.mxu1 }
 0x21e   :  { %2614 = vmatprep.subr.bf16.mxu0 %v2901_v0  ;;  %v954_v35 = vadd.f32 %v953_v28, %v912_v7 }
 0x21f   :  { %v2482_v8 = vpop.f32.mrf.mxu1 }
 0x221   :  { %2615 = vmatpush3.bf16.msra.mxu0 %v3196_v44  ;;  %v915_v9 = vpop.f32.mrf.mxu1 }
 0x222   :  { %2616 = vmatprep.subr.bf16.mxu0 %v2901_v0 }
 0x223   :  { %v2483_v14 = vpop.f32.mrf.mxu1 }
 0x225   :  { %2617 = vmatpush3.bf16.msra.mxu0 %v3204_v49  ;;  %v957_v49 = vadd.f32 %v956_v36, %v915_v9 }
 0x226   :  { %2618 = vmatprep.subr.bf16.mxu0 %v2901_v0 }
 0x229   :  { %2619 = vmatpush3.bf16.msra.mxu0 %v3215_v52 }
 0x22a   :  { %2644 = vmatprep.subr.bf16.mxu0 %v2901_v0 }
 0x22c   :  { %2621 = vmatmul.mubr.bf16.vlgmr.msra.gmra.mxu0 %v3300_v62 }
 0x22d   :  { %2645 = vmatpush3.bf16.msra.mxu0 %v3061_v22  ;;  %2660 = vmatprep.mubr.msk.bf16.mxu0 %vm2902_vm0, %v2901_v0 }
 0x22e   :  { %2646 = vmatprep.subr.bf16.mxu0 %v2901_v0 }
 0x231   :  { %2647 = vmatpush3.bf16.msra.mxu0 %v3075_v24 }
 0x232   :  { %2648 = vmatprep.subr.bf16.mxu0 %v2901_v0 }
 0x235   :  { %2649 = vmatpush3.bf16.msra.mxu0 %v3087_v26 }
 0x236   :  { %2650 = vmatprep.subr.bf16.mxu0 %v2901_v0 }
 0x239   :  { %2651 = vmatpush3.bf16.msra.mxu0 %v3096_v27 }
 0x23a   :  { %2652 = vmatprep.subr.bf16.mxu0 %v2901_v0 }
 0x23d   :  { %2653 = vmatpush3.bf16.msra.mxu0 %v3106_v29  ;;  %v994_v22 = vpop.f32.mrf.mxu1 }
 0x23e   :  { %v1001_v40 = vadd.f32 %v994_v22, %v954_v35  ;;  %2654 = vmatprep.subr.bf16.mxu0 %v2901_v0 }
 0x23f   :  { %v2522_v44 = vpop.f32.mrf.mxu1 }
 0x240   :  { %v1052_v24 = vadd.f32 %v1045_v16, %v1001_v40 }
 0x241   :  { %2655 = vmatpush3.bf16.msra.mxu0 %v3115_v30  ;;  %v997_v52 = vpop.f32.mrf.mxu1  ;;  %v3476_v30 = vld [vmem:[#allocation2 + $0x38] sm:$0xff]  }
 0x242   :  { %v1002_v26 = vadd.f32 %v997_v52, %v957_v49  ;;  %2656 = vmatprep.subr.bf16.mxu0 %v2901_v0  ;;  %v1054_v27 = vadd.f32 %v3434_v46, %v1052_v24 }
 0x243   :  { %v2523_v62 = vpop.f32.mrf.mxu1 }
 0x244   :  { %v1053_v17 = vadd.f32 %v1048_v1, %v1002_v26  ;;  %v1056_v10 = vmax.f32 %v1054_v27, 0.0 }
 0x245   :  { %2657 = vmatpush3.bf16.msra.mxu0 %v3125_v32  ;;  %v2876_v32 = vld [vmem:[%s3730_s3 + $0x78] sm:$0xff]  }
 0x246   :  { %v1055_v29 = vadd.f32 %v3434_v46, %v1053_v17  ;;  %2658 = vmatprep.subr.bf16.mxu0 %v2901_v0 }
 0x248   :  { %v1057_v19 = vmax.f32 %v1055_v29, 0.0 }
 0x249   :  { %2659 = vmatpush3.bf16.msra.mxu0 %v3134_v33  ;;  %v2877_v33 = vld [vmem:[%s3730_s3 + $0x70] sm:$0xff]  }
 0x24a   :  { %v1058_v20 = vpack.c.bf16 %v1057_v19, %v1056_v10  ;;  %2684 = vmatprep.subr.bf16.mxu0 %v2901_v0 }
 0x24c   :  { %2661 = vmatmul.mubr.bf16.vlgmr.msra.gmra.mxu0 %v3476_v30  ;;  %2561 = vmatmul.mubr.bf16.vlgmr.msra.gmra.mxu1 %v1058_v20 }
 0x24d   :  { %2585 = vmatpush3.bf16.msra.mxu1 %v2876_v32  ;;  %2685 = vmatpush3.bf16.msra.mxu0 %v2876_v32  ;;  %v2884_v32 = vld [vmem:[%s3730_s3 + $0x38] sm:$0xff]  }
 0x24e   :  { %2586 = vmatprep.subr.bf16.mxu1 %v2901_v0  ;;  %2686 = vmatprep.subr.bf16.mxu0 %v2901_v0 }
 0x24f   :  { %2600 = vmatprep.mubr.msk.bf16.mxu1 %vm2902_vm0, %v2901_v0  ;;  %2700 = vmatprep.mubr.msk.bf16.mxu0 %vm2902_vm0, %v2901_v0 }
 0x251   :  { %2587 = vmatpush3.bf16.msra.mxu1 %v2877_v33  ;;  %2687 = vmatpush3.bf16.msra.mxu0 %v2877_v33  ;;  %v2885_v33 = vld [vmem:[%s3730_s3 + $0x30] sm:$0xff]  }
 0x252   :  { %2588 = vmatprep.subr.bf16.mxu1 %v2901_v0  ;;  %2688 = vmatprep.subr.bf16.mxu0 %v2901_v0 }
 0x255   :  { %2589 = vmatpush3.bf16.msra.mxu1 %v2878_v21  ;;  %2689 = vmatpush3.bf16.msra.mxu0 %v2878_v21  ;;  %v2886_v21 = vld [vmem:[%s3730_s3 + $0x28] sm:$0xff]  }
 0x256   :  { %2590 = vmatprep.subr.bf16.mxu1 %v2901_v0  ;;  %2690 = vmatprep.subr.bf16.mxu0 %v2901_v0 }
 0x259   :  { %2591 = vmatpush3.bf16.msra.mxu1 %v2879_v11  ;;  %2691 = vmatpush3.bf16.msra.mxu0 %v2879_v11  ;;  %v2887_v11 = vld [vmem:[%s3730_s3 + $0x20] sm:$0xff]  }
 0x25a   :  { %2592 = vmatprep.subr.bf16.mxu1 %v2901_v0  ;;  %2692 = vmatprep.subr.bf16.mxu0 %v2901_v0 }
 0x25d   :  { %2593 = vmatpush3.bf16.msra.mxu1 %v2880_v12  ;;  %2693 = vmatpush3.bf16.msra.mxu0 %v2880_v12  ;;  %v2888_v12 = vld [vmem:[%s3730_s3 + $0x18] sm:$0xff]  }
 0x25e   :  { %2594 = vmatprep.subr.bf16.mxu1 %v2901_v0  ;;  %2694 = vmatprep.subr.bf16.mxu0 %v2901_v0 }
 0x261   :  { %2595 = vmatpush3.bf16.msra.mxu1 %v2881_v13  ;;  %2695 = vmatpush3.bf16.msra.mxu0 %v2881_v13  ;;  %v2889_v13 = vld [vmem:[%s3730_s3 + $0x10] sm:$0xff]  }
 0x262   :  { %2596 = vmatprep.subr.bf16.mxu1 %v2901_v0  ;;  %2696 = vmatprep.subr.bf16.mxu0 %v2901_v0 }
 0x265   :  { %2597 = vmatpush3.bf16.msra.mxu1 %v2882_v23  ;;  %2697 = vmatpush3.bf16.msra.mxu0 %v2882_v23  ;;  %v2890_v23 = vld [vmem:[%s3730_s3 + $0x8] sm:$0xff]  }
 0x266   :  { %2598 = vmatprep.subr.bf16.mxu1 %v2901_v0  ;;  %2698 = vmatprep.subr.bf16.mxu0 %v2901_v0 }
 0x269   :  { %2599 = vmatpush3.bf16.msra.mxu1 %v2883_v15  ;;  %2699 = vmatpush3.bf16.msra.mxu0 %v2883_v15  ;;  %v2891_v15 = vld [vmem:[%s3730_s3] sm:$0xff]  }
 0x26a   :  { %2624 = vmatprep.subr.bf16.mxu1 %v2901_v0  ;;  %2724 = vmatprep.subr.bf16.mxu0 %v2901_v0 }
 0x26c   :  { %2601 = vmatmul.mubr.bf16.vlgmr.msra.gmra.mxu1 %v3207_v51  ;;  %2701 = vmatmul.mubr.bf16.vlgmr.msra.gmra.mxu0 %v3330_v18  ;;  %v2858_v51 = vld [vmem:[#allocation2 + $0x30] sm:$0xff]  }
 0x26d   :  { %2625 = vmatpush3.bf16.msra.mxu1 %v3226_v53  ;;  %2725 = vmatpush3.bf16.msra.mxu0 %v3226_v53  ;;  %v2859_v53 = vld [vmem:[%s3732_s5 + $0xb8] sm:$0xff]  }
 0x26e   :  { %2626 = vmatprep.subr.bf16.mxu1 %v2901_v0  ;;  %2726 = vmatprep.subr.bf16.mxu0 %v2901_v0 }
 0x26f   :  { %2640 = vmatprep.mubr.msk.bf16.mxu1 %vm2902_vm0, %v2901_v0  ;;  %2740 = vmatprep.mubr.msk.bf16.mxu0 %vm2902_vm0, %v2901_v0 }
 0x271   :  { %2627 = vmatpush3.bf16.msra.mxu1 %v3235_v55  ;;  %2727 = vmatpush3.bf16.msra.mxu0 %v3235_v55  ;;  %v2860_v55 = vld [vmem:[%s3732_s5 + $0xb0] sm:$0xff]  }
 0x272   :  { %2628 = vmatprep.subr.bf16.mxu1 %v2901_v0  ;;  %2728 = vmatprep.subr.bf16.mxu0 %v2901_v0 }
 0x275   :  { %2629 = vmatpush3.bf16.msra.mxu1 %v3246_v56  ;;  %2729 = vmatpush3.bf16.msra.mxu0 %v3246_v56  ;;  %v2861_v56 = vld [vmem:[%s3732_s5 + $0xa8] sm:$0xff]  }
 0x276   :  { %2630 = vmatprep.subr.bf16.mxu1 %v2901_v0  ;;  %2730 = vmatprep.subr.bf16.mxu0 %v2901_v0 }
 0x279   :  { %2631 = vmatpush3.bf16.msra.mxu1 %v3255_v57  ;;  %2731 = vmatpush3.bf16.msra.mxu0 %v3255_v57  ;;  %v2862_v57 = vld [vmem:[%s3732_s5 + $0xa0] sm:$0xff]  }
 0x27a   :  { %2632 = vmatprep.subr.bf16.mxu1 %v2901_v0  ;;  %2732 = vmatprep.subr.bf16.mxu0 %v2901_v0 }
 0x27d   :  { %2633 = vmatpush3.bf16.msra.mxu1 %v3264_v58  ;;  %2733 = vmatpush3.bf16.msra.mxu0 %v3264_v58  ;;  %v2863_v58 = vld [vmem:[%s3732_s5 + $0x98] sm:$0xff]  }
 0x27e   :  { %2634 = vmatprep.subr.bf16.mxu1 %v2901_v0  ;;  %2734 = vmatprep.subr.bf16.mxu0 %v2901_v0 }
 0x281   :  { %2635 = vmatpush3.bf16.msra.mxu1 %v3273_v59  ;;  %2735 = vmatpush3.bf16.msra.mxu0 %v3273_v59 }
 0x282   :  { %2636 = vmatprep.subr.bf16.mxu1 %v2901_v0  ;;  %2736 = vmatprep.subr.bf16.mxu0 %v2901_v0 }
 0x285   :  { %2637 = vmatpush3.bf16.msra.mxu1 %v3282_v60  ;;  %2737 = vmatpush3.bf16.msra.mxu0 %v3282_v60  ;;  %v2864_v60 = vld [vmem:[%s3732_s5 + $0x90] sm:$0xff]  }
 0x286   :  { %2638 = vmatprep.subr.bf16.mxu1 %v2901_v0  ;;  %2738 = vmatprep.subr.bf16.mxu0 %v2901_v0 }
 0x289   :  { %2639 = vmatpush3.bf16.msra.mxu1 %v3291_v61  ;;  %2739 = vmatpush3.bf16.msra.mxu0 %v3291_v61 }
 0x28a   :  { %2664 = vmatprep.subr.bf16.mxu1 %v2901_v0  ;;  %2764 = vmatprep.subr.bf16.mxu0 %v2901_v0 }
 0x28c   :  { %2641 = vmatmul.mubr.bf16.vlgmr.msra.gmra.mxu1 %v2858_v51  ;;  %2741 = vmatmul.mubr.bf16.vlgmr.msra.gmra.mxu0 %v3476_v30  ;;  %v2892_v51 = vld [vmem:[#allocation2 + $0x20] sm:$0xff]  }
 0x28d   :  { %2680 = vmatprep.mubr.msk.bf16.mxu1 %vm2902_vm0, %v2901_v0  ;;  %2780 = vmatprep.mubr.msk.bf16.mxu0 %vm2902_vm0, %v2901_v0 }
 0x28e   :  { %2665 = vmatpush3.bf16.msra.mxu1 %v2859_v53  ;;  %v2893_v53 = vld [vmem:[%s3730_s3 + $0xf8] sm:$0xff]  }
 0x28f   :  { %2666 = vmatprep.subr.bf16.mxu1 %v2901_v0 }
 0x292   :  { %2667 = vmatpush3.bf16.msra.mxu1 %v2860_v55  ;;  %v2894_v55 = vld [vmem:[%s3730_s3 + $0xf0] sm:$0xff]  }
 0x293   :  { %2668 = vmatprep.subr.bf16.mxu1 %v2901_v0 }
 0x296   :  { %2669 = vmatpush3.bf16.msra.mxu1 %v2861_v56  ;;  %v2895_v56 = vld [vmem:[%s3730_s3 + $0xe8] sm:$0xff]  }
 0x297   :  { %2670 = vmatprep.subr.bf16.mxu1 %v2901_v0 }
 0x29a   :  { %2671 = vmatpush3.bf16.msra.mxu1 %v2862_v57  ;;  %v2896_v57 = vld [vmem:[%s3730_s3 + $0xe0] sm:$0xff]  }
 0x29b   :  { %2672 = vmatprep.subr.bf16.mxu1 %v2901_v0 }
 0x29e   :  { %2673 = vmatpush3.bf16.msra.mxu1 %v2863_v58  ;;  %v2897_v58 = vld [vmem:[%s3730_s3 + $0xd8] sm:$0xff]  }
 0x29f   :  { %2674 = vmatprep.subr.bf16.mxu1 %v2901_v0 }
 0x2a2   :  { %2675 = vmatpush3.bf16.msra.mxu1 %v2864_v60  ;;  %v2899_v60 = vld [vmem:[%s3730_s3 + $0xc8] sm:$0xff]  }
 0x2a3   :  { %2676 = vmatprep.subr.bf16.mxu1 %v2901_v0 }
 0x2a6   :  { %2677 = vmatpush3.bf16.msra.mxu1 %v2865_v25  ;;  %v2868_v25 = vld [vmem:[%s3732_s5 + $0xf8] sm:$0xff]  }
 0x2a7   :  { %2678 = vmatprep.subr.bf16.mxu1 %v2901_v0  ;;  %2765 = vmatpush3.bf16.msra.mxu0 %v2868_v25 }
 0x2a8   :  { %2766 = vmatprep.subr.bf16.mxu0 %v2901_v0 }
 0x2aa   :  { %2679 = vmatpush3.bf16.msra.mxu1 %v2866_v31  ;;  %v2870_v31 = vld [vmem:[%s3732_s5 + $0xe8] sm:$0xff]  }
 0x2ab   :  { %2704 = vmatprep.subr.bf16.mxu1 %v2901_v0 }
 0x2cc   :  { %v1247_v59 = vpop.f32.mrf.mxu0 }
 0x2ce   :  { %v2582_v61 = vpop.f32.mrf.mxu0 }
 0x2cf   :  { %v2900_v61 = vld [vmem:[%s3730_s3 + $0xc0] sm:$0xff]  }
 0x2d0   :  { %v1250_v18 = vpop.f32.mrf.mxu0 }
 0x2d2   :  { %v2583_v28 = vpop.f32.mrf.mxu0 }
 0x2d3   :  { %v2869_v28 = vld [vmem:[%s3732_s5 + $0xf0] sm:$0xff]  }
 0x2d4   :  { %2767 = vmatpush3.bf16.msra.mxu0 %v2869_v28 }
 0x2d5   :  { %2768 = vmatprep.subr.bf16.mxu0 %v2901_v0 }
 0x2d8   :  { %2769 = vmatpush3.bf16.msra.mxu0 %v2870_v31 }
 0x2d9   :  { %2770 = vmatprep.subr.bf16.mxu0 %v2901_v0 }
 0x2ec   :  { %v1329_v36 = vpop.f32.mrf.mxu0 }
 0x2ee   :  { %v2622_v37 = vpop.f32.mrf.mxu0 }
 0x2ef   :  { %v2872_v37 = vld [vmem:[%s3732_s5 + $0xd8] sm:$0xff]  }
 0x2f0   :  { %v1332_v38 = vpop.f32.mrf.mxu0 }
 0x2f2   :  { %v2623_v39 = vpop.f32.mrf.mxu0 }
 0x2f3   :  { %v2874_v39 = vld [vmem:[%s3732_s5 + $0xc8] sm:$0xff]  }
 0x30c   :  { %v1429_v41 = vpop.f32.mrf.mxu0  ;;  %v1158_v42 = vpop.f32.mrf.mxu1 }
 0x30d   :  { %v3599_v43 = vadd.f32 %v1247_v59, %v1158_v42  ;;  %v2898_v59 = vld [vmem:[%s3730_s3 + $0xd0] sm:$0xff]  }
 0x30e   :  { %v2662_v45 = vpop.f32.mrf.mxu0  ;;  %v2562_v34 = vpop.f32.mrf.mxu1 }
 0x310   :  { %v1432_v47 = vpop.f32.mrf.mxu0  ;;  %v1161_v48 = vpop.f32.mrf.mxu1 }
 0x311   :  { %v3601_v50 = vadd.f32 %v1250_v18, %v1161_v48  ;;  %v2867_v18 = vld [vmem:[#allocation2 + $0x40] sm:$0xff]  }
 0x312   :  { %v2663_v54 = vpop.f32.mrf.mxu0  ;;  %v2563_v63 = vpop.f32.mrf.mxu1 }
 0x32c   :  { %v1288_v6 = vpop.f32.mrf.mxu1  ;;  %v3603_v2 = vpop.f32.mrf.mxu0 }
 0x32d   :  { %v1330_v8 = vadd.f32 %v1329_v36, %v1288_v6  ;;  %v2871_v36 = vld [vmem:[%s3732_s5 + $0xe0] sm:$0xff]  }
 0x32e   :  { %v2602_v3 = vpop.f32.mrf.mxu1  ;;  %v2702_v16 = vpop.f32.mrf.mxu0  ;;  %2771 = vmatpush3.bf16.msra.mxu0 %v2871_v36 }
 0x32f   :  { %2772 = vmatprep.subr.bf16.mxu0 %v2901_v0 }
 0x330   :  { %v1291_v4 = vpop.f32.mrf.mxu1  ;;  %v3605_v1 = vpop.f32.mrf.mxu0 }
 0x331   :  { %v1333_v44 = vadd.f32 %v1332_v38, %v1291_v4  ;;  %v2873_v38 = vld [vmem:[%s3732_s5 + $0xd0] sm:$0xff]  }
 0x332   :  { %v2603_v5 = vpop.f32.mrf.mxu1  ;;  %v2703_v7 = vpop.f32.mrf.mxu0  ;;  %2773 = vmatpush3.bf16.msra.mxu0 %v2872_v37 }
 0x333   :  { %2774 = vmatprep.subr.bf16.mxu0 %v2901_v0 }
 0x336   :  { %2775 = vmatpush3.bf16.msra.mxu0 %v2873_v38 }
 0x337   :  { %2776 = vmatprep.subr.bf16.mxu0 %v2901_v0 }
 0x33a   :  { %2777 = vmatpush3.bf16.msra.mxu0 %v2874_v39 }
 0x33b   :  { %2778 = vmatprep.subr.bf16.mxu0 %v2901_v0 }
 0x34c   :  { %v1378_v9 = vpop.f32.mrf.mxu1  ;;  %v3607_v14 = vpop.f32.mrf.mxu0 }
 0x34d   :  { %v1385_v35 = vadd.f32 %v1378_v9, %v1330_v8 }
 0x34e   :  { %v2642_v22 = vpop.f32.mrf.mxu1  ;;  %v2742_v40 = vpop.f32.mrf.mxu0 }
 0x34f   :  { %v1436_v49 = vadd.f32 %v1429_v41, %v1385_v35  ;;  %v2875_v41 = vld [vmem:[%s3732_s5 + $0xc0] sm:$0xff]  }
 0x350   :  { %v1381_v24 = vpop.f32.mrf.mxu1  ;;  %v3609_v52 = vpop.f32.mrf.mxu0  ;;  %2779 = vmatpush3.bf16.msra.mxu0 %v2875_v41 }
 0x351   :  { %v1386_v26 = vadd.f32 %v1381_v24, %v1333_v44  ;;  %v1438_v17 = vadd.f32 %v3434_v46, %v1436_v49 }
 0x352   :  { %v2643_v62 = vpop.f32.mrf.mxu1  ;;  %v2743_v27 = vpop.f32.mrf.mxu0 }
 0x353   :  { %v1437_v29 = vadd.f32 %v1432_v47, %v1386_v26  ;;  %v1440_v19 = vmax.f32 %v1438_v17, 0.0 }
 0x355   :  { %v1439_v10 = vadd.f32 %v3434_v46, %v1437_v29 }
 0x357   :  { %v1441_v20 = vmax.f32 %v1439_v10, 0.0 }
 0x359   :  { %v1442_v30 = vpack.c.bf16 %v1441_v20, %v1440_v19 }
 0x35b   :  { %2681 = vmatmul.mubr.bf16.vlgmr.msra.gmra.mxu1 %v1442_v30 }
 0x35c   :  { %2705 = vmatpush3.bf16.msra.mxu1 %v2884_v32  ;;  %2720 = vmatprep.mubr.msk.bf16.mxu1 %vm2902_vm0, %v2901_v0 }
 0x35d   :  { %2706 = vmatprep.subr.bf16.mxu1 %v2901_v0 }
 0x360   :  { %2707 = vmatpush3.bf16.msra.mxu1 %v2885_v33 }
 0x361   :  { %2708 = vmatprep.subr.bf16.mxu1 %v2901_v0 }
 0x364   :  { %2709 = vmatpush3.bf16.msra.mxu1 %v2886_v21 }
 0x365   :  { %2710 = vmatprep.subr.bf16.mxu1 %v2901_v0 }
 0x368   :  { %2711 = vmatpush3.bf16.msra.mxu1 %v2887_v11 }
 0x369   :  { %2712 = vmatprep.subr.bf16.mxu1 %v2901_v0 }
 0x36c   :  { %2713 = vmatpush3.bf16.msra.mxu1 %v2888_v12 }
 0x36d   :  { %2714 = vmatprep.subr.bf16.mxu1 %v2901_v0 }
 0x370   :  { %2715 = vmatpush3.bf16.msra.mxu1 %v2889_v13 }
 0x371   :  { %2716 = vmatprep.subr.bf16.mxu1 %v2901_v0 }
 0x374   :  { %2717 = vmatpush3.bf16.msra.mxu1 %v2890_v23 }
 0x375   :  { %2718 = vmatprep.subr.bf16.mxu1 %v2901_v0 }
 0x378   :  { %2719 = vmatpush3.bf16.msra.mxu1 %v2891_v15 }
 0x379   :  { %2744 = vmatprep.subr.bf16.mxu1 %v2901_v0 }
 0x37b   :  { %2721 = vmatmul.mubr.bf16.vlgmr.msra.gmra.mxu1 %v2892_v51 }
 0x37c   :  { %2745 = vmatpush3.bf16.msra.mxu1 %v2893_v53  ;;  %2760 = vmatprep.mubr.msk.bf16.mxu1 %vm2902_vm0, %v2901_v0 }
 0x37d   :  { %2746 = vmatprep.subr.bf16.mxu1 %v2901_v0 }
 0x380   :  { %2747 = vmatpush3.bf16.msra.mxu1 %v2894_v55 }
 0x381   :  { %2748 = vmatprep.subr.bf16.mxu1 %v2901_v0 }
 0x384   :  { %2749 = vmatpush3.bf16.msra.mxu1 %v2895_v56 }
 0x385   :  { %2750 = vmatprep.subr.bf16.mxu1 %v2901_v0 }
 0x388   :  { %2751 = vmatpush3.bf16.msra.mxu1 %v2896_v57 }
 0x389   :  { %2752 = vmatprep.subr.bf16.mxu1 %v2901_v0 }
 0x38c   :  { %2753 = vmatpush3.bf16.msra.mxu1 %v2897_v58 }
 0x38d   :  { %2754 = vmatprep.subr.bf16.mxu1 %v2901_v0 }
 0x390   :  { %2755 = vmatpush3.bf16.msra.mxu1 %v2898_v59 }
 0x391   :  { %2756 = vmatprep.subr.bf16.mxu1 %v2901_v0 }
 0x394   :  { %2757 = vmatpush3.bf16.msra.mxu1 %v2899_v60 }
 0x395   :  { %2758 = vmatprep.subr.bf16.mxu1 %v2901_v0 }
 0x398   :  { %2759 = vmatpush3.bf16.msra.mxu1 %v2900_v61 }
 0x39b   :  { %2761 = vmatmul.mubr.bf16.vlgmr.msra.gmra.mxu1 %v2867_v18 }
 0x41b   :  { %v1542_v42 = vpop.f32.mrf.mxu1 }
 0x41c   :  { %v1549_v45 = vadd.f32 %v1542_v42, %v3599_v43 }
 0x41d   :  { %v2682_v34 = vpop.f32.mrf.mxu1 }
 0x41f   :  { %v1545_v47 = vpop.f32.mrf.mxu1 }
 0x420   :  { %v1550_v48 = vadd.f32 %v1545_v47, %v3601_v50 }
 0x421   :  { %v2683_v54 = vpop.f32.mrf.mxu1 }
 0x43b   :  { %v1626_v63 = vpop.f32.mrf.mxu1 }
 0x43c   :  { %v1627_v4 = vadd.f32 %v1626_v63, %v3603_v2 }
 0x43d   :  { %v2722_v6 = vpop.f32.mrf.mxu1 }
 0x43e   :  { %v1674_v5 = vadd.f32 %v3607_v14, %v1627_v4 }
 0x43f   :  { %v1629_v3 = vpop.f32.mrf.mxu1 }
 0x440   :  { %v1630_v0 = vadd.f32 %v1629_v3, %v3605_v1  ;;  %v2063_v1 = vld [vmem:[%s3734_s6] ss:$0 sm:$0xff] }
 0x441   :  { %v2723_v16 = vpop.f32.mrf.mxu1 }
 0x442   :  { %v1675_v43 = vadd.f32 %v3609_v52, %v1630_v0 }
 0x45b   :  { %v1718_v7 = vpop.f32.mrf.mxu1 }
 0x45c   :  { %v1725_v8 = vadd.f32 %v1718_v7, %v1674_v5 }
 0x45d   :  { %v2762_v9 = vpop.f32.mrf.mxu1 }
 0x45e   :  { %v1727_v22 = vadd.f32 %v3434_v46, %v1725_v8 }
 0x45f   :  { %v1721_v35 = vpop.f32.mrf.mxu1 }
 0x460   :  { %v1726_v50 = vadd.f32 %v1721_v35, %v1675_v43  ;;  %v1729_v49 = vmax.f32 %v1727_v22, 0.0 }
 0x461   :  { %v2763_v40 = vpop.f32.mrf.mxu1 }
 0x462   :  { %v1728_v44 = vadd.f32 %v3434_v46, %v1726_v50 }
 0x464   :  { %v1730_v24 = vmax.f32 %v1728_v44, 0.0 }
 0x466   :  { %v1731_v26 = vpack.c.bf16 %v1730_v24, %v1729_v49 }
 0x468   :  { %2781 = vmatmul.mubr.bf16.vlgmr.msra.gmra.mxu0 %v1731_v26 }
 0x528   :  { %v1831_v2 = vpop.f32.mrf.mxu0 }
 0x529   :  { %v1838_v14 = vadd.f32 %v1831_v2, %v1549_v45 }
 0x52a   :  { %v2782_v62 = vpop.f32.mrf.mxu0 }
 0x52b   :  { %v1847_v27 = vadd.f32 %v2063_v1, %v1838_v14 }
 0x52c   :  { %v1834_v52 = vpop.f32.mrf.mxu0 }
 0x52d   :  { %v1849_v17 = vmax.f32 %v1847_v27, 0.0  ;;  %v1839_v29 = vadd.f32 %v1834_v52, %v1550_v48 }
 0x52e   :  { %v2783_v10 = vpop.f32.mrf.mxu0 }
 0x52f   :  { %1851 = vst [vmem:[%s3735_s7] sm:$0xff] %v1849_v17  ;;  %v1848_v46 = vadd.f32 %v2063_v1, %v1839_v29 }
 0x531   :  { %v1850_v19 = vmax.f32 %v1848_v46, 0.0 }
 0x533   :  { %1852 = vst [vmem:[%s3735_s7 + $0x8] sm:$0xff] %v1850_v19 }

// kernel: fwd.1
= control target key start
LH: loop header
LB: loop body
LE: loop exit
PB: predicated region body
PF: predicated region fallthrough
CT: control target
= control target key end

     0   :  { %v2901_v0 = vmov 0.0   ;;  %vm2902_vm0 = vmmov 0   ;;  %s3728_s1 = inlined_call_operand.vmem [shape: bf16[128,128], index: 1, kind: input, shape index: {}]   ;;  %s3729_s0 = inlined_call_operand.vmem [shape: bf16[1,144,128], index: 0, kind: input, shape index: {}]   ;;  %s3730_s3 = inlined_call_operand.vmem [shape: bf16[2,2,128,128], index: 3, kind: input, shape index: {}]   ;;  %s3731_s2 = inlined_call_operand.vmem [shape: f32[1,128], index: 2, kind: input, shape index: {}]   ;;  %s3732_s5 = inlined_call_operand.vmem [shape: bf16[4,128,128], index: 5, kind: input, shape index: {}]   ;;  %s3733_s4 = inlined_call_operand.vmem [shape: f32[1,128], index: 4, kind: input, shape index: {}]   ;;  %s3734_s6 = inlined_call_operand.vmem [shape: f32[1,128], index: 6, kind: input, shape index: {}]   ;;  %s3735_s7 = inlined_call_operand.vmem [shape: f32[16,128], index: 7, kind: output, shape index: {}]  }
   0x1   :  { %2332 = vmatprep.subr.bf16.mxu0 %v2901_v0  ;;  %v2786_v1 = vld [vmem:[%s3728_s1 + $0x38] sm:$0xff]   ;;  %2348 = vmatprep.mubr.msk.bf16.mxu0 %vm2902_vm0, %v2901_v0  ;;  %v2787_v2 = vld [vmem:[%s3728_s1 + $0x30] sm:$0xff]   ;;  %v2788_v3 = vld [vmem:[%s3728_s1 + $0x28] sm:$0xff]  }
   0x2   :  { %2384 = vmatprep.subr.bf16.mxu1 %v2901_v0  ;;  %2400 = vmatprep.mubr.msk.bf16.mxu1 %vm2902_vm0, %v2901_v0  ;;  %v2789_v4 = vld [vmem:[%s3728_s1 + $0x20] sm:$0xff]   ;;  %v2790_v5 = vld [vmem:[%s3728_s1 + $0x18] sm:$0xff]   ;;  %v2791_v7 = vld [vmem:[%s3728_s1 + $0x10] sm:$0xff]  }
   0x3   :  { %2333 = vmatpush3.bf16.msra.mxu0 %v2786_v1  ;;  %v2970_v6 = vld [vmem:[%s3730_s3 + $0x78] sm:$0xff]   ;;  %v2792_v8 = vld [vmem:[%s3728_s1 + $0x8] sm:$0xff]   ;;  %v2793_v9 = vld [vmem:[%s3728_s1] sm:$0xff]  }
   0x4   :  { %2334 = vmatprep.subr.bf16.mxu0 %v2901_v0  ;;  %2385 = vmatpush3.bf16.msra.mxu1 %v2970_v6  ;;  %v2794_v10 = vld [vmem:[%s3729_s0] sm:$0xff]   ;;  %v2795_v11 = vld [vmem:[%s3729_s0 + $0x8] sm:$0xff]   ;;  %v2796_v12 = vld [vmem:[%s3729_s0 + $0x10] sm:$0xff]  }
   0x5   :  { %2386 = vmatprep.subr.bf16.mxu1 %v2901_v0  ;;  %v2797_v13 = vld [vmem:[%s3729_s0 + $0x18] sm:$0xff]   ;;  %v2798_v14 = vld [vmem:[%s3729_s0 + $0x20] sm:$0xff]   ;;  %v2799_v15 = vld [vmem:[%s3729_s0 + $0x28] sm:$0xff]  }
   0x6   :  { %v3021_v16 = vld [vmem:[%s3730_s3 + $0x70] sm:$0xff]   ;;  %v3028_v17 = vld [vmem:[%s3730_s3 + $0x68] sm:$0xff]   ;;  %v3035_v18 = vld [vmem:[%s3730_s3 + $0x60] sm:$0xff]  }
   0x7   :  { %2335 = vmatpush3.bf16.msra.mxu0 %v2787_v2  ;;  %v3042_v19 = vld [vmem:[%s3730_s3 + $0x58] sm:$0xff]   ;;  %v3049_v20 = vld [vmem:[%s3730_s3 + $0x50] sm:$0xff]   ;;  %v3056_v21 = vld [vmem:[%s3730_s3 + $0x48] sm:$0xff]  }
   0x8   :  { %2336 = vmatprep.subr.bf16.mxu0 %v2901_v0  ;;  %2387 = vmatpush3.bf16.msra.mxu1 %v3021_v16  ;;  %v3061_v22 = vld [vmem:[%s3730_s3 + $0xf8] sm:$0xff]   ;;  %v3070_v23 = vld [vmem:[%s3730_s3 + $0x40] sm:$0xff]   ;;  %v3075_v24 = vld [vmem:[%s3730_s3 + $0xf0] sm:$0xff]  }
   0x9   :  { %2388 = vmatprep.subr.bf16.mxu1 %v2901_v0  ;;  %v2810_v25 = vld [vmem:[%s3729_s0 + $0x30] sm:$0xff]   ;;  %v3087_v26 = vld [vmem:[%s3730_s3 + $0xe8] sm:$0xff]   ;;  %v3096_v27 = vld [vmem:[%s3730_s3 + $0xe0] sm:$0xff]  }
   0xa   :  { %v2816_v28 = vld [vmem:[%s3729_s0 + $0x38] sm:$0xff]   ;;  %v3115_v30 = vld [vmem:[%s3730_s3 + $0xd0] sm:$0xff]   ;;  %v2821_v31 = vld [vmem:[%s3729_s0 + $0x40] sm:$0xff]  }
   0xb   :  { %2337 = vmatpush3.bf16.msra.mxu0 %v2788_v3  ;;  %v3106_v29 = vld [vmem:[%s3730_s3 + $0xd8] sm:$0xff]   ;;  %v3125_v32 = vld [vmem:[%s3730_s3 + $0xc8] sm:$0xff]   ;;  %v3134_v33 = vld [vmem:[%s3730_s3 + $0xc0] sm:$0xff]  }
   0xc   :  { %2338 = vmatprep.subr.bf16.mxu0 %v2901_v0  ;;  %2389 = vmatpush3.bf16.msra.mxu1 %v3028_v17  ;;  %v3141_v34 = vld [vmem:[%s3731_s2] ss:$0 sm:$0xff]  ;;  %v3153_v1 = vld [vmem:[%s3730_s3 + $0x38] sm:$0xff]  }
   0xd   :  { %2390 = vmatprep.subr.bf16.mxu1 %v2901_v0 }
   0xf   :  { %2339 = vmatpush3.bf16.msra.mxu0 %v2789_v4 }
  0x10   :  { %2340 = vmatprep.subr.bf16.mxu0 %v2901_v0  ;;  %2391 = vmatpush3.bf16.msra.mxu1 %v3035_v18 }
  0x11   :  { %2392 = vmatprep.subr.bf16.mxu1 %v2901_v0 }
  0x13   :  { %2341 = vmatpush3.bf16.msra.mxu0 %v2790_v5 }
  0x14   :  { %2342 = vmatprep.subr.bf16.mxu0 %v2901_v0  ;;  %2393 = vmatpush3.bf16.msra.mxu1 %v3042_v19 }
  0x15   :  { %2394 = vmatprep.subr.bf16.mxu1 %v2901_v0 }
  0x17   :  { %2343 = vmatpush3.bf16.msra.mxu0 %v2791_v7 }
  0x18   :  { %2344 = vmatprep.subr.bf16.mxu0 %v2901_v0  ;;  %2395 = vmatpush3.bf16.msra.mxu1 %v3049_v20 }
  0x19   :  { %2396 = vmatprep.subr.bf16.mxu1 %v2901_v0 }
  0x1b   :  { %2345 = vmatpush3.bf16.msra.mxu0 %v2792_v8  ;;  %v3163_v8 = vld [vmem:[%s3730_s3 + $0x30] sm:$0xff]  }
  0x1c   :  { %2346 = vmatprep.subr.bf16.mxu0 %v2901_v0  ;;  %2397 = vmatpush3.bf16.msra.mxu1 %v3056_v21 }
  0x1d   :  { %2398 = vmatprep.subr.bf16.mxu1 %v2901_v0 }
  0x1f   :  { %2347 = vmatpush3.bf16.msra.mxu0 %v2793_v9 }
  0x20   :  { %2444 = vmatprep.subr.bf16.mxu0 %v2901_v0  ;;  %2399 = vmatpush3.bf16.msra.mxu1 %v3070_v23 }
  0x21   :  { %2404 = vmatprep.subr.bf16.mxu1 %v2901_v0 }
  0x22   :  { %2349 = vmatmul.mubr.bf16.vlgmr.msra.gmra.mxu0 %v2794_v10 }
  0x23   :  { %2352 = vmatprep.mubr.msk.bf16.mxu0 %vm2902_vm0, %v2901_v0  ;;  %2445 = vmatpush3.bf16.msra.mxu0 %v3061_v22 }
  0x24   :  { %2446 = vmatprep.subr.bf16.mxu0 %v2901_v0 }
  0x27   :  { %2447 = vmatpush3.bf16.msra.mxu0 %v3075_v24 }
  0x28   :  { %2448 = vmatprep.subr.bf16.mxu0 %v2901_v0 }
  0x2a   :  { %2353 = vmatmul.mubr.bf16.gmra.mxu0 %v2795_v11 }
  0x2b   :  { %2356 = vmatprep.mubr.msk.bf16.mxu0 %vm2902_vm0, %v2901_v0  ;;  %2449 = vmatpush3.bf16.msra.mxu0 %v3087_v26 }
  0x2c   :  { %2450 = vmatprep.subr.bf16.mxu0 %v2901_v0 }
  0x2f   :  { %2451 = vmatpush3.bf16.msra.mxu0 %v3096_v27 }
  0x30   :  { %2452 = vmatprep.subr.bf16.mxu0 %v2901_v0 }
  0x32   :  { %2357 = vmatmul.mubr.bf16.gmra.mxu0 %v2796_v12 }
  0x33   :  { %2360 = vmatprep.mubr.msk.bf16.mxu0 %vm2902_vm0, %v2901_v0  ;;  %2453 = vmatpush3.bf16.msra.mxu0 %v3106_v29 }
  0x34   :  { %2454 = vmatprep.subr.bf16.mxu0 %v2901_v0 }
  0x37   :  { %2455 = vmatpush3.bf16.msra.mxu0 %v3115_v30 }
  0x38   :  { %2456 = vmatprep.subr.bf16.mxu0 %v2901_v0 }
  0x3a   :  { %2361 = vmatmul.mubr.bf16.gmra.mxu0 %v2797_v13 }
  0x3b   :  { %2364 = vmatprep.mubr.msk.bf16.mxu0 %vm2902_vm0, %v2901_v0  ;;  %2457 = vmatpush3.bf16.msra.mxu0 %v3125_v32 }
  0x3c   :  { %2458 = vmatprep.subr.bf16.mxu0 %v2901_v0 }
  0x3f   :  { %2459 = vmatpush3.bf16.msra.mxu0 %v3134_v33 }
  0x40   :  { %2484 = vmatprep.subr.bf16.mxu0 %v2901_v0 }
  0x42   :  { %2365 = vmatmul.mubr.bf16.gmra.mxu0 %v2798_v14  ;;  %v3173_v14 = vld [vmem:[%s3730_s3 + $0x28] sm:$0xff]  }
  0x43   :  { %2368 = vmatprep.mubr.msk.bf16.mxu0 %vm2902_vm0, %v2901_v0 }
  0x4a   :  { %2369 = vmatmul.mubr.bf16.gmra.mxu0 %v2799_v15 }
  0x4b   :  { %2372 = vmatprep.mubr.msk.bf16.mxu0 %vm2902_vm0, %v2901_v0 }
  0x52   :  { %2373 = vmatmul.mubr.bf16.gmra.mxu0 %v2810_v25 }
  0x53   :  { %2376 = vmatprep.mubr.msk.bf16.mxu0 %vm2902_vm0, %v2901_v0 }
  0x5a   :  { %2377 = vmatmul.mubr.bf16.gmra.mxu0 %v2816_v28 }
  0x5b   :  { %2380 = vmatprep.mubr.msk.bf16.mxu0 %vm2902_vm0, %v2901_v0 }
  0x62   :  { %2381 = vmatmul.mubr.bf16.gmra.mxu0 %v2821_v31 }
  0x63   :  { %2460 = vmatprep.mubr.msk.bf16.mxu0 %vm2902_vm0, %v2901_v0 }
  0xe2   :  { %v204_v35 = vpop.f32.mrf.mxu0 }
  0xe3   :  { %v205_v37 = vadd.f32 %v3141_v34, %v204_v35  ;;  %v3181_v35 = vld [vmem:[%s3730_s3 + $0x20] sm:$0xff]  }
  0xe4   :  { %v2350_v36 = vpop.f32.mrf.mxu0 }
  0xe5   :  { %v275_v41 = vmax.f32 %v205_v37, 0.0 }
  0xe6   :  { %v207_v38 = vpop.f32.mrf.mxu0 }
  0xe7   :  { %v208_v39 = vadd.f32 %v3141_v34, %v207_v38 }
  0xe8   :  { %v2351_v40 = vpop.f32.mrf.mxu0 }
  0xe9   :  { %v276_v42 = vmax.f32 %v208_v39, 0.0  ;;  %v3188_v40 = vld [vmem:[%s3730_s3 + $0x18] sm:$0xff]  }
  0xea   :  { %v212_v43 = vpop.f32.mrf.mxu0 }
  0xeb   :  { %v2085_v44 = vpack.c.bf16 %v276_v42, %v275_v41  ;;  %v213_v46 = vadd.f32 %v3141_v34, %v212_v43 }
  0xec   :  { %v2354_v45 = vpop.f32.mrf.mxu0 }
  0xed   :  { %2086 = vst [vmem:[#allocation2] sm:$0xff] %v2085_v44   ;;  %v277_v50 = vmax.f32 %v213_v46, 0.0  ;;  %v3196_v44 = vld [vmem:[%s3730_s3 + $0x10] sm:$0xff]  }
  0xee   :  { %v215_v47 = vpop.f32.mrf.mxu0 }
  0xef   :  { %v216_v48 = vadd.f32 %v3141_v34, %v215_v47 }
  0xf0   :  { %v2355_v49 = vpop.f32.mrf.mxu0 }
  0xf1   :  { %v278_v51 = vmax.f32 %v216_v48, 0.0  ;;  %v3204_v49 = vld [vmem:[%s3730_s3 + $0x8] sm:$0xff]  }
  0xf2   :  { %v220_v52 = vpop.f32.mrf.mxu0 }
  0xf3   :  { %v2090_v53 = vpack.c.bf16 %v278_v51, %v277_v50  ;;  %v221_v54 = vadd.f32 %v3141_v34, %v220_v52  ;;  %v3215_v52 = vld [vmem:[%s3730_s3] sm:$0xff]  }
  0xf4   :  { %v2358_v55 = vpop.f32.mrf.mxu0 }
  0xf5   :  { %2127 = vst [vmem:[#allocation2 + $0x8] sm:$0xff] %v2090_v53   ;;  %v279_v57 = vmax.f32 %v221_v54, 0.0  ;;  %v3226_v53 = vld [vmem:[%s3730_s3 + $0xb8] sm:$0xff]   ;;  %v2829_v54 = vld [vmem:[#allocation2] sm:$0xff]   ;;  %v3235_v55 = vld [vmem:[%s3730_s3 + $0xb0] sm:$0xff]  }
  0xf6   :  { %v223_v56 = vpop.f32.mrf.mxu0 }
  0xf7   :  { %v224_v58 = vadd.f32 %v3141_v34, %v223_v56  ;;  %v3246_v56 = vld [vmem:[%s3730_s3 + $0xa8] sm:$0xff]  }
  0xf8   :  { %v2359_v59 = vpop.f32.mrf.mxu0 }
  0xf9   :  { %v280_v60 = vmax.f32 %v224_v58, 0.0  ;;  %v3264_v58 = vld [vmem:[%s3730_s3 + $0x98] sm:$0xff]   ;;  %v3273_v59 = vld [vmem:[%s3730_s3 + $0x90] sm:$0xff]  }
  0xfa   :  { %v228_v61 = vpop.f32.mrf.mxu0 }
  0xfb   :  { %v2095_v62 = vpack.c.bf16 %v280_v60, %v279_v57  ;;  %v229_v63 = vadd.f32 %v3141_v34, %v228_v61  ;;  %v3255_v57 = vld [vmem:[%s3730_s3 + $0xa0] sm:$0xff]   ;;  %v3282_v60 = vld [vmem:[%s3730_s3 + $0x88] sm:$0xff]  }
  0xfc   :  { %v2362_v2 = vpop.f32.mrf.mxu0  ;;  %v3155_v3 = vld [vmem:[#allocation2 + $0x8] sm:$0xff]   ;;  %v3291_v61 = vld [vmem:[%s3730_s3 + $0x80] sm:$0xff]  }
  0xfd   :  { %2128 = vst [vmem:[#allocation2 + $0x10] sm:$0xff] %v2095_v62   ;;  %2401 = vmatmul.mubr.bf16.vlgmr.msra.gmra.mxu1 %v3155_v3  ;;  %v281_v5 = vmax.f32 %v229_v63, 0.0 }
  0xfe   :  { %v231_v4 = vpop.f32.mrf.mxu0  ;;  %2405 = vmatpush3.bf16.msra.mxu1 %v3153_v1  ;;  %2420 = vmatprep.mubr.msk.bf16.mxu1 %vm2902_vm0, %v2901_v0 }
  0xff   :  { %v232_v7 = vadd.f32 %v3141_v34, %v231_v4  ;;  %2406 = vmatprep.subr.bf16.mxu1 %v2901_v0 }
 0x100   :  { %v2363_v9 = vpop.f32.mrf.mxu0 }
 0x101   :  { %v282_v10 = vmax.f32 %v232_v7, 0.0 }
 0x102   :  { %v236_v11 = vpop.f32.mrf.mxu0  ;;  %2407 = vmatpush3.bf16.msra.mxu1 %v3163_v8 }
 0x103   :  { %v2100_v12 = vpack.c.bf16 %v282_v10, %v281_v5  ;;  %v237_v13 = vadd.f32 %v3141_v34, %v236_v11  ;;  %2408 = vmatprep.subr.bf16.mxu1 %v2901_v0 }
 0x104   :  { %v2366_v15 = vpop.f32.mrf.mxu0 }
 0x105   :  { %2129 = vst [vmem:[#allocation2 + $0x18] sm:$0xff] %v2100_v12   ;;  %v283_v28 = vmax.f32 %v237_v13, 0.0 }
 0x106   :  { %v239_v25 = vpop.f32.mrf.mxu0  ;;  %2409 = vmatpush3.bf16.msra.mxu1 %v3173_v14 }
 0x107   :  { %v240_v31 = vadd.f32 %v3141_v34, %v239_v25  ;;  %2410 = vmatprep.subr.bf16.mxu1 %v2901_v0 }
 0x108   :  { %v2367_v36 = vpop.f32.mrf.mxu0 }
 0x109   :  { %v284_v37 = vmax.f32 %v240_v31, 0.0  ;;  %v2841_v31 = vld [vmem:[%s3732_s5 + $0x38] sm:$0xff]  }
 0x10a   :  { %v244_v38 = vpop.f32.mrf.mxu0  ;;  %2411 = vmatpush3.bf16.msra.mxu1 %v3181_v35 }
 0x10b   :  { %v2105_v39 = vpack.c.bf16 %v284_v37, %v283_v28  ;;  %v245_v41 = vadd.f32 %v3141_v34, %v244_v38  ;;  %2412 = vmatprep.subr.bf16.mxu1 %v2901_v0  ;;  %v2842_v38 = vld [vmem:[%s3732_s5 + $0x30] sm:$0xff]  }
 0x10c   :  { %v2370_v42 = vpop.f32.mrf.mxu0  ;;  %v3300_v62 = vld [vmem:[#allocation2 + $0x18] sm:$0xff]  }
 0x10d   :  { %2130 = vst [vmem:[#allocation2 + $0x20] sm:$0xff] %v2105_v39   ;;  %v285_v45 = vmax.f32 %v245_v41, 0.0 }
 0x10e   :  { %v247_v43 = vpop.f32.mrf.mxu0  ;;  %2413 = vmatpush3.bf16.msra.mxu1 %v3188_v40 }
 0x10f   :  { %v248_v46 = vadd.f32 %v3141_v34, %v247_v43  ;;  %2414 = vmatprep.subr.bf16.mxu1 %v2901_v0 }
 0x110   :  { %v2371_v47 = vpop.f32.mrf.mxu0 }
 0x111   :  { %v286_v48 = vmax.f32 %v248_v46, 0.0  ;;  %v2845_v47 = vld [vmem:[%s3732_s5 + $0x18] sm:$0xff]  }
 0x112   :  { %2415 = vmatpush3.bf16.msra.mxu1 %v3196_v44  ;;  %v252_v63 = vpop.f32.mrf.mxu0 }
 0x113   :  { %v2110_v50 = vpack.c.bf16 %v286_v48, %v285_v45  ;;  %2416 = vmatprep.subr.bf16.mxu1 %v2901_v0  ;;  %v2843_v45 = vld [vmem:[%s3732_s5 + $0x28] sm:$0xff]   ;;  %v2846_v48 = vld [vmem:[%s3732_s5 + $0x10] sm:$0xff]  }
 0x114   :  { %v3207_v51 = vld [vmem:[#allocation2 + $0x20] sm:$0xff]   ;;  %v2374_v2 = vpop.f32.mrf.mxu0 }
 0x115   :  { %2131 = vst [vmem:[#allocation2 + $0x28] sm:$0xff] %v2110_v50   ;;  %2461 = vmatmul.mubr.bf16.vlgmr.msra.gmra.mxu0 %v3207_v51  ;;  %v2847_v50 = vld [vmem:[%s3732_s5 + $0x8] sm:$0xff]  }
 0x116   :  { %2417 = vmatpush3.bf16.msra.mxu1 %v3204_v49  ;;  %2485 = vmatpush3.bf16.msra.mxu0 %v3153_v1  ;;  %v2851_v2 = vld [vmem:[%s3732_s5 + $0x68] sm:$0xff]  }
 0x117   :  { %2418 = vmatprep.subr.bf16.mxu1 %v2901_v0  ;;  %2486 = vmatprep.subr.bf16.mxu0 %v2901_v0 }
 0x118   :  { %2500 = vmatprep.mubr.msk.bf16.mxu0 %vm2902_vm0, %v2901_v0 }
 0x11a   :  { %2419 = vmatpush3.bf16.msra.mxu1 %v3215_v52  ;;  %2487 = vmatpush3.bf16.msra.mxu0 %v3163_v8 }
 0x11b   :  { %2424 = vmatprep.subr.bf16.mxu1 %v2901_v0  ;;  %2488 = vmatprep.subr.bf16.mxu0 %v2901_v0 }
 0x11d   :  { %2421 = vmatmul.mubr.bf16.vlgmr.msra.gmra.mxu1 %v2829_v54  ;;  %v2848_v54 = vld [vmem:[%s3732_s5] sm:$0xff]  }
 0x11e   :  { %2425 = vmatpush3.bf16.msra.mxu1 %v3226_v53  ;;  %2489 = vmatpush3.bf16.msra.mxu0 %v3173_v14 }
 0x11f   :  { %2426 = vmatprep.subr.bf16.mxu1 %v2901_v0  ;;  %2490 = vmatprep.subr.bf16.mxu0 %v2901_v0 }
 0x120   :  { %2440 = vmatprep.mubr.msk.bf16.mxu1 %vm2902_vm0, %v2901_v0 }
 0x122   :  { %2427 = vmatpush3.bf16.msra.mxu1 %v3235_v55  ;;  %2491 = vmatpush3.bf16.msra.mxu0 %v3181_v35 }
 0x123   :  { %2428 = vmatprep.subr.bf16.mxu1 %v2901_v0  ;;  %2492 = vmatprep.subr.bf16.mxu0 %v2901_v0 }
 0x126   :  { %2429 = vmatpush3.bf16.msra.mxu1 %v3246_v56  ;;  %2493 = vmatpush3.bf16.msra.mxu0 %v3188_v40 }
 0x127   :  { %2430 = vmatprep.subr.bf16.mxu1 %v2901_v0  ;;  %2494 = vmatprep.subr.bf16.mxu0 %v2901_v0 }
 0x12a   :  { %2431 = vmatpush3.bf16.msra.mxu1 %v3255_v57  ;;  %2495 = vmatpush3.bf16.msra.mxu0 %v3196_v44 }
 0x12b   :  { %2432 = vmatprep.subr.bf16.mxu1 %v2901_v0  ;;  %2496 = vmatprep.subr.bf16.mxu0 %v2901_v0 }
 0x12e   :  { %2433 = vmatpush3.bf16.msra.mxu1 %v3264_v58  ;;  %2497 = vmatpush3.bf16.msra.mxu0 %v3204_v49 }
 0x12f   :  { %2434 = vmatprep.subr.bf16.mxu1 %v2901_v0  ;;  %2498 = vmatprep.subr.bf16.mxu0 %v2901_v0 }
 0x132   :  { %2435 = vmatpush3.bf16.msra.mxu1 %v3273_v59  ;;  %2499 = vmatpush3.bf16.msra.mxu0 %v3215_v52 }
 0x133   :  { %2436 = vmatprep.subr.bf16.mxu1 %v2901_v0  ;;  %2524 = vmatprep.subr.bf16.mxu0 %v2901_v0 }
 0x135   :  { %2501 = vmatmul.mubr.bf16.vlgmr.msra.gmra.mxu0 %v3155_v3  ;;  %v255_v3 = vpop.f32.mrf.mxu0 }
 0x136   :  { %2437 = vmatpush3.bf16.msra.mxu1 %v3282_v60  ;;  %2525 = vmatpush3.bf16.msra.mxu0 %v3061_v22  ;;  %v256_v4 = vadd.f32 %v3141_v34, %v255_v3  ;;  %v2852_v3 = vld [vmem:[%s3732_s5 + $0x60] sm:$0xff]  }
 0x137   :  { %2438 = vmatprep.subr.bf16.mxu1 %v2901_v0  ;;  %2526 = vmatprep.subr.bf16.mxu0 %v2901_v0  ;;  %v2375_v5 = vpop.f32.mrf.mxu0 }
 0x138   :  { %2540 = vmatprep.mubr.msk.bf16.mxu0 %vm2902_vm0, %v2901_v0  ;;  %v288_v7 = vmax.f32 %v256_v4, 0.0 }
 0x139   :  { %v260_v9 = vpop.f32.mrf.mxu0 }
 0x13a   :  { %2439 = vmatpush3.bf16.msra.mxu1 %v3291_v61  ;;  %2527 = vmatpush3.bf16.msra.mxu0 %v3075_v24 }
 0x13b   :  { %2464 = vmatprep.subr.bf16.mxu1 %v2901_v0  ;;  %2528 = vmatprep.subr.bf16.mxu0 %v2901_v0  ;;  %v2378_v10 = vpop.f32.mrf.mxu0 }
 0x13c   :  { %v2855_v10 = vld [vmem:[%s3732_s5 + $0x48] sm:$0xff]  }
 0x13d   :  { %2441 = vmatmul.mubr.bf16.vlgmr.msra.gmra.mxu1 %v3300_v62 }
 0x13e   :  { %2465 = vmatpush3.bf16.msra.mxu1 %v2970_v6  ;;  %2480 = vmatprep.mubr.msk.bf16.mxu1 %vm2902_vm0, %v2901_v0  ;;  %v253_v6 = vadd.f32 %v3141_v34, %v252_v63  ;;  %v2849_v63 = vld [vmem:[%s3732_s5 + $0x78] sm:$0xff]  }
 0x13f   :  { %2466 = vmatprep.subr.bf16.mxu1 %v2901_v0  ;;  %2529 = vmatpush3.bf16.msra.mxu0 %v3087_v26 }
 0x140   :  { %2530 = vmatprep.subr.bf16.mxu0 %v2901_v0 }
 0x142   :  { %2467 = vmatpush3.bf16.msra.mxu1 %v3021_v16  ;;  %v287_v16 = vmax.f32 %v253_v6, 0.0  ;;  %v2850_v6 = vld [vmem:[%s3732_s5 + $0x70] sm:$0xff]  }
 0x143   :  { %2468 = vmatprep.subr.bf16.mxu1 %v2901_v0  ;;  %2531 = vmatpush3.bf16.msra.mxu0 %v3096_v27 }
 0x144   :  { %2532 = vmatprep.subr.bf16.mxu0 %v2901_v0 }
 0x146   :  { %2469 = vmatpush3.bf16.msra.mxu1 %v3028_v17  ;;  %v2115_v17 = vpack.c.bf16 %v288_v7, %v287_v16  ;;  %v2853_v16 = vld [vmem:[%s3732_s5 + $0x58] sm:$0xff]   ;;  %v2854_v7 = vld [vmem:[%s3732_s5 + $0x50] sm:$0xff]  }
 0x147   :  { %2470 = vmatprep.subr.bf16.mxu1 %v2901_v0  ;;  %2533 = vmatpush3.bf16.msra.mxu0 %v3106_v29 }
 0x148   :  { %2534 = vmatprep.subr.bf16.mxu0 %v2901_v0  ;;  %2132 = vst [vmem:[#allocation2 + $0x30] sm:$0xff] %v2115_v17  }
 0x14a   :  { %2471 = vmatpush3.bf16.msra.mxu1 %v3035_v18  ;;  %v3330_v18 = vld [vmem:[#allocation2 + $0x28] sm:$0xff]  }
 0x14b   :  { %2472 = vmatprep.subr.bf16.mxu1 %v2901_v0  ;;  %2535 = vmatpush3.bf16.msra.mxu0 %v3115_v30 }
 0x14c   :  { %2536 = vmatprep.subr.bf16.mxu0 %v2901_v0 }
 0x14e   :  { %2473 = vmatpush3.bf16.msra.mxu1 %v3042_v19  ;;  %v2839_v19 = vld [vmem:[#allocation2 + $0x10] sm:$0xff]  }
 0x14f   :  { %2474 = vmatprep.subr.bf16.mxu1 %v2901_v0  ;;  %2537 = vmatpush3.bf16.msra.mxu0 %v3125_v32 }
 0x150   :  { %2538 = vmatprep.subr.bf16.mxu0 %v2901_v0 }
 0x152   :  { %2475 = vmatpush3.bf16.msra.mxu1 %v3049_v20  ;;  %v261_v20 = vadd.f32 %v3141_v34, %v260_v9 }
 0x153   :  { %2476 = vmatprep.subr.bf16.mxu1 %v2901_v0  ;;  %2539 = vmatpush3.bf16.msra.mxu0 %v3134_v33 }
 0x154   :  { %2564 = vmatprep.subr.bf16.mxu0 %v2901_v0  ;;  %v289_v11 = vmax.f32 %v261_v20, 0.0 }
 0x156   :  { %2477 = vmatpush3.bf16.msra.mxu1 %v3056_v21  ;;  %2541 = vmatmul.mubr.bf16.vlgmr.msra.gmra.mxu0 %v3330_v18  ;;  %v263_v21 = vpop.f32.mrf.mxu0 }
 0x157   :  { %2478 = vmatprep.subr.bf16.mxu1 %v2901_v0  ;;  %2580 = vmatprep.mubr.msk.bf16.mxu0 %vm2902_vm0, %v2901_v0  ;;  %v264_v12 = vadd.f32 %v3141_v34, %v263_v21 }
 0x158   :  { %v2379_v13 = vpop.f32.mrf.mxu0  ;;  %2565 = vmatpush3.bf16.msra.mxu0 %v2841_v31 }
 0x159   :  { %2566 = vmatprep.subr.bf16.mxu0 %v2901_v0 }
 0x15a   :  { %2479 = vmatpush3.bf16.msra.mxu1 %v3070_v23  ;;  %v290_v23 = vmax.f32 %v264_v12, 0.0  ;;  %v268_v15 = vpop.f32.mrf.mxu0 }
 0x15b   :  { %2504 = vmatprep.subr.bf16.mxu1 %v2901_v0  ;;  %v269_v28 = vadd.f32 %v3141_v34, %v268_v15 }
 0x15c   :  { %v2120_v25 = vpack.c.bf16 %v290_v23, %v289_v11  ;;  %v2382_v36 = vpop.f32.mrf.mxu0  ;;  %2567 = vmatpush3.bf16.msra.mxu0 %v2842_v38 }
 0x15d   :  { %2481 = vmatmul.mubr.bf16.vlgmr.msra.gmra.mxu1 %v2839_v19  ;;  %v291_v37 = vmax.f32 %v269_v28, 0.0  ;;  %2568 = vmatprep.subr.bf16.mxu0 %v2901_v0  ;;  %v2856_v19 = vld [vmem:[%s3732_s5 + $0x40] sm:$0xff]  }
 0x15e   :  { %2505 = vmatpush3.bf16.msra.mxu1 %v3226_v53  ;;  %2520 = vmatprep.mubr.msk.bf16.mxu1 %vm2902_vm0, %v2901_v0  ;;  %2133 = vst [vmem:[#allocation2 + $0x38] sm:$0xff] %v2120_v25   ;;  %v271_v39 = vpop.f32.mrf.mxu0 }
 0x15f   :  { %2506 = vmatprep.subr.bf16.mxu1 %v2901_v0  ;;  %v272_v41 = vadd.f32 %v3141_v34, %v271_v39  ;;  %v2844_v34 = vld [vmem:[%s3732_s5 + $0x20] sm:$0xff]  }
 0x160   :  { %v2383_v42 = vpop.f32.mrf.mxu0  ;;  %2569 = vmatpush3.bf16.msra.mxu0 %v2843_v45 }
 0x161   :  { %v292_v43 = vmax.f32 %v272_v41, 0.0  ;;  %2570 = vmatprep.subr.bf16.mxu0 %v2901_v0 }
 0x162   :  { %2507 = vmatpush3.bf16.msra.mxu1 %v3235_v55 }
 0x163   :  { %2508 = vmatprep.subr.bf16.mxu1 %v2901_v0  ;;  %v2125_v46 = vpack.c.bf16 %v292_v43, %v291_v37 }
 0x164   :  { %2571 = vmatpush3.bf16.msra.mxu0 %v2844_v34 }
 0x165   :  { %2134 = vst [vmem:[#allocation2 + $0x40] sm:$0xff] %v2125_v46   ;;  %2572 = vmatprep.subr.bf16.mxu0 %v2901_v0  ;;  %v3434_v46 = vld [vmem:[%s3733_s4] ss:$0 sm:$0xff] }
 0x166   :  { %2509 = vmatpush3.bf16.msra.mxu1 %v3246_v56 }
 0x167   :  { %2510 = vmatprep.subr.bf16.mxu1 %v2901_v0 }
 0x168   :  { %2573 = vmatpush3.bf16.msra.mxu0 %v2845_v47 }
 0x169   :  { %2574 = vmatprep.subr.bf16.mxu0 %v2901_v0 }
 0x16a   :  { %2511 = vmatpush3.bf16.msra.mxu1 %v3255_v57 }
 0x16b   :  { %2512 = vmatprep.subr.bf16.mxu1 %v2901_v0 }
 0x16c   :  { %2575 = vmatpush3.bf16.msra.mxu0 %v2846_v48 }
 0x16d   :  { %2576 = vmatprep.subr.bf16.mxu0 %v2901_v0 }
 0x16e   :  { %2513 = vmatpush3.bf16.msra.mxu1 %v3264_v58 }
 0x16f   :  { %2514 = vmatprep.subr.bf16.mxu1 %v2901_v0 }
 0x170   :  { %2577 = vmatpush3.bf16.msra.mxu0 %v2847_v50 }
 0x171   :  { %2578 = vmatprep.subr.bf16.mxu0 %v2901_v0 }
 0x172   :  { %2515 = vmatpush3.bf16.msra.mxu1 %v3273_v59 }
 0x173   :  { %2516 = vmatprep.subr.bf16.mxu1 %v2901_v0 }
 0x174   :  { %2579 = vmatpush3.bf16.msra.mxu0 %v2848_v54 }
 0x175   :  { %2604 = vmatprep.subr.bf16.mxu0 %v2901_v0 }
 0x176   :  { %2517 = vmatpush3.bf16.msra.mxu1 %v3282_v60 }
 0x177   :  { %2518 = vmatprep.subr.bf16.mxu1 %v2901_v0 }
 0x17a   :  { %2519 = vmatpush3.bf16.msra.mxu1 %v3291_v61 }
 0x17b   :  { %2544 = vmatprep.subr.bf16.mxu1 %v2901_v0 }
 0x17d   :  { %2521 = vmatmul.mubr.bf16.vlgmr.msra.gmra.mxu1 %v3207_v51 }
 0x17e   :  { %2560 = vmatprep.mubr.msk.bf16.mxu1 %vm2902_vm0, %v2901_v0  ;;  %2545 = vmatpush3.bf16.msra.mxu1 %v2849_v63 }
 0x17f   :  { %2546 = vmatprep.subr.bf16.mxu1 %v2901_v0 }
 0x182   :  { %2547 = vmatpush3.bf16.msra.mxu1 %v2850_v6 }
 0x183   :  { %2548 = vmatprep.subr.bf16.mxu1 %v2901_v0 }
 0x186   :  { %2549 = vmatpush3.bf16.msra.mxu1 %v2851_v2 }
 0x187   :  { %2550 = vmatprep.subr.bf16.mxu1 %v2901_v0 }
 0x18a   :  { %2551 = vmatpush3.bf16.msra.mxu1 %v2852_v3 }
 0x18b   :  { %2552 = vmatprep.subr.bf16.mxu1 %v2901_v0 }
 0x18e   :  { %2553 = vmatpush3.bf16.msra.mxu1 %v2853_v16 }
 0x18f   :  { %2554 = vmatprep.subr.bf16.mxu1 %v2901_v0 }
 0x192   :  { %2555 = vmatpush3.bf16.msra.mxu1 %v2854_v7 }
 0x193   :  { %2556 = vmatprep.subr.bf16.mxu1 %v2901_v0 }
 0x196   :  { %2557 = vmatpush3.bf16.msra.mxu1 %v2855_v10 }
 0x197   :  { %2558 = vmatprep.subr.bf16.mxu1 %v2901_v0 }
 0x19a   :  { %2559 = vmatpush3.bf16.msra.mxu1 %v2856_v19 }
 0x19b   :  { %2584 = vmatprep.subr.bf16.mxu1 %v2901_v0 }
 0x1bd   :  { %v509_v4 = vpop.f32.mrf.mxu1 }
 0x1bf   :  { %v2402_v5 = vpop.f32.mrf.mxu1 }
 0x1c1   :  { %v512_v9 = vpop.f32.mrf.mxu1 }
 0x1c3   :  { %v2403_v17 = vpop.f32.mrf.mxu1 }
 0x1d5   :  { %v834_v20 = vpop.f32.mrf.mxu0 }
 0x1d7   :  { %v2462_v21 = vpop.f32.mrf.mxu0 }
 0x1d8   :  { %v2878_v21 = vld [vmem:[%s3730_s3 + $0x68] sm:$0xff]  }
 0x1d9   :  { %v837_v11 = vpop.f32.mrf.mxu0 }
 0x1db   :  { %v2463_v12 = vpop.f32.mrf.mxu0 }
 0x1dc   :  { %v2880_v12 = vld [vmem:[%s3730_s3 + $0x58] sm:$0xff]  }
 0x1dd   :  { %v604_v13 = vpop.f32.mrf.mxu1 }
 0x1de   :  { %v605_v38 = vadd.f32 %v604_v13, %v509_v4  ;;  %v2881_v13 = vld [vmem:[%s3730_s3 + $0x50] sm:$0xff]  }
 0x1df   :  { %v2422_v23 = vpop.f32.mrf.mxu1 }
 0x1e0   :  { %v2882_v23 = vld [vmem:[%s3730_s3 + $0x48] sm:$0xff]  }
 0x1e1   :  { %v607_v15 = vpop.f32.mrf.mxu1 }
 0x1e2   :  { %v608_v43 = vadd.f32 %v607_v15, %v512_v9  ;;  %v2883_v15 = vld [vmem:[%s3730_s3 + $0x40] sm:$0xff]  }
 0x1e3   :  { %v2423_v25 = vpop.f32.mrf.mxu1 }
 0x1e4   :  { %v2865_v25 = vld [vmem:[%s3732_s5 + $0x88] sm:$0xff]  }
 0x1f5   :  { %v953_v28 = vpop.f32.mrf.mxu0 }
 0x1f7   :  { %v2502_v31 = vpop.f32.mrf.mxu0 }
 0x1f8   :  { %v2866_v31 = vld [vmem:[%s3732_s5 + $0x80] sm:$0xff]  }
 0x1f9   :  { %v956_v36 = vpop.f32.mrf.mxu0 }
 0x1fb   :  { %v2503_v37 = vpop.f32.mrf.mxu0 }
 0x1fd   :  { %v718_v39 = vpop.f32.mrf.mxu1 }
 0x1fe   :  { %v725_v41 = vadd.f32 %v718_v39, %v605_v38 }
 0x1ff   :  { %v2442_v42 = vpop.f32.mrf.mxu1 }
 0x200   :  { %v841_v45 = vadd.f32 %v834_v20, %v725_v41 }
 0x201   :  { %v721_v34 = vpop.f32.mrf.mxu1 }
 0x202   :  { %v726_v47 = vadd.f32 %v721_v34, %v608_v43  ;;  %v849_v50 = vadd.f32 %v3434_v46, %v841_v45 }
 0x203   :  { %v2443_v48 = vpop.f32.mrf.mxu1 }
 0x204   :  { %v842_v54 = vadd.f32 %v837_v11, %v726_v47  ;;  %v851_v6 = vmax.f32 %v849_v50, 0.0  ;;  %v2879_v11 = vld [vmem:[%s3730_s3 + $0x60] sm:$0xff]  }
 0x206   :  { %v850_v63 = vadd.f32 %v3434_v46, %v842_v54 }
 0x208   :  { %v852_v2 = vmax.f32 %v850_v63, 0.0 }
 0x20a   :  { %v853_v3 = vpack.c.bf16 %v852_v2, %v851_v6 }
 0x20c   :  { %2581 = vmatmul.mubr.bf16.vlgmr.msra.gmra.mxu0 %v853_v3 }
 0x20d   :  { %2605 = vmatpush3.bf16.msra.mxu0 %v3153_v1  ;;  %2620 = vmatprep.mubr.msk.bf16.mxu0 %vm2902_vm0, %v2901_v0 }
 0x20e   :  { %2606 = vmatprep.subr.bf16.mxu0 %v2901_v0 }
 0x211   :  { %2607 = vmatpush3.bf16.msra.mxu0 %v3163_v8 }
 0x212   :  { %2608 = vmatprep.subr.bf16.mxu0 %v2901_v0 }
 0x215   :  { %2609 = vmatpush3.bf16.msra.mxu0 %v3173_v14 }
 0x216   :  { %2610 = vmatprep.subr.bf16.mxu0 %v2901_v0  ;;  %v1045_v16 = vpop.f32.mrf.mxu0 }
 0x218   :  { %v2542_v4 = vpop.f32.mrf.mxu0 }
 0x219   :  { %2611 = vmatpush3.bf16.msra.mxu0 %v3181_v35 }
 0x21a   :  { %2612 = vmatprep.subr.bf16.mxu0 %v2901_v0  ;;  %v1048_v1 = vpop.f32.mrf.mxu0 }
 0x21c   :  { %v2543_v5 = vpop.f32.mrf.mxu0 }
 0x21d   :  { %2613 = vmatpush3.bf16.msra.mxu0 %v3188_v40  ;;  %v912_v7 = vpop.f32.mrf.mxu1 }
 0x21e   :  { %2614 = vmatprep.subr.bf16.mxu0 %v2901_v0  ;;  %v954_v35 = vadd.f32 %v953_v28, %v912_v7 }
 0x21f   :  { %v2482_v8 = vpop.f32.mrf.mxu1 }
 0x221   :  { %2615 = vmatpush3.bf16.msra.mxu0 %v3196_v44  ;;  %v915_v9 = vpop.f32.mrf.mxu1 }
 0x222   :  { %2616 = vmatprep.subr.bf16.mxu0 %v2901_v0 }
 0x223   :  { %v2483_v14 = vpop.f32.mrf.mxu1 }
 0x225   :  { %2617 = vmatpush3.bf16.msra.mxu0 %v3204_v49  ;;  %v957_v49 = vadd.f32 %v956_v36, %v915_v9 }
 0x226   :  { %2618 = vmatprep.subr.bf16.mxu0 %v2901_v0 }
 0x229   :  { %2619 = vmatpush3.bf16.msra.mxu0 %v3215_v52 }
 0x22a   :  { %2644 = vmatprep.subr.bf16.mxu0 %v2901_v0 }
 0x22c   :  { %2621 = vmatmul.mubr.bf16.vlgmr.msra.gmra.mxu0 %v3300_v62 }
 0x22d   :  { %2645 = vmatpush3.bf16.msra.mxu0 %v3061_v22  ;;  %2660 = vmatprep.mubr.msk.bf16.mxu0 %vm2902_vm0, %v2901_v0 }
 0x22e   :  { %2646 = vmatprep.subr.bf16.mxu0 %v2901_v0 }
 0x231   :  { %2647 = vmatpush3.bf16.msra.mxu0 %v3075_v24 }
 0x232   :  { %2648 = vmatprep.subr.bf16.mxu0 %v2901_v0 }
 0x235   :  { %2649 = vmatpush3.bf16.msra.mxu0 %v3087_v26 }
 0x236   :  { %2650 = vmatprep.subr.bf16.mxu0 %v2901_v0 }
 0x239   :  { %2651 = vmatpush3.bf16.msra.mxu0 %v3096_v27 }
 0x23a   :  { %2652 = vmatprep.subr.bf16.mxu0 %v2901_v0 }
 0x23d   :  { %2653 = vmatpush3.bf16.msra.mxu0 %v3106_v29  ;;  %v994_v22 = vpop.f32.mrf.mxu1 }
 0x23e   :  { %v1001_v40 = vadd.f32 %v994_v22, %v954_v35  ;;  %2654 = vmatprep.subr.bf16.mxu0 %v2901_v0 }
 0x23f   :  { %v2522_v44 = vpop.f32.mrf.mxu1 }
 0x240   :  { %v1052_v24 = vadd.f32 %v1045_v16, %v1001_v40 }
 0x241   :  { %2655 = vmatpush3.bf16.msra.mxu0 %v3115_v30  ;;  %v997_v52 = vpop.f32.mrf.mxu1  ;;  %v3476_v30 = vld [vmem:[#allocation2 + $0x38] sm:$0xff]  }
 0x242   :  { %v1002_v26 = vadd.f32 %v997_v52, %v957_v49  ;;  %2656 = vmatprep.subr.bf16.mxu0 %v2901_v0  ;;  %v1054_v27 = vadd.f32 %v3434_v46, %v1052_v24 }
 0x243   :  { %v2523_v62 = vpop.f32.mrf.mxu1 }
 0x244   :  { %v1053_v17 = vadd.f32 %v1048_v1, %v1002_v26  ;;  %v1056_v10 = vmax.f32 %v1054_v27, 0.0 }
 0x245   :  { %2657 = vmatpush3.bf16.msra.mxu0 %v3125_v32  ;;  %v2876_v32 = vld [vmem:[%s3730_s3 + $0x78] sm:$0xff]  }
 0x246   :  { %v1055_v29 = vadd.f32 %v3434_v46, %v1053_v17  ;;  %2658 = vmatprep.subr.bf16.mxu0 %v2901_v0 }
 0x248   :  { %v1057_v19 = vmax.f32 %v1055_v29, 0.0 }
 0x249   :  { %2659 = vmatpush3.bf16.msra.mxu0 %v3134_v33  ;;  %v2877_v33 = vld [vmem:[%s3730_s3 + $0x70] sm:$0xff]  }
 0x24a   :  { %v1058_v20 = vpack.c.bf16 %v1057_v19, %v1056_v10  ;;  %2684 = vmatprep.subr.bf16.mxu0 %v2901_v0 }
 0x24c   :  { %2661 = vmatmul.mubr.bf16.vlgmr.msra.gmra.mxu0 %v3476_v30  ;;  %2561 = vmatmul.mubr.bf16.vlgmr.msra.gmra.mxu1 %v1058_v20 }
 0x24d   :  { %2585 = vmatpush3.bf16.msra.mxu1 %v2876_v32  ;;  %2685 = vmatpush3.bf16.msra.mxu0 %v2876_v32  ;;  %v2884_v32 = vld [vmem:[%s3730_s3 + $0x38] sm:$0xff]  }
 0x24e   :  { %2586 = vmatprep.subr.bf16.mxu1 %v2901_v0  ;;  %2686 = vmatprep.subr.bf16.mxu0 %v2901_v0 }
 0x24f   :  { %2600 = vmatprep.mubr.msk.bf16.mxu1 %vm2902_vm0, %v2901_v0  ;;  %2700 = vmatprep.mubr.msk.bf16.mxu0 %vm2902_vm0, %v2901_v0 }
 0x251   :  { %2587 = vmatpush3.bf16.msra.mxu1 %v2877_v33  ;;  %2687 = vmatpush3.bf16.msra.mxu0 %v2877_v33  ;;  %v2885_v33 = vld [vmem:[%s3730_s3 + $0x30] sm:$0xff]  }
 0x252   :  { %2588 = vmatprep.subr.bf16.mxu1 %v2901_v0  ;;  %2688 = vmatprep.subr.bf16.mxu0 %v2901_v0 }
 0x255   :  { %2589 = vmatpush3.bf16.msra.mxu1 %v2878_v21  ;;  %2689 = vmatpush3.bf16.msra.mxu0 %v2878_v21  ;;  %v2886_v21 = vld [vmem:[%s3730_s3 + $0x28] sm:$0xff]  }
 0x256   :  { %2590 = vmatprep.subr.bf16.mxu1 %v2901_v0  ;;  %2690 = vmatprep.subr.bf16.mxu0 %v2901_v0 }
 0x259   :  { %2591 = vmatpush3.bf16.msra.mxu1 %v2879_v11  ;;  %2691 = vmatpush3.bf16.msra.mxu0 %v2879_v11  ;;  %v2887_v11 = vld [vmem:[%s3730_s3 + $0x20] sm:$0xff]  }
 0x25a   :  { %2592 = vmatprep.subr.bf16.mxu1 %v2901_v0  ;;  %2692 = vmatprep.subr.bf16.mxu0 %v2901_v0 }
 0x25d   :  { %2593 = vmatpush3.bf16.msra.mxu1 %v2880_v12  ;;  %2693 = vmatpush3.bf16.msra.mxu0 %v2880_v12  ;;  %v2888_v12 = vld [vmem:[%s3730_s3 + $0x18] sm:$0xff]  }
 0x25e   :  { %2594 = vmatprep.subr.bf16.mxu1 %v2901_v0  ;;  %2694 = vmatprep.subr.bf16.mxu0 %v2901_v0 }
 0x261   :  { %2595 = vmatpush3.bf16.msra.mxu1 %v2881_v13  ;;  %2695 = vmatpush3.bf16.msra.mxu0 %v2881_v13  ;;  %v2889_v13 = vld [vmem:[%s3730_s3 + $0x10] sm:$0xff]  }
 0x262   :  { %2596 = vmatprep.subr.bf16.mxu1 %v2901_v0  ;;  %2696 = vmatprep.subr.bf16.mxu0 %v2901_v0 }
 0x265   :  { %2597 = vmatpush3.bf16.msra.mxu1 %v2882_v23  ;;  %2697 = vmatpush3.bf16.msra.mxu0 %v2882_v23  ;;  %v2890_v23 = vld [vmem:[%s3730_s3 + $0x8] sm:$0xff]  }
 0x266   :  { %2598 = vmatprep.subr.bf16.mxu1 %v2901_v0  ;;  %2698 = vmatprep.subr.bf16.mxu0 %v2901_v0 }
 0x269   :  { %2599 = vmatpush3.bf16.msra.mxu1 %v2883_v15  ;;  %2699 = vmatpush3.bf16.msra.mxu0 %v2883_v15  ;;  %v2891_v15 = vld [vmem:[%s3730_s3] sm:$0xff]  }
 0x26a   :  { %2624 = vmatprep.subr.bf16.mxu1 %v2901_v0  ;;  %2724 = vmatprep.subr.bf16.mxu0 %v2901_v0 }
 0x26c   :  { %2601 = vmatmul.mubr.bf16.vlgmr.msra.gmra.mxu1 %v3207_v51  ;;  %2701 = vmatmul.mubr.bf16.vlgmr.msra.gmra.mxu0 %v3330_v18  ;;  %v2858_v51 = vld [vmem:[#allocation2 + $0x30] sm:$0xff]  }
 0x26d   :  { %2625 = vmatpush3.bf16.msra.mxu1 %v3226_v53  ;;  %2725 = vmatpush3.bf16.msra.mxu0 %v3226_v53  ;;  %v2859_v53 = vld [vmem:[%s3732_s5 + $0xb8] sm:$0xff]  }
 0x26e   :  { %2626 = vmatprep.subr.bf16.mxu1 %v2901_v0  ;;  %2726 = vmatprep.subr.bf16.mxu0 %v2901_v0 }
 0x26f   :  { %2640 = vmatprep.mubr.msk.bf16.mxu1 %vm2902_vm0, %v2901_v0  ;;  %2740 = vmatprep.mubr.msk.bf16.mxu0 %vm2902_vm0, %v2901_v0 }
 0x271   :  { %2627 = vmatpush3.bf16.msra.mxu1 %v3235_v55  ;;  %2727 = vmatpush3.bf16.msra.mxu0 %v3235_v55  ;;  %v2860_v55 = vld [vmem:[%s3732_s5 + $0xb0] sm:$0xff]  }
 0x272   :  { %2628 = vmatprep.subr.bf16.mxu1 %v2901_v0  ;;  %2728 = vmatprep.subr.bf16.mxu0 %v2901_v0 }
 0x275   :  { %2629 = vmatpush3.bf16.msra.mxu1 %v3246_v56  ;;  %2729 = vmatpush3.bf16.msra.mxu0 %v3246_v56  ;;  %v2861_v56 = vld [vmem:[%s3732_s5 + $0xa8] sm:$0xff]  }
 0x276   :  { %2630 = vmatprep.subr.bf16.mxu1 %v2901_v0  ;;  %2730 = vmatprep.subr.bf16.mxu0 %v2901_v0 }
 0x279   :  { %2631 = vmatpush3.bf16.msra.mxu1 %v3255_v57  ;;  %2731 = vmatpush3.bf16.msra.mxu0 %v3255_v57  ;;  %v2862_v57 = vld [vmem:[%s3732_s5 + $0xa0] sm:$0xff]  }
 0x27a   :  { %2632 = vmatprep.subr.bf16.mxu1 %v2901_v0  ;;  %2732 = vmatprep.subr.bf16.mxu0 %v2901_v0 }
 0x27d   :  { %2633 = vmatpush3.bf16.msra.mxu1 %v3264_v58  ;;  %2733 = vmatpush3.bf16.msra.mxu0 %v3264_v58  ;;  %v2863_v58 = vld [vmem:[%s3732_s5 + $0x98] sm:$0xff]  }
 0x27e   :  { %2634 = vmatprep.subr.bf16.mxu1 %v2901_v0  ;;  %2734 = vmatprep.subr.bf16.mxu0 %v2901_v0 }
 0x281   :  { %2635 = vmatpush3.bf16.msra.mxu1 %v3273_v59  ;;  %2735 = vmatpush3.bf16.msra.mxu0 %v3273_v59 }
 0x282   :  { %2636 = vmatprep.subr.bf16.mxu1 %v2901_v0  ;;  %2736 = vmatprep.subr.bf16.mxu0 %v2901_v0 }
 0x285   :  { %2637 = vmatpush3.bf16.msra.mxu1 %v3282_v60  ;;  %2737 = vmatpush3.bf16.msra.mxu0 %v3282_v60  ;;  %v2864_v60 = vld [vmem:[%s3732_s5 + $0x90] sm:$0xff]  }
 0x286   :  { %2638 = vmatprep.subr.bf16.mxu1 %v2901_v0  ;;  %2738 = vmatprep.subr.bf16.mxu0 %v2901_v0 }
 0x289   :  { %2639 = vmatpush3.bf16.msra.mxu1 %v3291_v61  ;;  %2739 = vmatpush3.bf16.msra.mxu0 %v3291_v61 }
 0x28a   :  { %2664 = vmatprep.subr.bf16.mxu1 %v2901_v0  ;;  %2764 = vmatprep.subr.bf16.mxu0 %v2901_v0 }
 0x28c   :  { %2641 = vmatmul.mubr.bf16.vlgmr.msra.gmra.mxu1 %v2858_v51  ;;  %2741 = vmatmul.mubr.bf16.vlgmr.msra.gmra.mxu0 %v3476_v30  ;;  %v2892_v51 = vld [vmem:[#allocation2 + $0x20] sm:$0xff]  }
 0x28d   :  { %2680 = vmatprep.mubr.msk.bf16.mxu1 %vm2902_vm0, %v2901_v0  ;;  %2780 = vmatprep.mubr.msk.bf16.mxu0 %vm2902_vm0, %v2901_v0 }
 0x28e   :  { %2665 = vmatpush3.bf16.msra.mxu1 %v2859_v53  ;;  %v2893_v53 = vld [vmem:[%s3730_s3 + $0xf8] sm:$0xff]  }
 0x28f   :  { %2666 = vmatprep.subr.bf16.mxu1 %v2901_v0 }
 0x292   :  { %2667 = vmatpush3.bf16.msra.mxu1 %v2860_v55  ;;  %v2894_v55 = vld [vmem:[%s3730_s3 + $0xf0] sm:$0xff]  }
 0x293   :  { %2668 = vmatprep.subr.bf16.mxu1 %v2901_v0 }
 0x296   :  { %2669 = vmatpush3.bf16.msra.mxu1 %v2861_v56  ;;  %v2895_v56 = vld [vmem:[%s3730_s3 + $0xe8] sm:$0xff]  }
 0x297   :  { %2670 = vmatprep.subr.bf16.mxu1 %v2901_v0 }
 0x29a   :  { %2671 = vmatpush3.bf16.msra.mxu1 %v2862_v57  ;;  %v2896_v57 = vld [vmem:[%s3730_s3 + $0xe0] sm:$0xff]  }
 0x29b   :  { %2672 = vmatprep.subr.bf16.mxu1 %v2901_v0 }
 0x29e   :  { %2673 = vmatpush3.bf16.msra.mxu1 %v2863_v58  ;;  %v2897_v58 = vld [vmem:[%s3730_s3 + $0xd8] sm:$0xff]  }
 0x29f   :  { %2674 = vmatprep.subr.bf16.mxu1 %v2901_v0 }
 0x2a2   :  { %2675 = vmatpush3.bf16.msra.mxu1 %v2864_v60  ;;  %v2899_v60 = vld [vmem:[%s3730_s3 + $0xc8] sm:$0xff]  }
 0x2a3   :  { %2676 = vmatprep.subr.bf16.mxu1 %v2901_v0 }
 0x2a6   :  { %2677 = vmatpush3.bf16.msra.mxu1 %v2865_v25  ;;  %v2868_v25 = vld [vmem:[%s3732_s5 + $0xf8] sm:$0xff]  }
 0x2a7   :  { %2678 = vmatprep.subr.bf16.mxu1 %v2901_v0  ;;  %2765 = vmatpush3.bf16.msra.mxu0 %v2868_v25 }
 0x2a8   :  { %2766 = vmatprep.subr.bf16.mxu0 %v2901_v0 }
 0x2aa   :  { %2679 = vmatpush3.bf16.msra.mxu1 %v2866_v31  ;;  %v2870_v31 = vld [vmem:[%s3732_s5 + $0xe8] sm:$0xff]  }
 0x2ab   :  { %2704 = vmatprep.subr.bf16.mxu1 %v2901_v0 }
 0x2cc   :  { %v1247_v59 = vpop.f32.mrf.mxu0 }
 0x2ce   :  { %v2582_v61 = vpop.f32.mrf.mxu0 }
 0x2cf   :  { %v2900_v61 = vld [vmem:[%s3730_s3 + $0xc0] sm:$0xff]  }
 0x2d0   :  { %v1250_v18 = vpop.f32.mrf.mxu0 }
 0x2d2   :  { %v2583_v28 = vpop.f32.mrf.mxu0 }
 0x2d3   :  { %v2869_v28 = vld [vmem:[%s3732_s5 + $0xf0] sm:$0xff]  }
 0x2d4   :  { %2767 = vmatpush3.bf16.msra.mxu0 %v2869_v28 }
 0x2d5   :  { %2768 = vmatprep.subr.bf16.mxu0 %v2901_v0 }
 0x2d8   :  { %2769 = vmatpush3.bf16.msra.mxu0 %v2870_v31 }
 0x2d9   :  { %2770 = vmatprep.subr.bf16.mxu0 %v2901_v0 }
 0x2ec   :  { %v1329_v36 = vpop.f32.mrf.mxu0 }
 0x2ee   :  { %v2622_v37 = vpop.f32.mrf.mxu0 }
 0x2ef   :  { %v2872_v37 = vld [vmem:[%s3732_s5 + $0xd8] sm:$0xff]  }
 0x2f0   :  { %v1332_v38 = vpop.f32.mrf.mxu0 }
 0x2f2   :  { %v2623_v39 = vpop.f32.mrf.mxu0 }
 0x2f3   :  { %v2874_v39 = vld [vmem:[%s3732_s5 + $0xc8] sm:$0xff]  }
 0x30c   :  { %v1429_v41 = vpop.f32.mrf.mxu0  ;;  %v1158_v42 = vpop.f32.mrf.mxu1 }
 0x30d   :  { %v3599_v43 = vadd.f32 %v1247_v59, %v1158_v42  ;;  %v2898_v59 = vld [vmem:[%s3730_s3 + $0xd0] sm:$0xff]  }
 0x30e   :  { %v2662_v45 = vpop.f32.mrf.mxu0  ;;  %v2562_v34 = vpop.f32.mrf.mxu1 }
 0x310   :  { %v1432_v47 = vpop.f32.mrf.mxu0  ;;  %v1161_v48 = vpop.f32.mrf.mxu1 }
 0x311   :  { %v3601_v50 = vadd.f32 %v1250_v18, %v1161_v48  ;;  %v2867_v18 = vld [vmem:[#allocation2 + $0x40] sm:$0xff]  }
 0x312   :  { %v2663_v54 = vpop.f32.mrf.mxu0  ;;  %v2563_v63 = vpop.f32.mrf.mxu1 }
 0x32c   :  { %v1288_v6 = vpop.f32.mrf.mxu1  ;;  %v3603_v2 = vpop.f32.mrf.mxu0 }
 0x32d   :  { %v1330_v8 = vadd.f32 %v1329_v36, %v1288_v6  ;;  %v2871_v36 = vld [vmem:[%s3732_s5 + $0xe0] sm:$0xff]  }
 0x32e   :  { %v2602_v3 = vpop.f32.mrf.mxu1  ;;  %v2702_v16 = vpop.f32.mrf.mxu0  ;;  %2771 = vmatpush3.bf16.msra.mxu0 %v2871_v36 }
 0x32f   :  { %2772 = vmatprep.subr.bf16.mxu0 %v2901_v0 }
 0x330   :  { %v1291_v4 = vpop.f32.mrf.mxu1  ;;  %v3605_v1 = vpop.f32.mrf.mxu0 }
 0x331   :  { %v1333_v44 = vadd.f32 %v1332_v38, %v1291_v4  ;;  %v2873_v38 = vld [vmem:[%s3732_s5 + $0xd0] sm:$0xff]  }
 0x332   :  { %v2603_v5 = vpop.f32.mrf.mxu1  ;;  %v2703_v7 = vpop.f32.mrf.mxu0  ;;  %2773 = vmatpush3.bf16.msra.mxu0 %v2872_v37 }
 0x333   :  { %2774 = vmatprep.subr.bf16.mxu0 %v2901_v0 }
 0x336   :  { %2775 = vmatpush3.bf16.msra.mxu0 %v2873_v38 }
 0x337   :  { %2776 = vmatprep.subr.bf16.mxu0 %v2901_v0 }
 0x33a   :  { %2777 = vmatpush3.bf16.msra.mxu0 %v2874_v39 }
 0x33b   :  { %2778 = vmatprep.subr.bf16.mxu0 %v2901_v0 }
 0x34c   :  { %v1378_v9 = vpop.f32.mrf.mxu1  ;;  %v3607_v14 = vpop.f32.mrf.mxu0 }
 0x34d   :  { %v1385_v35 = vadd.f32 %v1378_v9, %v1330_v8 }
 0x34e   :  { %v2642_v22 = vpop.f32.mrf.mxu1  ;;  %v2742_v40 = vpop.f32.mrf.mxu0 }
 0x34f   :  { %v1436_v49 = vadd.f32 %v1429_v41, %v1385_v35  ;;  %v2875_v41 = vld [vmem:[%s3732_s5 + $0xc0] sm:$0xff]  }
 0x350   :  { %v1381_v24 = vpop.f32.mrf.mxu1  ;;  %v3609_v52 = vpop.f32.mrf.mxu0  ;;  %2779 = vmatpush3.bf16.msra.mxu0 %v2875_v41 }
 0x351   :  { %v1386_v26 = vadd.f32 %v1381_v24, %v1333_v44  ;;  %v1438_v17 = vadd.f32 %v3434_v46, %v1436_v49 }
 0x352   :  { %v2643_v62 = vpop.f32.mrf.mxu1  ;;  %v2743_v27 = vpop.f32.mrf.mxu0 }
 0x353   :  { %v1437_v29 = vadd.f32 %v1432_v47, %v1386_v26  ;;  %v1440_v19 = vmax.f32 %v1438_v17, 0.0 }
 0x355   :  { %v1439_v10 = vadd.f32 %v3434_v46, %v1437_v29 }
 0x357   :  { %v1441_v20 = vmax.f32 %v1439_v10, 0.0 }
 0x359   :  { %v1442_v30 = vpack.c.bf16 %v1441_v20, %v1440_v19 }
 0x35b   :  { %2681 = vmatmul.mubr.bf16.vlgmr.msra.gmra.mxu1 %v1442_v30 }
 0x35c   :  { %2705 = vmatpush3.bf16.msra.mxu1 %v2884_v32  ;;  %2720 = vmatprep.mubr.msk.bf16.mxu1 %vm2902_vm0, %v2901_v0 }
 0x35d   :  { %2706 = vmatprep.subr.bf16.mxu1 %v2901_v0 }
 0x360   :  { %2707 = vmatpush3.bf16.msra.mxu1 %v2885_v33 }
 0x361   :  { %2708 = vmatprep.subr.bf16.mxu1 %v2901_v0 }
 0x364   :  { %2709 = vmatpush3.bf16.msra.mxu1 %v2886_v21 }
 0x365   :  { %2710 = vmatprep.subr.bf16.mxu1 %v2901_v0 }
 0x368   :  { %2711 = vmatpush3.bf16.msra.mxu1 %v2887_v11 }
 0x369   :  { %2712 = vmatprep.subr.bf16.mxu1 %v2901_v0 }
 0x36c   :  { %2713 = vmatpush3.bf16.msra.mxu1 %v2888_v12 }
 0x36d   :  { %2714 = vmatprep.subr.bf16.mxu1 %v2901_v0 }
 0x370   :  { %2715 = vmatpush3.bf16.msra.mxu1 %v2889_v13 }
 0x371   :  { %2716 = vmatprep.subr.bf16.mxu1 %v2901_v0 }
 0x374   :  { %2717 = vmatpush3.bf16.msra.mxu1 %v2890_v23 }
 0x375   :  { %2718 = vmatprep.subr.bf16.mxu1 %v2901_v0 }
 0x378   :  { %2719 = vmatpush3.bf16.msra.mxu1 %v2891_v15 }
 0x379   :  { %2744 = vmatprep.subr.bf16.mxu1 %v2901_v0 }
 0x37b   :  { %2721 = vmatmul.mubr.bf16.vlgmr.msra.gmra.mxu1 %v2892_v51 }
 0x37c   :  { %2745 = vmatpush3.bf16.msra.mxu1 %v2893_v53  ;;  %2760 = vmatprep.mubr.msk.bf16.mxu1 %vm2902_vm0, %v2901_v0 }
 0x37d   :  { %2746 = vmatprep.subr.bf16.mxu1 %v2901_v0 }
 0x380   :  { %2747 = vmatpush3.bf16.msra.mxu1 %v2894_v55 }
 0x381   :  { %2748 = vmatprep.subr.bf16.mxu1 %v2901_v0 }
 0x384   :  { %2749 = vmatpush3.bf16.msra.mxu1 %v2895_v56 }
 0x385   :  { %2750 = vmatprep.subr.bf16.mxu1 %v2901_v0 }
 0x388   :  { %2751 = vmatpush3.bf16.msra.mxu1 %v2896_v57 }
 0x389   :  { %2752 = vmatprep.subr.bf16.mxu1 %v2901_v0 }
 0x38c   :  { %2753 = vmatpush3.bf16.msra.mxu1 %v2897_v58 }
 0x38d   :  { %2754 = vmatprep.subr.bf16.mxu1 %v2901_v0 }
 0x390   :  { %2755 = vmatpush3.bf16.msra.mxu1 %v2898_v59 }
 0x391   :  { %2756 = vmatprep.subr.bf16.mxu1 %v2901_v0 }
 0x394   :  { %2757 = vmatpush3.bf16.msra.mxu1 %v2899_v60 }
 0x395   :  { %2758 = vmatprep.subr.bf16.mxu1 %v2901_v0 }
 0x398   :  { %2759 = vmatpush3.bf16.msra.mxu1 %v2900_v61 }
 0x39b   :  { %2761 = vmatmul.mubr.bf16.vlgmr.msra.gmra.mxu1 %v2867_v18 }
 0x41b   :  { %v1542_v42 = vpop.f32.mrf.mxu1 }
 0x41c   :  { %v1549_v45 = vadd.f32 %v1542_v42, %v3599_v43 }
 0x41d   :  { %v2682_v34 = vpop.f32.mrf.mxu1 }
 0x41f   :  { %v1545_v47 = vpop.f32.mrf.mxu1 }
 0x420   :  { %v1550_v48 = vadd.f32 %v1545_v47, %v3601_v50 }
 0x421   :  { %v2683_v54 = vpop.f32.mrf.mxu1 }
 0x43b   :  { %v1626_v63 = vpop.f32.mrf.mxu1 }
 0x43c   :  { %v1627_v4 = vadd.f32 %v1626_v63, %v3603_v2 }
 0x43d   :  { %v2722_v6 = vpop.f32.mrf.mxu1 }
 0x43e   :  { %v1674_v5 = vadd.f32 %v3607_v14, %v1627_v4 }
 0x43f   :  { %v1629_v3 = vpop.f32.mrf.mxu1 }
 0x440   :  { %v1630_v0 = vadd.f32 %v1629_v3, %v3605_v1  ;;  %v2063_v1 = vld [vmem:[%s3734_s6] ss:$0 sm:$0xff] }
 0x441   :  { %v2723_v16 = vpop.f32.mrf.mxu1 }
 0x442   :  { %v1675_v43 = vadd.f32 %v3609_v52, %v1630_v0 }
 0x45b   :  { %v1718_v7 = vpop.f32.mrf.mxu1 }
 0x45c   :  { %v1725_v8 = vadd.f32 %v1718_v7, %v1674_v5 }
 0x45d   :  { %v2762_v9 = vpop.f32.mrf.mxu1 }
 0x45e   :  { %v1727_v22 = vadd.f32 %v3434_v46, %v1725_v8 }
 0x45f   :  { %v1721_v35 = vpop.f32.mrf.mxu1 }
 0x460   :  { %v1726_v50 = vadd.f32 %v1721_v35, %v1675_v43  ;;  %v1729_v49 = vmax.f32 %v1727_v22, 0.0 }
 0x461   :  { %v2763_v40 = vpop.f32.mrf.mxu1 }
 0x462   :  { %v1728_v44 = vadd.f32 %v3434_v46, %v1726_v50 }
 0x464   :  { %v1730_v24 = vmax.f32 %v1728_v44, 0.0 }
 0x466   :  { %v1731_v26 = vpack.c.bf16 %v1730_v24, %v1729_v49 }
 0x468   :  { %2781 = vmatmul.mubr.bf16.vlgmr.msra.gmra.mxu0 %v1731_v26 }
 0x528   :  { %v1831_v2 = vpop.f32.mrf.mxu0 }
 0x529   :  { %v1838_v14 = vadd.f32 %v1831_v2, %v1549_v45 }
 0x52a   :  { %v2782_v62 = vpop.f32.mrf.mxu0 }
 0x52b   :  { %v1847_v27 = vadd.f32 %v2063_v1, %v1838_v14 }
 0x52c   :  { %v1834_v52 = vpop.f32.mrf.mxu0 }
 0x52d   :  { %v1849_v17 = vmax.f32 %v1847_v27, 0.0  ;;  %v1839_v29 = vadd.f32 %v1834_v52, %v1550_v48 }
 0x52e   :  { %v2783_v10 = vpop.f32.mrf.mxu0 }
 0x52f   :  { %1851 = vst [vmem:[%s3735_s7] sm:$0xff] %v1849_v17  ;;  %v1848_v46 = vadd.f32 %v2063_v1, %v1839_v29 }
 0x531   :  { %v1850_v19 = vmax.f32 %v1848_v46, 0.0 }
 0x533   :  { %1852 = vst [vmem:[%s3735_s7 + $0x8] sm:$0xff] %v1850_v19 }

</bundles_post_ra>
